<compile_context>
chip_gen: v7x
topology: tpu7x:2x2x1
jax: 0.10.0
libtpu: 0.0.40
codegen_flags: <defaults>
</compile_context>

<pallas_src>
import jax
import jax.numpy as jnp
from jax.experimental import pallas as pl
from jax.experimental.pallas import tpu as pltpu


def _make_pool_readout_kernel(num_graphs, b_pad):
    """Build the fused segment-max-pool + readout kernel."""

    def kernel(glo_ref, ghi_ref, batch_ref, x_ref, w_ref, o_ref,
               hg_ref, parts_ref):
        t = pl.program_id(0)

        @pl.when(t == 0)
        def _init():
            hg_ref[...] = jnp.full_like(hg_ref, -jnp.inf)
            parts_ref[...] = jnp.full_like(parts_ref, -jnp.inf)

        xb = x_ref[...]            # [tile_n, H] float32 node features
        bb = batch_ref[...]        # [tile_n, 1] int32 graph ids (pad rows = -1)

        # Hoist the lane broadcast of the id column out of the per-graph loop:
        # one XLU broadcast per tile, full-width VALU compares per graph.
        bb_full = jnp.broadcast_to(bb, xb.shape)

        g_lo = glo_ref[t]          # range of graph ids present in this tile
        g_hi = ghi_ref[t]

        # Gated masked max per graph.  Graphs not present in this tile are
        # skipped at runtime; their parts_ref rows keep stale values that were
        # already merged into hg (max is idempotent), so the full-block merge
        # below is a no-op for them.  Stale/partial rows of xb (last block)
        # never match because their batch id is -1.
        for g in range(b_pad):
            @pl.when((g_lo <= g) & (g <= g_hi))
            def _do(g=g):
                vals = jnp.where(bb_full == g, xb, -jnp.inf)         # VPU select
                parts_ref[g:g + 1, :] = jnp.max(vals, axis=0,        # XLU reduce
                                                keepdims=True)

        # Single unmasked, (8k,128)-aligned read-modify-write per tile.
        hg_ref[...] = jnp.maximum(hg_ref[...], parts_ref[...])

        @pl.when(t == pl.num_programs(0) - 1)
        def _finalize():
            # readout_mlp: Linear(in_dim, n_classes, bias=False) on the MXU.
            logits = jnp.dot(hg_ref[...], w_ref[...],
                             preferred_element_type=jnp.float32)     # [b_pad, C]
            o_ref[...] = logits[:num_graphs, :]

    return kernel


def no_attention_forward(x, batch, w_readout, num_graphs, *, tile_n=512):
    """global_max_pool(x, batch) @ w_readout, as one fused Pallas kernel.

    x:         [N, in_dim] float32 node features       (data.x)
    batch:     [N] int32 graph id per node              (data.batch)
    w_readout: [in_dim, n_classes] float32 (torch Linear.weight.T, no bias)
    """
    n, h = x.shape
    c = w_readout.shape[1]
    num_tiles = pl.cdiv(n, tile_n)
    n_pad = num_tiles * tile_n
    b_pad = ((num_graphs + 7) // 8) * 8          # sublane-aligned accumulator rows

    batch = batch.astype(jnp.int32)
    # Only the tiny id vector gets padded; pad rows = -1 never match any graph.
    batch_hi = jnp.pad(batch, (0, n_pad - n), constant_values=-1)
    batch_p = batch_hi.reshape(n_pad, 1)

    # Per-tile [g_lo, g_hi] of graph ids present (robust to unsorted batch);
    # scalar-prefetched into SMEM so the kernel can skip absent graphs.
    batch_lo = jnp.pad(batch, (0, n_pad - n), constant_values=num_graphs)
    tile_glo = batch_lo.reshape(num_tiles, tile_n).min(axis=1)
    tile_ghi = batch_hi.reshape(num_tiles, tile_n).max(axis=1)

    kernel = _make_pool_readout_kernel(num_graphs, b_pad)

    return pl.pallas_call(
        kernel,
        out_shape=jax.ShapeDtypeStruct((num_graphs, c), jnp.float32),
        grid_spec=pltpu.PrefetchScalarGridSpec(
            num_scalar_prefetch=2,               # tile_glo, tile_ghi -> SMEM
            grid=(num_tiles,),
            in_specs=[
                pl.BlockSpec((tile_n, 1), lambda t, glo, ghi: (t, 0)),  # ids (streamed)
                pl.BlockSpec((tile_n, h), lambda t, glo, ghi: (t, 0)),  # x (streamed, partial last block)
                pl.BlockSpec((h, c), lambda t, glo, ghi: (0, 0)),       # weight (resident)
            ],
            out_specs=pl.BlockSpec((num_graphs, c), lambda t, glo, ghi: (0, 0)),
            scratch_shapes=[
                pltpu.VMEM((b_pad, h), jnp.float32),   # hg accumulator
                pltpu.VMEM((b_pad, h), jnp.float32),   # per-tile partial maxima
            ],
        ),
        compiler_params=pltpu.CompilerParams(
            dimension_semantics=("arbitrary",)),       # node axis is a reduction
    )(tile_glo, tile_ghi, batch_p, x, w_readout)


# ---------------------------------------------------------------------------
# Pure-JAX reference (same math, no Pallas)
# ---------------------------------------------------------------------------
def reference_forward(x, batch, w_readout, num_graphs):
    hg = jnp.full((num_graphs, x.shape[1]), -jnp.inf, jnp.float32)
    hg = hg.at[batch].max(x)          # segment max == global_max_pool
    return hg @ w_readout             # bias-free readout


if __name__ == "__main__":
    in_dim, n_classes = 128, 10              # module defaults
    nodes_per_graph = [100, 150, 130, 137]   # ragged graphs; N=517 exercises the partial last block
    num_graphs = len(nodes_per_graph)
    n = sum(nodes_per_graph)

    key = jax.random.PRNGKey(0)
    kx, kw = jax.random.split(key)
    x = jax.random.normal(kx, (n, in_dim), jnp.float32)                  # data.x
    batch = jnp.concatenate([jnp.full((m,), g, jnp.int32)
                             for g, m in enumerate(nodes_per_graph)])    # data.batch
    assert int(batch.max()) < num_graphs                                 # precondition
    # nn.Linear(in_dim, n_classes, bias=False) weight, stored transposed.
    w_readout = 0.1 * jax.random.normal(kw, (in_dim, n_classes), jnp.float32)

    out = no_attention_forward(x, batch, w_readout, num_graphs)
    out = jax.block_until_ready(out)

    ref = reference_forward(x, batch, w_readout, num_graphs)
    assert out.shape == (num_graphs, n_classes)
    assert bool(jnp.all(jnp.isfinite(out)))
    assert bool(jnp.allclose(out, ref, atol=1e-4, rtol=1e-4)), "mismatch vs reference"

    print("KERNEL_OK")
</pallas_src>

<mosaic_0001>
module attributes {stable_mosaic.version = 11 : i64} {
  func.func @kernel(%arg0: i32, %arg1: memref<2xi32, #tpu.memory_space<smem>>, %arg2: memref<2xi32, #tpu.memory_space<smem>>, %arg3: memref<512x1xi32, #tpu.memory_space<vmem>>, %arg4: memref<512x128xf32, #tpu.memory_space<vmem>>, %arg5: memref<128x10xf32, #tpu.memory_space<vmem>>, %arg6: memref<4x10xf32, #tpu.memory_space<vmem>>, %arg7: memref<8x128xf32, #tpu.memory_space<vmem>>, %arg8: memref<8x128xf32, #tpu.memory_space<vmem>>) attributes {dimension_semantics = [#tpu.dimension_semantics<arbitrary>], iteration_bounds = array<i64: 2>, scalar_prefetch = 2 : i64, scratch_operands = 2 : i64, tpu.core_type = #tpu.core_type<tc>, window_params = [{transform_indices = @transform_0, window_bounds = array<i64: 512, 1>}, {transform_indices = @transform_1, window_bounds = array<i64: 512, 128>}, {pipeline_mode = #tpu.pipeline_mode<synchronous>, transform_indices = @transform_2, window_bounds = array<i64: 128, 10>}, {pipeline_mode = #tpu.pipeline_mode<synchronous>, transform_indices = @transform_3, window_bounds = array<i64: 4, 10>}]} {
    %c0_i32 = arith.constant 0 : i32
    %0 = arith.cmpi eq, %arg0, %c0_i32 : i32
    %1 = arith.extui %0 : i1 to i32
    %c0_i32_0 = arith.constant 0 : i32
    %2 = arith.cmpi ne, %1, %c0_i32_0 : i32
    scf.if %2 {
      %cst = arith.constant 0xFF800000 : f32
      %58 = vector.broadcast %cst : f32 to vector<8x128xf32>
      %c0_29 = arith.constant 0 : index
      %c0_30 = arith.constant 0 : index
      %59 = vector.load %arg7[%c0_29, %c0_30] : memref<8x128xf32, #tpu.memory_space<vmem>>, vector<8x128xf32>
      tpu.vector_store %arg7[%c0_29, %c0_30], %58 {strides = array<i32>} : memref<8x128xf32, #tpu.memory_space<vmem>>, vector<8x128xf32>,
      %cst_31 = arith.constant 0xFF800000 : f32
      %60 = vector.broadcast %cst_31 : f32 to vector<8x128xf32>
      %c0_32 = arith.constant 0 : index
      %c0_33 = arith.constant 0 : index
      %61 = vector.load %arg8[%c0_32, %c0_33] : memref<8x128xf32, #tpu.memory_space<vmem>>, vector<8x128xf32>
      tpu.vector_store %arg8[%c0_32, %c0_33], %60 {strides = array<i32>} : memref<8x128xf32, #tpu.memory_space<vmem>>, vector<8x128xf32>,
    } else {
    }
    %c0 = arith.constant 0 : index
    %c0_1 = arith.constant 0 : index
    %3 = vector.load %arg4[%c0, %c0_1] : memref<512x128xf32, #tpu.memory_space<vmem>>, vector<512x128xf32>
    %c0_2 = arith.constant 0 : index
    %c0_3 = arith.constant 0 : index
    %4 = vector.load %arg3[%c0_2, %c0_3] : memref<512x1xi32, #tpu.memory_space<vmem>>, vector<512x1xi32>
    %5 = vector.shape_cast %4 : vector<512x1xi32> to vector<512x1xi32>
    %6 = vector.broadcast %5 : vector<512x1xi32> to vector<512x128xi32>
    %7 = arith.index_cast %arg0 : i32 to index
    %8 = memref.load %arg1[%7] : memref<2xi32, #tpu.memory_space<smem>>
    %9 = arith.index_cast %arg0 : i32 to index
    %10 = memref.load %arg2[%9] : memref<2xi32, #tpu.memory_space<smem>>
    %c0_i32_4 = arith.constant 0 : i32
    %11 = arith.cmpi sle, %8, %c0_i32_4 : i32
    %c0_i32_5 = arith.constant 0 : i32
    %12 = arith.cmpi sge, %10, %c0_i32_5 : i32
    %13 = arith.andi %11, %12 : i1
    %14 = arith.extui %13 : i1 to i32
    %c0_i32_6 = arith.constant 0 : i32
    %15 = arith.cmpi ne, %14, %c0_i32_6 : i32
    scf.if %15 {
      %c0_i32_29 = arith.constant 0 : i32
      %58 = vector.broadcast %c0_i32_29 : i32 to vector<512x128xi32>
      %59 = arith.cmpi eq, %6, %58 : vector<512x128xi32>
      %cst = arith.constant 0xFF800000 : f32
      %60 = vector.broadcast %cst : f32 to vector<512x128xf32>
      %61 = arith.select %59, %3, %60 : vector<512x128xi1>, vector<512x128xf32>
      %cst_30 = arith.constant dense<0xFF800000> : vector<128xf32>
      %62 = vector.multi_reduction <maximumf>, %61, %cst_30 [0] : vector<512x128xf32> to vector<128xf32>
      %63 = vector.shape_cast %62 : vector<128xf32> to vector<1x128xf32>
      %c0_31 = arith.constant 0 : index
      %c0_32 = arith.constant 0 : index
      %64 = vector.load %arg8[%c0_31, %c0_32] : memref<8x128xf32, #tpu.memory_space<vmem>>, vector<1x128xf32>
      tpu.vector_store %arg8[%c0_31, %c0_32], %63 {strides = array<i32>} : memref<8x128xf32, #tpu.memory_space<vmem>>, vector<1x128xf32>,
    } else {
    }
    %c1_i32 = arith.constant 1 : i32
    %16 = arith.cmpi sle, %8, %c1_i32 : i32
    %c1_i32_7 = arith.constant 1 : i32
    %17 = arith.cmpi sge, %10, %c1_i32_7 : i32
    %18 = arith.andi %16, %17 : i1
    %19 = arith.extui %18 : i1 to i32
    %c0_i32_8 = arith.constant 0 : i32
    %20 = arith.cmpi ne, %19, %c0_i32_8 : i32
    scf.if %20 {
      %c1_i32_29 = arith.constant 1 : i32
      %58 = vector.broadcast %c1_i32_29 : i32 to vector<512x128xi32>
      %59 = arith.cmpi eq, %6, %58 : vector<512x128xi32>
      %cst = arith.constant 0xFF800000 : f32
      %60 = vector.broadcast %cst : f32 to vector<512x128xf32>
      %61 = arith.select %59, %3, %60 : vector<512x128xi1>, vector<512x128xf32>
      %cst_30 = arith.constant dense<0xFF800000> : vector<128xf32>
      %62 = vector.multi_reduction <maximumf>, %61, %cst_30 [0] : vector<512x128xf32> to vector<128xf32>
      %63 = vector.shape_cast %62 : vector<128xf32> to vector<1x128xf32>
      %c1 = arith.constant 1 : index
      %c0_31 = arith.constant 0 : index
      %64 = vector.load %arg8[%c1, %c0_31] : memref<8x128xf32, #tpu.memory_space<vmem>>, vector<1x128xf32>
      tpu.vector_store %arg8[%c1, %c0_31], %63 {strides = array<i32>} : memref<8x128xf32, #tpu.memory_space<vmem>>, vector<1x128xf32>,
    } else {
    }
    %c2_i32 = arith.constant 2 : i32
    %21 = arith.cmpi sle, %8, %c2_i32 : i32
    %c2_i32_9 = arith.constant 2 : i32
    %22 = arith.cmpi sge, %10, %c2_i32_9 : i32
    %23 = arith.andi %21, %22 : i1
    %24 = arith.extui %23 : i1 to i32
    %c0_i32_10 = arith.constant 0 : i32
    %25 = arith.cmpi ne, %24, %c0_i32_10 : i32
    scf.if %25 {
      %c2_i32_29 = arith.constant 2 : i32
      %58 = vector.broadcast %c2_i32_29 : i32 to vector<512x128xi32>
      %59 = arith.cmpi eq, %6, %58 : vector<512x128xi32>
      %cst = arith.constant 0xFF800000 : f32
      %60 = vector.broadcast %cst : f32 to vector<512x128xf32>
      %61 = arith.select %59, %3, %60 : vector<512x128xi1>, vector<512x128xf32>
      %cst_30 = arith.constant dense<0xFF800000> : vector<128xf32>
      %62 = vector.multi_reduction <maximumf>, %61, %cst_30 [0] : vector<512x128xf32> to vector<128xf32>
      %63 = vector.shape_cast %62 : vector<128xf32> to vector<1x128xf32>
      %c2 = arith.constant 2 : index
      %c0_31 = arith.constant 0 : index
      %64 = vector.load %arg8[%c2, %c0_31] : memref<8x128xf32, #tpu.memory_space<vmem>>, vector<1x128xf32>
      tpu.vector_store %arg8[%c2, %c0_31], %63 {strides = array<i32>} : memref<8x128xf32, #tpu.memory_space<vmem>>, vector<1x128xf32>,
    } else {
    }
    %c3_i32 = arith.constant 3 : i32
    %26 = arith.cmpi sle, %8, %c3_i32 : i32
    %c3_i32_11 = arith.constant 3 : i32
    %27 = arith.cmpi sge, %10, %c3_i32_11 : i32
    %28 = arith.andi %26, %27 : i1
    %29 = arith.extui %28 : i1 to i32
    %c0_i32_12 = arith.constant 0 : i32
    %30 = arith.cmpi ne, %29, %c0_i32_12 : i32
    scf.if %30 {
      %c3_i32_29 = arith.constant 3 : i32
      %58 = vector.broadcast %c3_i32_29 : i32 to vector<512x128xi32>
      %59 = arith.cmpi eq, %6, %58 : vector<512x128xi32>
      %cst = arith.constant 0xFF800000 : f32
      %60 = vector.broadcast %cst : f32 to vector<512x128xf32>
      %61 = arith.select %59, %3, %60 : vector<512x128xi1>, vector<512x128xf32>
      %cst_30 = arith.constant dense<0xFF800000> : vector<128xf32>
      %62 = vector.multi_reduction <maximumf>, %61, %cst_30 [0] : vector<512x128xf32> to vector<128xf32>
      %63 = vector.shape_cast %62 : vector<128xf32> to vector<1x128xf32>
      %c3 = arith.constant 3 : index
      %c0_31 = arith.constant 0 : index
      %64 = vector.load %arg8[%c3, %c0_31] : memref<8x128xf32, #tpu.memory_space<vmem>>, vector<1x128xf32>
      tpu.vector_store %arg8[%c3, %c0_31], %63 {strides = array<i32>} : memref<8x128xf32, #tpu.memory_space<vmem>>, vector<1x128xf32>,
    } else {
    }
    %c4_i32 = arith.constant 4 : i32
    %31 = arith.cmpi sle, %8, %c4_i32 : i32
    %c4_i32_13 = arith.constant 4 : i32
    %32 = arith.cmpi sge, %10, %c4_i32_13 : i32
    %33 = arith.andi %31, %32 : i1
    %34 = arith.extui %33 : i1 to i32
    %c0_i32_14 = arith.constant 0 : i32
    %35 = arith.cmpi ne, %34, %c0_i32_14 : i32
    scf.if %35 {
      %c4_i32_29 = arith.constant 4 : i32
      %58 = vector.broadcast %c4_i32_29 : i32 to vector<512x128xi32>
      %59 = arith.cmpi eq, %6, %58 : vector<512x128xi32>
      %cst = arith.constant 0xFF800000 : f32
      %60 = vector.broadcast %cst : f32 to vector<512x128xf32>
      %61 = arith.select %59, %3, %60 : vector<512x128xi1>, vector<512x128xf32>
      %cst_30 = arith.constant dense<0xFF800000> : vector<128xf32>
      %62 = vector.multi_reduction <maximumf>, %61, %cst_30 [0] : vector<512x128xf32> to vector<128xf32>
      %63 = vector.shape_cast %62 : vector<128xf32> to vector<1x128xf32>
      %c4 = arith.constant 4 : index
      %c0_31 = arith.constant 0 : index
      %64 = vector.load %arg8[%c4, %c0_31] : memref<8x128xf32, #tpu.memory_space<vmem>>, vector<1x128xf32>
      tpu.vector_store %arg8[%c4, %c0_31], %63 {strides = array<i32>} : memref<8x128xf32, #tpu.memory_space<vmem>>, vector<1x128xf32>,
    } else {
    }
    %c5_i32 = arith.constant 5 : i32
    %36 = arith.cmpi sle, %8, %c5_i32 : i32
    %c5_i32_15 = arith.constant 5 : i32
    %37 = arith.cmpi sge, %10, %c5_i32_15 : i32
    %38 = arith.andi %36, %37 : i1
    %39 = arith.extui %38 : i1 to i32
    %c0_i32_16 = arith.constant 0 : i32
    %40 = arith.cmpi ne, %39, %c0_i32_16 : i32
    scf.if %40 {
      %c5_i32_29 = arith.constant 5 : i32
      %58 = vector.broadcast %c5_i32_29 : i32 to vector<512x128xi32>
      %59 = arith.cmpi eq, %6, %58 : vector<512x128xi32>
      %cst = arith.constant 0xFF800000 : f32
      %60 = vector.broadcast %cst : f32 to vector<512x128xf32>
      %61 = arith.select %59, %3, %60 : vector<512x128xi1>, vector<512x128xf32>
      %cst_30 = arith.constant dense<0xFF800000> : vector<128xf32>
      %62 = vector.multi_reduction <maximumf>, %61, %cst_30 [0] : vector<512x128xf32> to vector<128xf32>
      %63 = vector.shape_cast %62 : vector<128xf32> to vector<1x128xf32>
      %c5 = arith.constant 5 : index
      %c0_31 = arith.constant 0 : index
      %64 = vector.load %arg8[%c5, %c0_31] : memref<8x128xf32, #tpu.memory_space<vmem>>, vector<1x128xf32>
      tpu.vector_store %arg8[%c5, %c0_31], %63 {strides = array<i32>} : memref<8x128xf32, #tpu.memory_space<vmem>>, vector<1x128xf32>,
    } else {
    }
    %c6_i32 = arith.constant 6 : i32
    %41 = arith.cmpi sle, %8, %c6_i32 : i32
    %c6_i32_17 = arith.constant 6 : i32
    %42 = arith.cmpi sge, %10, %c6_i32_17 : i32
    %43 = arith.andi %41, %42 : i1
    %44 = arith.extui %43 : i1 to i32
    %c0_i32_18 = arith.constant 0 : i32
    %45 = arith.cmpi ne, %44, %c0_i32_18 : i32
    scf.if %45 {
      %c6_i32_29 = arith.constant 6 : i32
      %58 = vector.broadcast %c6_i32_29 : i32 to vector<512x128xi32>
      %59 = arith.cmpi eq, %6, %58 : vector<512x128xi32>
      %cst = arith.constant 0xFF800000 : f32
      %60 = vector.broadcast %cst : f32 to vector<512x128xf32>
      %61 = arith.select %59, %3, %60 : vector<512x128xi1>, vector<512x128xf32>
      %cst_30 = arith.constant dense<0xFF800000> : vector<128xf32>
      %62 = vector.multi_reduction <maximumf>, %61, %cst_30 [0] : vector<512x128xf32> to vector<128xf32>
      %63 = vector.shape_cast %62 : vector<128xf32> to vector<1x128xf32>
      %c6 = arith.constant 6 : index
      %c0_31 = arith.constant 0 : index
      %64 = vector.load %arg8[%c6, %c0_31] : memref<8x128xf32, #tpu.memory_space<vmem>>, vector<1x128xf32>
      tpu.vector_store %arg8[%c6, %c0_31], %63 {strides = array<i32>} : memref<8x128xf32, #tpu.memory_space<vmem>>, vector<1x128xf32>,
    } else {
    }
    %c7_i32 = arith.constant 7 : i32
    %46 = arith.cmpi sle, %8, %c7_i32 : i32
    %c7_i32_19 = arith.constant 7 : i32
    %47 = arith.cmpi sge, %10, %c7_i32_19 : i32
    %48 = arith.andi %46, %47 : i1
    %49 = arith.extui %48 : i1 to i32
    %c0_i32_20 = arith.constant 0 : i32
    %50 = arith.cmpi ne, %49, %c0_i32_20 : i32
    scf.if %50 {
      %c7_i32_29 = arith.constant 7 : i32
      %58 = vector.broadcast %c7_i32_29 : i32 to vector<512x128xi32>
      %59 = arith.cmpi eq, %6, %58 : vector<512x128xi32>
      %cst = arith.constant 0xFF800000 : f32
      %60 = vector.broadcast %cst : f32 to vector<512x128xf32>
      %61 = arith.select %59, %3, %60 : vector<512x128xi1>, vector<512x128xf32>
      %cst_30 = arith.constant dense<0xFF800000> : vector<128xf32>
      %62 = vector.multi_reduction <maximumf>, %61, %cst_30 [0] : vector<512x128xf32> to vector<128xf32>
      %63 = vector.shape_cast %62 : vector<128xf32> to vector<1x128xf32>
      %c7 = arith.constant 7 : index
      %c0_31 = arith.constant 0 : index
      %64 = vector.load %arg8[%c7, %c0_31] : memref<8x128xf32, #tpu.memory_space<vmem>>, vector<1x128xf32>
      tpu.vector_store %arg8[%c7, %c0_31], %63 {strides = array<i32>} : memref<8x128xf32, #tpu.memory_space<vmem>>, vector<1x128xf32>,
    } else {
    }
    %c0_21 = arith.constant 0 : index
    %c0_22 = arith.constant 0 : index
    %51 = vector.load %arg7[%c0_21, %c0_22] : memref<8x128xf32, #tpu.memory_space<vmem>>, vector<8x128xf32>
    %c0_23 = arith.constant 0 : index
    %c0_24 = arith.constant 0 : index
    %52 = vector.load %arg8[%c0_23, %c0_24] : memref<8x128xf32, #tpu.memory_space<vmem>>, vector<8x128xf32>
    %53 = arith.maximumf %51, %52 : vector<8x128xf32>
    %c0_25 = arith.constant 0 : index
    %c0_26 = arith.constant 0 : index
    %54 = vector.load %arg7[%c0_25, %c0_26] : memref<8x128xf32, #tpu.memory_space<vmem>>, vector<8x128xf32>
    tpu.vector_store %arg7[%c0_25, %c0_26], %53 {strides = array<i32>} : memref<8x128xf32, #tpu.memory_space<vmem>>, vector<8x128xf32>,
    %c1_i32_27 = arith.constant 1 : i32
    %55 = arith.cmpi eq, %arg0, %c1_i32_27 : i32
    %56 = arith.extui %55 : i1 to i32
    %c0_i32_28 = arith.constant 0 : i32
    %57 = arith.cmpi ne, %56, %c0_i32_28 : i32
    scf.if %57 {
      %c0_29 = arith.constant 0 : index
      %c0_30 = arith.constant 0 : index
      %58 = vector.load %arg7[%c0_29, %c0_30] : memref<8x128xf32, #tpu.memory_space<vmem>>, vector<8x128xf32>
      %c0_31 = arith.constant 0 : index
      %c0_32 = arith.constant 0 : index
      %59 = vector.load %arg5[%c0_31, %c0_32] : memref<128x10xf32, #tpu.memory_space<vmem>>, vector<128x10xf32>
      %cst = arith.constant dense<0.000000e+00> : vector<8x10xf32>
      %60 = tpu.matmul %58, %59, %cst {dimension_numbers = #tpu.dot_dimension_numbers<[1], [0], [0], [1], [0, 0, 1, 1], [], []>} : vector<8x128xf32>, vector<128x10xf32>, vector<8x10xf32> -> vector<8x10xf32>
      %61 = vector.extract_strided_slice %60 {offsets = [0, 0], sizes = [4, 10], strides = [1, 1]} : vector<8x10xf32> to vector<4x10xf32>
      %c0_33 = arith.constant 0 : index
      %c0_34 = arith.constant 0 : index
      %62 = vector.load %arg6[%c0_33, %c0_34] : memref<4x10xf32, #tpu.memory_space<vmem>>, vector<4x10xf32>
      tpu.vector_store %arg6[%c0_33, %c0_34], %61 {strides = array<i32>} : memref<4x10xf32, #tpu.memory_space<vmem>>, vector<4x10xf32>,
    } else {
    }
    return
  }
  func.func @transform_0(%arg0: i32, %arg1: memref<2xi32, #tpu.memory_space<smem>>, %arg2: memref<2xi32, #tpu.memory_space<smem>>) -> (i32, i32) {
    %c0_i32 = arith.constant 0 : i32
    %c0_i32_0 = arith.constant 0 : i32
    return %arg0, %c0_i32 : i32, i32
  }
  func.func @transform_1(%arg0: i32, %arg1: memref<2xi32, #tpu.memory_space<smem>>, %arg2: memref<2xi32, #tpu.memory_space<smem>>) -> (i32, i32) {
    %c0_i32 = arith.constant 0 : i32
    %c0_i32_0 = arith.constant 0 : i32
    return %arg0, %c0_i32 : i32, i32
  }
  func.func @transform_2(%arg0: i32, %arg1: memref<2xi32, #tpu.memory_space<smem>>, %arg2: memref<2xi32, #tpu.memory_space<smem>>) -> (i32, i32) {
    %c0_i32 = arith.constant 0 : i32
    %c0_i32_0 = arith.constant 0 : i32
    %c0_i32_1 = arith.constant 0 : i32
    return %c0_i32, %c0_i32_0 : i32, i32
  }
  func.func @transform_3(%arg0: i32, %arg1: memref<2xi32, #tpu.memory_space<smem>>, %arg2: memref<2xi32, #tpu.memory_space<smem>>) -> (i32, i32) {
    %c0_i32 = arith.constant 0 : i32
    %c0_i32_0 = arith.constant 0 : i32
    %c0_i32_1 = arith.constant 0 : i32
    return %c0_i32, %c0_i32_0 : i32, i32
  }
}

</mosaic_0001>

<bundles_post_ra>
// kernel: tpu_custom_call.1
= control target key start
LH: loop header
LB: loop body
LE: loop exit
PB: predicated region body
PF: predicated region fallthrough
CT: control target
= control target key end

     0   :  { %s5107_s0 = inlined_call_operand.vmem [shape: s32[2], index: 0, kind: input, shape index: {}]   ;;  %s5108_s2 = inlined_call_operand.vmem [shape: s32[1024,1], index: 2, kind: input, shape index: {}]   ;;  %s5109_s3 = inlined_call_operand.vmem [shape: f32[517,128], index: 3, kind: input, shape index: {}]   ;;  %s5110_s4 = inlined_call_operand.vmem [shape: f32[128,10], index: 4, kind: input, shape index: {}]   ;;  %s5111_s5 = inlined_call_operand.hbm [shape: f32[4,10], index: 5, kind: output, shape index: {}]   ;;  %s5112_s1 = inlined_call_operand.vmem [shape: s32[2], index: 1, kind: input, shape index: {}]  }
   0x1   :  { %s10_s20 = sshll.u32 %s5107_s0, 4  ;;  %s14_s23 = sshll.u32 %s5112_s1, 4  ;;  %s11_s20 = int_to_ptr.vmem [resolvable:$true] %s10_s20  ;;  %s15_s23 = int_to_ptr.vmem [resolvable:$true] %s14_s23 }
   0x2   :  { %s2442_s24 = scalar_lea.vmem %s11_s20, 16  ;;  %p2447_p1 = scmp.lt.s32.totalorder %s11_s20, %s11_s20 }
   0x3   :  { %p2443_p0 = scmp.ne.s32.totalorder %s11_s20, %s2442_s24  ;;  %p2448_p2 = scmp.lt.s32.totalorder %s2442_s24, %s2442_s24 }
   0x5   :  { %p2449_p3 = por %p2448_p2, %p2447_p1 }
   0x7   :  { %p2450_p4 = pnand %p2449_p3, %p2443_p0 }
   0x9   :  { %2453 = shalt.err (!%p2450_p4)  }
   0xa   :  { %s2506_s25 = smov [#allocation5]   ;;  %s2454_s26 = scalar_lea.vmem %s15_s23, 16 }
   0xb   :  { %13 = dma.vmem_to_smem %s11_s20, 16, %s2506_s25, [#allocation4] }
   0xc   :  { %p2455_p5 = scmp.ne.s32.totalorder %s15_s23, %s2454_s26  ;;  %p2459_p6 = scmp.lt.s32.totalorder %s15_s23, %s15_s23 }
   0xd   :  { %p2460_p7 = scmp.lt.s32.totalorder %s2454_s26, %s2454_s26 }
   0xf   :  { %p2461_p8 = por %p2460_p7, %p2459_p6 }
  0x11   :  { %p2462_p9 = pnand %p2461_p8, %p2455_p5 }
  0x13   :  { %2465 = shalt.err (!%p2462_p9)  }
  0x14   :  { %s2507_s0 = smov [#allocation6]  }
  0x15   :  { %17 = dma.vmem_to_smem %s15_s23, 16, %s2507_s0, [#allocation4] }
  0x16   :  { %2496 = dma.done.wait [#allocation4], 32 }
  0x17   :  { %2497 = vsyncadd [#allocation4], 4294967264 }
  0x18   :  { %19 = sfence }
  0x19   :  { %20 = vsyncpa [#allocation8], 0  ;;  %s2550_s1 = smov 0  }
  0x1a LB: > { %s2556_s27 = sadd.s32 4294967295, %s2504_s1   ;;  %p2331_p10 = scmp.ge.s32.totalorder %s2504_s1, 1  ;;  %s2504_s1 = sphi %s2550_s1, %s26_s1  }
  0x1b   : > { %p165_p11 = scmp.lt.s32.totalorder %s2504_s1, 3 }
  0x1d   : > { %p166_p12 = pnand %p2331_p10, %p165_p11 }
  0x1f   : > { %169 = sbr.rel (%p166_p12) target bundleno = 1145 (0x479), region = 32 }
  0x26   : > { %s2332_s28 = sshll.u32 %s2556_s27, 6  ;;  %p2336_p1 = scmp.ne.s32.totalorder %s2556_s27, 0 }
  0x27   : > { %p194_p13 = scmp.lt.s32.totalorder %s2332_s28, 127  ;;  %p204_p0 = scmp.lt.s32.totalorder %s2332_s28, 64  ;;  %v2508_v0 = vmov (!%p2336_p1), -inf  }
  0x28   : > { %216 = sbr.rel (%p2336_p1) target bundleno = 47 (0x2f), region = 36  ;;  %217 = vst [vmem:[#allocation2] sm:$0xff] (!%p2336_p1), %v2508_v0  ;;  %218 = vst [vmem:[#allocation3] sm:$0xff] (!%p2336_p1), %v2508_v0 }
  0x29   : > { %s195_s29 = scalar_select %p194_p13, %s2332_s28, 127 }
  0x2a   : > { %s6656_s28 = smov (!%p204_p0, %s2332_s28), 64 }
  0x2b   : > { %s2333_s30 = sshll.u32 %s195_s29, 3  ;;  %s2335_s9 = sshll.u32 %s6656_s28, 3 }
  0x2c   : > { %s2564_s8 = scalar_lea.vmem %s5108_s2, %s2333_s30  ;;  %s2569_s12 = scalar_lea.vmem %s5109_s3, %s2335_s9 }
  0x2f PF: > { %v285_v1 = vld [vmem:[%s2564_s8 + $0x10] sm:$0xff]  ;;  %v283_v2 = vld [vmem:[%s2564_s8] sm:$0xff]  ;;  %v2509_v3 = vmov 0   ;;  %v286_v4 = vld [vmem:[%s2564_s8 + $0x18] sm:$0xff]  ;;  %s2633_s13 = sld [smem:[#allocation5 + %s2556_s27]] }
  0x30   : > { %2441 = vset.pattern.permute.xlu1 %v2509_v3  ;;  %2440 = vset.pattern.permute.xlu0 %v2509_v3  ;;  %v284_v5 = vld [vmem:[%s2564_s8 + $0x8] sm:$0xff]  ;;  %v287_v7 = vld [vmem:[%s2564_s8 + $0x20] sm:$0xff]  ;;  %v290_v8 = vld [vmem:[%s2564_s8 + $0x38] sm:$0xff]  ;;  %s2636_s14 = sld [smem:[#allocation6 + %s2556_s27]] }
  0x31   : > { %354 = vperm.xlu1 %2441, %v285_v1   ;;  %348 = vperm.xlu0 %2440, %v283_v2   ;;  %v288_v6 = vld [vmem:[%s2564_s8 + $0x28] sm:$0xff]  ;;  %v289_v9 = vld [vmem:[%s2564_s8 + $0x30] sm:$0xff]  ;;  %v291_v11 = vld [vmem:[%s2564_s8 + $0x40] sm:$0xff] }
  0x32   : > { %v292_v10 = vld [vmem:[%s2564_s8 + $0x48] sm:$0xff]  ;;  %v294_v12 = vld [vmem:[%s2564_s8 + $0x58] sm:$0xff]  ;;  %v293_v13 = vld [vmem:[%s2564_s8 + $0x50] sm:$0xff] }
  0x33   : > { %v296_v14 = vld [vmem:[%s2564_s8 + $0x68] sm:$0xff]  ;;  %v295_v15 = vld [vmem:[%s2564_s8 + $0x60] sm:$0xff]  ;;  %v298_v16 = vld [vmem:[%s2564_s8 + $0x78] sm:$0xff] }
  0x34   : > { %v297_v17 = vld [vmem:[%s2564_s8 + $0x70] sm:$0xff]  ;;  %v300_v18 = vld [vmem:[%s2564_s8 + $0x88] sm:$0xff]  ;;  %v299_v19 = vld [vmem:[%s2564_s8 + $0x80] sm:$0xff] }
  0x35   : > { %357 = vperm.xlu1 %2441, %v286_v4   ;;  %351 = vperm.xlu0 %2440, %v284_v5   ;;  %v302_v20 = vld [vmem:[%s2564_s8 + $0x98] sm:$0xff]  ;;  %v301_v21 = vld [vmem:[%s2564_s8 + $0x90] sm:$0xff]  ;;  %v304_v22 = vld [vmem:[%s2564_s8 + $0xa8] sm:$0xff]  ;;  %p541_p2 = scmp.le.s32.totalorder %s2633_s13, 0 }
  0x36   : > { %v303_v23 = vld [vmem:[%s2564_s8 + $0xa0] sm:$0xff]  ;;  %v306_v24 = vld [vmem:[%s2564_s8 + $0xb8] sm:$0xff]  ;;  %v305_v25 = vld [vmem:[%s2564_s8 + $0xb0] sm:$0xff]  ;;  %p542_p3 = scmp.ge.s32.totalorder %s2636_s14, 0 }
  0x37   : > { %v308_v26 = vld [vmem:[%s2564_s8 + $0xc8] sm:$0xff]  ;;  %v307_v27 = vld [vmem:[%s2564_s8 + $0xc0] sm:$0xff]  ;;  %v310_v28 = vld [vmem:[%s2564_s8 + $0xd8] sm:$0xff] }
  0x38   : > { %v309_v29 = vld [vmem:[%s2564_s8 + $0xd0] sm:$0xff]  ;;  %v312_v30 = vld [vmem:[%s2564_s8 + $0xe8] sm:$0xff]  ;;  %v311_v31 = vld [vmem:[%s2564_s8 + $0xe0] sm:$0xff]  ;;  %p2653_p4 = pnand %p542_p3, %p541_p2 }
  0x39   : > { %363 = vperm.xlu1 %2441, %v288_v6   ;;  %360 = vperm.xlu0 %2440, %v287_v7   ;;  %v314_v32 = vld [vmem:[%s2564_s8 + $0xf8] sm:$0xff]  ;;  %v313_v33 = vld [vmem:[%s2564_s8 + $0xf0] sm:$0xff]  ;;  %v316_v34 = vld [vmem:[%s2564_s8 + $0x108] sm:$0xff] }
  0x3a   : > { %v315_v35 = vld [vmem:[%s2564_s8 + $0x100] sm:$0xff]  ;;  %v318_v36 = vld [vmem:[%s2564_s8 + $0x118] sm:$0xff]  ;;  %v317_v37 = vld [vmem:[%s2564_s8 + $0x110] sm:$0xff] }
  0x3b   : > { %v320_v38 = vld [vmem:[%s2564_s8 + $0x128] sm:$0xff]  ;;  %v319_v39 = vld [vmem:[%s2564_s8 + $0x120] sm:$0xff]  ;;  %v322_v40 = vld [vmem:[%s2564_s8 + $0x138] sm:$0xff] }
  0x3c   : > { %v321_v41 = vld [vmem:[%s2564_s8 + $0x130] sm:$0xff]  ;;  %v324_v42 = vld [vmem:[%s2564_s8 + $0x148] sm:$0xff]  ;;  %v323_v43 = vld [vmem:[%s2564_s8 + $0x140] sm:$0xff] }
  0x3d   : > { %369 = vperm.xlu1 %2441, %v290_v8   ;;  %366 = vperm.xlu0 %2440, %v289_v9   ;;  %v326_v44 = vld [vmem:[%s2564_s8 + $0x158] sm:$0xff]  ;;  %v325_v45 = vld [vmem:[%s2564_s8 + $0x150] sm:$0xff]  ;;  %v328_v46 = vld [vmem:[%s2564_s8 + $0x168] sm:$0xff] }
  0x3e   : > { %v327_v47 = vld [vmem:[%s2564_s8 + $0x160] sm:$0xff]  ;;  %v330_v48 = vld [vmem:[%s2564_s8 + $0x178] sm:$0xff]  ;;  %v329_v49 = vld [vmem:[%s2564_s8 + $0x170] sm:$0xff] }
  0x3f   : > { %v332_v50 = vld [vmem:[%s2564_s8 + $0x188] sm:$0xff]  ;;  %v331_v51 = vld [vmem:[%s2564_s8 + $0x180] sm:$0xff]  ;;  %v334_v52 = vld [vmem:[%s2564_s8 + $0x198] sm:$0xff] }
  0x40   : > { %v333_v53 = vld [vmem:[%s2564_s8 + $0x190] sm:$0xff]  ;;  %v336_v54 = vld [vmem:[%s2564_s8 + $0x1a8] sm:$0xff]  ;;  %v335_v55 = vld [vmem:[%s2564_s8 + $0x1a0] sm:$0xff] }
  0x41   : > { %375 = vperm.xlu1 %2441, %v292_v10   ;;  %372 = vperm.xlu0 %2440, %v291_v11   ;;  %v338_v56 = vld [vmem:[%s2564_s8 + $0x1b8] sm:$0xff]  ;;  %v337_v57 = vld [vmem:[%s2564_s8 + $0x1b0] sm:$0xff]  ;;  %v340_v58 = vld [vmem:[%s2564_s8 + $0x1c8] sm:$0xff] }
  0x42   : > { %v339_v59 = vld [vmem:[%s2564_s8 + $0x1c0] sm:$0xff]  ;;  %v342_v60 = vld [vmem:[%s2564_s8 + $0x1d8] sm:$0xff]  ;;  %v341_v61 = vld [vmem:[%s2564_s8 + $0x1d0] sm:$0xff] }
  0x43   : > { %v344_v62 = vld [vmem:[%s2564_s8 + $0x1e8] sm:$0xff]  ;;  %v343_v63 = vld [vmem:[%s2564_s8 + $0x1e0] sm:$0xff]  ;;  %v346_v0 = vld [vmem:[%s2564_s8 + $0x1f8] sm:$0xff] }
  0x44   : > { %v345_v1 = vld [vmem:[%s2564_s8 + $0x1f0] sm:$0xff]  ;;  %v2645_v2 = vld [vmem:[%s2569_s12] sm:$0xff]  ;;  %v2648_v3 = vld [vmem:[%s2569_s12 + $0x8] sm:$0xff] }
  0x45   : > { %381 = vperm.xlu1 %2441, %v294_v12   ;;  %378 = vperm.xlu0 %2440, %v293_v13   ;;  %5465 = vst [vmem:[#allocation11_spill] sm:$0xff] %v2645_v2  ;;  %5466 = vst [vmem:[#allocation12_spill] sm:$0xff] %v2648_v3  ;;  %v2651_v4 = vld [vmem:[%s2569_s12 + $0x10] sm:$0xff]  ;;  %v2658_v5 = vld [vmem:[%s2569_s12 + $0x18] sm:$0xff] }
  0x46   : > { %5467 = vst [vmem:[#allocation13_spill] sm:$0xff] %v2651_v4  ;;  %5469 = vst [vmem:[#allocation14_spill] sm:$0xff] %v2658_v5  ;;  %v2661_v6 = vld [vmem:[%s2569_s12 + $0x20] sm:$0xff]  ;;  %v2664_v7 = vld [vmem:[%s2569_s12 + $0x28] sm:$0xff] }
  0x47   : > { %5470 = vst [vmem:[#allocation15_spill] sm:$0xff] %v2661_v6  ;;  %5471 = vst [vmem:[#allocation16_spill] sm:$0xff] %v2664_v7  ;;  %v2667_v8 = vld [vmem:[%s2569_s12 + $0x30] sm:$0xff]  ;;  %v2670_v9 = vld [vmem:[%s2569_s12 + $0x38] sm:$0xff] }
  0x48   : > { %5472 = vst [vmem:[#allocation17_spill] sm:$0xff] %v2667_v8  ;;  %5473 = vst [vmem:[#allocation18_spill] sm:$0xff] %v2670_v9  ;;  %v2673_v10 = vld [vmem:[%s2569_s12 + $0x40] sm:$0xff]  ;;  %v2676_v11 = vld [vmem:[%s2569_s12 + $0x48] sm:$0xff] }
  0x49   : > { %387 = vperm.xlu1 %2441, %v296_v14   ;;  %384 = vperm.xlu0 %2440, %v295_v15   ;;  %5474 = vst [vmem:[#allocation19_spill] sm:$0xff] %v2673_v10  ;;  %5475 = vst [vmem:[#allocation20_spill] sm:$0xff] %v2676_v11  ;;  %v2679_v12 = vld [vmem:[%s2569_s12 + $0x50] sm:$0xff]  ;;  %v2682_v13 = vld [vmem:[%s2569_s12 + $0x58] sm:$0xff] }
  0x4a   : > { %5476 = vst [vmem:[#allocation21_spill] sm:$0xff] %v2679_v12  ;;  %5477 = vst [vmem:[#allocation22_spill] sm:$0xff] %v2682_v13 }
  0x4d   : > { %393 = vperm.xlu1 %2441, %v298_v16   ;;  %390 = vperm.xlu0 %2440, %v297_v17   ;;  %v2689_v16 = vld [vmem:[%s2569_s12 + $0x60] sm:$0xff]  ;;  %v2692_v17 = vld [vmem:[%s2569_s12 + $0x68] sm:$0xff] }
  0x4e   : > { %5478 = vst [vmem:[#allocation23_spill] sm:$0xff] %v2689_v16  ;;  %5479 = vst [vmem:[#allocation24_spill] sm:$0xff] %v2692_v17 }
  0x51   : > { %399 = vperm.xlu1 %2441, %v300_v18   ;;  %396 = vperm.xlu0 %2440, %v299_v19   ;;  %v2695_v18 = vld [vmem:[%s2569_s12 + $0x70] sm:$0xff]  ;;  %v2698_v19 = vld [vmem:[%s2569_s12 + $0x78] sm:$0xff] }
  0x52   : > { %5480 = vst [vmem:[#allocation25_spill] sm:$0xff] %v2695_v18  ;;  %5481 = vst [vmem:[#allocation26_spill] sm:$0xff] %v2698_v19 }
  0x55   : > { %405 = vperm.xlu1 %2441, %v302_v20   ;;  %402 = vperm.xlu0 %2440, %v301_v21   ;;  %v2701_v20 = vld [vmem:[%s2569_s12 + $0x80] sm:$0xff]  ;;  %v2704_v21 = vld [vmem:[%s2569_s12 + $0x88] sm:$0xff] }
  0x56   : > { %5482 = vst [vmem:[#allocation27_spill] sm:$0xff] %v2701_v20  ;;  %5483 = vst [vmem:[#allocation28_spill] sm:$0xff] %v2704_v21 }
  0x59   : > { %411 = vperm.xlu1 %2441, %v304_v22   ;;  %408 = vperm.xlu0 %2440, %v303_v23   ;;  %v2707_v22 = vld [vmem:[%s2569_s12 + $0x90] sm:$0xff]  ;;  %v2710_v23 = vld [vmem:[%s2569_s12 + $0x98] sm:$0xff] }
  0x5a   : > { %5484 = vst [vmem:[#allocation29_spill] sm:$0xff] %v2707_v22  ;;  %5485 = vst [vmem:[#allocation30_spill] sm:$0xff] %v2710_v23 }
  0x5d   : > { %417 = vperm.xlu1 %2441, %v306_v24   ;;  %414 = vperm.xlu0 %2440, %v305_v25   ;;  %v2713_v24 = vld [vmem:[%s2569_s12 + $0xa0] sm:$0xff]  ;;  %v2716_v25 = vld [vmem:[%s2569_s12 + $0xa8] sm:$0xff] }
  0x5e   : > { %5486 = vst [vmem:[#allocation31_spill] sm:$0xff] %v2713_v24  ;;  %5487 = vst [vmem:[#allocation32_spill] sm:$0xff] %v2716_v25 }
  0x61   : > { %423 = vperm.xlu1 %2441, %v308_v26   ;;  %420 = vperm.xlu0 %2440, %v307_v27   ;;  %v2719_v26 = vld [vmem:[%s2569_s12 + $0xb0] sm:$0xff]  ;;  %v2722_v27 = vld [vmem:[%s2569_s12 + $0xb8] sm:$0xff] }
  0x62   : > { %5488 = vst [vmem:[#allocation33_spill] sm:$0xff] %v2719_v26  ;;  %5489 = vst [vmem:[#allocation34_spill] sm:$0xff] %v2722_v27 }
  0x65   : > { %429 = vperm.xlu1 %2441, %v310_v28   ;;  %426 = vperm.xlu0 %2440, %v309_v29  }
  0x69   : > { %435 = vperm.xlu1 %2441, %v312_v30   ;;  %432 = vperm.xlu0 %2440, %v311_v31   ;;  %v2729_v30 = vld [vmem:[%s2569_s12 + $0xc0] sm:$0xff]  ;;  %v2732_v31 = vld [vmem:[%s2569_s12 + $0xc8] sm:$0xff] }
  0x6a   : > { %5490 = vst [vmem:[#allocation35_spill] sm:$0xff] %v2729_v30  ;;  %5491 = vst [vmem:[#allocation36_spill] sm:$0xff] %v2732_v31 }
  0x6d   : > { %441 = vperm.xlu1 %2441, %v314_v32   ;;  %438 = vperm.xlu0 %2440, %v313_v33   ;;  %v2735_v32 = vld [vmem:[%s2569_s12 + $0xd0] sm:$0xff]  ;;  %v2738_v33 = vld [vmem:[%s2569_s12 + $0xd8] sm:$0xff] }
  0x6e   : > { %5492 = vst [vmem:[#allocation37_spill] sm:$0xff] %v2735_v32  ;;  %5493 = vst [vmem:[#allocation38_spill] sm:$0xff] %v2738_v33 }
  0x71   : > { %447 = vperm.xlu1 %2441, %v316_v34   ;;  %444 = vperm.xlu0 %2440, %v315_v35   ;;  %v2741_v34 = vld [vmem:[%s2569_s12 + $0xe0] sm:$0xff]  ;;  %v2744_v35 = vld [vmem:[%s2569_s12 + $0xe8] sm:$0xff] }
  0x72   : > { %5494 = vst [vmem:[#allocation39_spill] sm:$0xff] %v2741_v34  ;;  %5495 = vst [vmem:[#allocation40_spill] sm:$0xff] %v2744_v35 }
  0x75   : > { %453 = vperm.xlu1 %2441, %v318_v36   ;;  %450 = vperm.xlu0 %2440, %v317_v37   ;;  %v2747_v36 = vld [vmem:[%s2569_s12 + $0xf0] sm:$0xff]  ;;  %v2750_v37 = vld [vmem:[%s2569_s12 + $0xf8] sm:$0xff] }
  0x76   : > { %5496 = vst [vmem:[#allocation41_spill] sm:$0xff] %v2747_v36  ;;  %5497 = vst [vmem:[#allocation42_spill] sm:$0xff] %v2750_v37 }
  0x79   : > { %459 = vperm.xlu1 %2441, %v320_v38   ;;  %456 = vperm.xlu0 %2440, %v319_v39   ;;  %v2753_v38 = vld [vmem:[%s2569_s12 + $0x100] sm:$0xff]  ;;  %v2756_v39 = vld [vmem:[%s2569_s12 + $0x108] sm:$0xff] }
  0x7a   : > { %5498 = vst [vmem:[#allocation43_spill] sm:$0xff] %v2753_v38  ;;  %5499 = vst [vmem:[#allocation44_spill] sm:$0xff] %v2756_v39 }
  0x7d   : > { %465 = vperm.xlu1 %2441, %v322_v40   ;;  %462 = vperm.xlu0 %2440, %v321_v41   ;;  %v2759_v40 = vld [vmem:[%s2569_s12 + $0x110] sm:$0xff]  ;;  %v2762_v41 = vld [vmem:[%s2569_s12 + $0x118] sm:$0xff] }
  0x7e   : > { %5500 = vst [vmem:[#allocation45_spill] sm:$0xff] %v2759_v40  ;;  %5501 = vst [vmem:[#allocation46_spill] sm:$0xff] %v2762_v41 }
  0x81   : > { %471 = vperm.xlu1 %2441, %v324_v42   ;;  %468 = vperm.xlu0 %2440, %v323_v43  }
  0x85   : > { %477 = vperm.xlu1 %2441, %v326_v44   ;;  %474 = vperm.xlu0 %2440, %v325_v45   ;;  %v2769_v44 = vld [vmem:[%s2569_s12 + $0x120] sm:$0xff]  ;;  %v2772_v45 = vld [vmem:[%s2569_s12 + $0x128] sm:$0xff] }
  0x86   : > { %5502 = vst [vmem:[#allocation47_spill] sm:$0xff] %v2769_v44  ;;  %5503 = vst [vmem:[#allocation48_spill] sm:$0xff] %v2772_v45 }
  0x89   : > { %483 = vperm.xlu1 %2441, %v328_v46   ;;  %480 = vperm.xlu0 %2440, %v327_v47   ;;  %v2775_v46 = vld [vmem:[%s2569_s12 + $0x130] sm:$0xff]  ;;  %v2778_v47 = vld [vmem:[%s2569_s12 + $0x138] sm:$0xff] }
  0x8a   : > { %5504 = vst [vmem:[#allocation49_spill] sm:$0xff] %v2775_v46  ;;  %5505 = vst [vmem:[#allocation50_spill] sm:$0xff] %v2778_v47 }
  0x8d   : > { %489 = vperm.xlu1 %2441, %v330_v48   ;;  %486 = vperm.xlu0 %2440, %v329_v49   ;;  %v2781_v48 = vld [vmem:[%s2569_s12 + $0x140] sm:$0xff]  ;;  %v2784_v49 = vld [vmem:[%s2569_s12 + $0x148] sm:$0xff] }
  0x8e   : > { %5506 = vst [vmem:[#allocation51_spill] sm:$0xff] %v2781_v48  ;;  %5507 = vst [vmem:[#allocation52_spill] sm:$0xff] %v2784_v49 }
  0x91   : > { %495 = vperm.xlu1 %2441, %v332_v50   ;;  %492 = vperm.xlu0 %2440, %v331_v51   ;;  %v2787_v50 = vld [vmem:[%s2569_s12 + $0x150] sm:$0xff]  ;;  %v2790_v51 = vld [vmem:[%s2569_s12 + $0x158] sm:$0xff] }
  0x92   : > { %5508 = vst [vmem:[#allocation53_spill] sm:$0xff] %v2787_v50  ;;  %5509 = vst [vmem:[#allocation54_spill] sm:$0xff] %v2790_v51 }
  0x95   : > { %501 = vperm.xlu1 %2441, %v334_v52   ;;  %498 = vperm.xlu0 %2440, %v333_v53   ;;  %v2793_v52 = vld [vmem:[%s2569_s12 + $0x160] sm:$0xff]  ;;  %v2796_v53 = vld [vmem:[%s2569_s12 + $0x168] sm:$0xff] }
  0x96   : > { %5510 = vst [vmem:[#allocation55_spill] sm:$0xff] %v2793_v52  ;;  %5511 = vst [vmem:[#allocation56_spill] sm:$0xff] %v2796_v53 }
  0x99   : > { %507 = vperm.xlu1 %2441, %v336_v54   ;;  %504 = vperm.xlu0 %2440, %v335_v55   ;;  %v2799_v54 = vld [vmem:[%s2569_s12 + $0x170] sm:$0xff]  ;;  %v2802_v55 = vld [vmem:[%s2569_s12 + $0x178] sm:$0xff] }
  0x9a   : > { %5512 = vst [vmem:[#allocation57_spill] sm:$0xff] %v2799_v54  ;;  %5513 = vst [vmem:[#allocation58_spill] sm:$0xff] %v2802_v55  ;;  %v2833_v55 = vld [vmem:[%s2569_s12 + $0x1c0] sm:$0xff]  ;;  %v2836_v54 = vld [vmem:[%s2569_s12 + $0x1c8] sm:$0xff] }
  0x9b   : > { %5522 = vst [vmem:[#allocation67_spill] sm:$0xff] %v2833_v55  ;;  %5523 = vst [vmem:[#allocation68_spill] sm:$0xff] %v2836_v54 }
  0x9d   : > { %513 = vperm.xlu1 %2441, %v338_v56   ;;  %510 = vperm.xlu0 %2440, %v337_v57  }
  0xa1   : > { %519 = vperm.xlu1 %2441, %v340_v58   ;;  %516 = vperm.xlu0 %2440, %v339_v59   ;;  %v2809_v58 = vld [vmem:[%s2569_s12 + $0x180] sm:$0xff]  ;;  %v2812_v59 = vld [vmem:[%s2569_s12 + $0x188] sm:$0xff] }
  0xa2   : > { %5514 = vst [vmem:[#allocation59_spill] sm:$0xff] %v2809_v58  ;;  %5515 = vst [vmem:[#allocation60_spill] sm:$0xff] %v2812_v59  ;;  %v2839_v58 = vld [vmem:[%s2569_s12 + $0x1d0] sm:$0xff]  ;;  %v2842_v59 = vld [vmem:[%s2569_s12 + $0x1d8] sm:$0xff] }
  0xa3   : > { %5524 = vst [vmem:[#allocation69_spill] sm:$0xff] %v2839_v58  ;;  %5525 = vst [vmem:[#allocation70_spill] sm:$0xff] %v2842_v59 }
  0xa5   : > { %525 = vperm.xlu1 %2441, %v342_v60   ;;  %522 = vperm.xlu0 %2440, %v341_v61   ;;  %v2815_v60 = vld [vmem:[%s2569_s12 + $0x190] sm:$0xff]  ;;  %v2818_v61 = vld [vmem:[%s2569_s12 + $0x198] sm:$0xff] }
  0xa6   : > { %5516 = vst [vmem:[#allocation61_spill] sm:$0xff] %v2815_v60  ;;  %5517 = vst [vmem:[#allocation62_spill] sm:$0xff] %v2818_v61  ;;  %v2849_v61 = vld [vmem:[%s2569_s12 + $0x1e0] sm:$0xff] }
  0xa7   : > { %5527 = vst [vmem:[#allocation72_spill] sm:$0xff] %v2849_v61 }
  0xa9   : > { %531 = vperm.xlu1 %2441, %v344_v62   ;;  %528 = vperm.xlu0 %2440, %v343_v63   ;;  %v2821_v62 = vld [vmem:[%s2569_s12 + $0x1a0] sm:$0xff]  ;;  %v2824_v63 = vld [vmem:[%s2569_s12 + $0x1a8] sm:$0xff] }
  0xaa   : > { %5518 = vst [vmem:[#allocation63_spill] sm:$0xff] %v2821_v62  ;;  %5519 = vst [vmem:[#allocation64_spill] sm:$0xff] %v2824_v63  ;;  %v2852_v62 = vld [vmem:[%s2569_s12 + $0x1e8] sm:$0xff]  ;;  %v2855_v63 = vld [vmem:[%s2569_s12 + $0x1f0] sm:$0xff] }
  0xab   : > { %5528 = vst [vmem:[#allocation73_spill] sm:$0xff] %v2852_v62  ;;  %5529 = vst [vmem:[#allocation74_spill] sm:$0xff] %v2855_v63 }
  0xad   : > { %537 = vperm.xlu1 %2441, %v346_v0   ;;  %534 = vperm.xlu0 %2440, %v345_v1   ;;  %v2827_v0 = vld [vmem:[%s2569_s12 + $0x1b0] sm:$0xff]  ;;  %v2830_v1 = vld [vmem:[%s2569_s12 + $0x1b8] sm:$0xff] }
  0xae   : > { %5520 = vst [vmem:[#allocation65_spill] sm:$0xff] %v2827_v0  ;;  %5521 = vst [vmem:[#allocation66_spill] sm:$0xff] %v2830_v1  ;;  %v2858_v0 = vld [vmem:[%s2569_s12 + $0x1f8] sm:$0xff] }
  0xaf   : > { %5530 = vst [vmem:[#allocation75_spill] sm:$0xff] %v2858_v0 }
  0xb0   : > { %v2684_v14 = vpop.permute.xlu1 %354  ;;  %v2686_v15 = vpop.permute.xlu0 %348 }
  0xb1   : > { %vm547_vm0 = vcmp.eq.s32.totalorder (!%p2653_p4), %v2686_v15, 0  ;;  %vm549_vm2 = vcmp.eq.s32.totalorder (!%p2653_p4), %v2684_v14, 0 }
  0xb4   : > { %v2724_v28 = vpop.permute.xlu1 %357  ;;  %v2726_v29 = vpop.permute.xlu0 %351 }
  0xb5   : > { %vm548_vm1 = vcmp.eq.s32.totalorder (!%p2653_p4), %v2726_v29, 0  ;;  %vm550_vm3 = vcmp.eq.s32.totalorder (!%p2653_p4), %v2724_v28, 0 }
  0xb8   : > { %v2764_v42 = vpop.permute.xlu1 %363  ;;  %v2766_v43 = vpop.permute.xlu0 %360 }
  0xb9   : > { %vm551_vm4 = vcmp.eq.s32.totalorder (!%p2653_p4), %v2766_v43, 0  ;;  %vm552_vm5 = vcmp.eq.s32.totalorder (!%p2653_p4), %v2764_v42, 0 }
  0xbc   : > { %v2804_v56 = vpop.permute.xlu1 %369  ;;  %v2806_v57 = vpop.permute.xlu0 %366 }
  0xc0   : > { %v2844_v53 = vpop.permute.xlu1 %375  ;;  %v2846_v60 = vpop.permute.xlu0 %372 }
  0xc1   : > { %5526 = vst [vmem:[#allocation71_spill] sm:$0xff] %v2844_v53  ;;  %vm5574_vm6 = vcmp.eq.s32.totalorder (!%p2653_p4), %v2846_v60, 0 }
  0xc4   : > { %v2860_v1 = vpop.permute.xlu1 %381  ;;  %v2862_v55 = vpop.permute.xlu0 %378 }
  0xc5   : > { %5531 = vst [vmem:[#allocation76_spill] sm:$0xff] %v2860_v1  ;;  %5532 = vst [vmem:[#allocation77_spill] sm:$0xff] %v2862_v55 }
  0xc8   : > { %v2864_v54 = vpop.permute.xlu1 %387  ;;  %v2866_v58 = vpop.permute.xlu0 %384 }
  0xc9   : > { %5533 = vst [vmem:[#allocation78_spill] sm:$0xff] %v2864_v54 }
  0xcc   : > { %v2868_v59 = vpop.permute.xlu1 %393  ;;  %v2870_v52 = vpop.permute.xlu0 %390 }
  0xcd   : > { %5534 = vst [vmem:[#allocation79_spill] sm:$0xff] %v2868_v59  ;;  %5535 = vst [vmem:[#allocation80_spill] sm:$0xff] %v2870_v52 }
  0xd0   : > { %v2872_v51 = vpop.permute.xlu1 %399  ;;  %v2874_v61 = vpop.permute.xlu0 %396 }
  0xd1   : > { %5536 = vst [vmem:[#allocation81_spill] sm:$0xff] %v2872_v51  ;;  %5537 = vst [vmem:[#allocation82_spill] sm:$0xff] %v2874_v61 }
  0xd4   : > { %v2876_v62 = vpop.permute.xlu1 %405  ;;  %v2878_v63 = vpop.permute.xlu0 %402 }
  0xd5   : > { %5538 = vst [vmem:[#allocation83_spill] sm:$0xff] %v2876_v62  ;;  %5539 = vst [vmem:[#allocation84_spill] sm:$0xff] %v2878_v63  ;;  %vm565_vm8 = vcmp.eq.s32.totalorder (!%p2653_p4), %v2878_v63, 0  ;;  %vm566_vm9 = vcmp.eq.s32.totalorder (!%p2653_p4), %v2876_v62, 0  ;;  %v5597_v62 = vld [vmem:[#allocation33_spill] sm:$0xff] (!%p2653_p4) }
  0xd8   : > { %v2880_v0 = vpop.permute.xlu1 %411  ;;  %v2882_v50 = vpop.permute.xlu0 %408 }
  0xd9   : > { %5540 = vst [vmem:[#allocation85_spill] sm:$0xff] %v2880_v0  ;;  %5541 = vst [vmem:[#allocation86_spill] sm:$0xff] %v2882_v50  ;;  %vm567_vm10 = vcmp.eq.s32.totalorder (!%p2653_p4), %v2882_v50, 0  ;;  %vm568_vm11 = vcmp.eq.s32.totalorder (!%p2653_p4), %v2880_v0, 0  ;;  %v5607_v0 = vld [vmem:[#allocation38_spill] sm:$0xff] (!%p2653_p4) }
  0xdc   : > { %v2884_v49 = vpop.permute.xlu1 %417  ;;  %v2886_v48 = vpop.permute.xlu0 %414 }
  0xdd   : > { %5542 = vst [vmem:[#allocation87_spill] sm:$0xff] %v2884_v49  ;;  %5543 = vst [vmem:[#allocation88_spill] sm:$0xff] %v2886_v48  ;;  %vm569_vm12 = vcmp.eq.s32.totalorder (!%p2653_p4), %v2886_v48, 0  ;;  %vm570_vm13 = vcmp.eq.s32.totalorder (!%p2653_p4), %v2884_v49, 0  ;;  %v5605_v49 = vld [vmem:[#allocation37_spill] sm:$0xff] (!%p2653_p4) }
  0xde   : > { %v633_v63 = vsel (!%p2653_p4), %vm569_vm12, %v5597_v62, -inf }
  0xe0   : > { %v2888_v47 = vpop.permute.xlu1 %423  ;;  %v2890_v46 = vpop.permute.xlu0 %420 }
  0xe1   : > { %5544 = vst [vmem:[#allocation89_spill] sm:$0xff] %v2888_v47  ;;  %5545 = vst [vmem:[#allocation90_spill] sm:$0xff] %v2890_v46  ;;  %vm571_vm14 = vcmp.eq.s32.totalorder (!%p2653_p4), %v2890_v46, 0  ;;  %vm572_vm15 = vcmp.eq.s32.totalorder (!%p2653_p4), %v2888_v47, 0  ;;  %v5618_v47 = vld [vmem:[#allocation42_spill] sm:$0xff] (!%p2653_p4) }
  0xe4   : > { %v2892_v45 = vpop.permute.xlu1 %429  ;;  %v2894_v44 = vpop.permute.xlu0 %426 }
  0xe5   : > { %5546 = vst [vmem:[#allocation91_spill] sm:$0xff] %v2892_v45  ;;  %5547 = vst [vmem:[#allocation92_spill] sm:$0xff] %v2894_v44  ;;  %vm5608_vm12 = vcmp.eq.s32.totalorder (!%p2653_p4), %v2892_v45, 0  ;;  %v5616_v45 = vld [vmem:[#allocation41_spill] sm:$0xff] (!%p2653_p4) }
  0xe6   : > { %v638_v50 = vsel (!%p2653_p4), %vm5608_vm12, %v5607_v0, -inf }
  0xe8   : > { %v2896_v41 = vpop.permute.xlu1 %435  ;;  %v2898_v40 = vpop.permute.xlu0 %432 }
  0xec   : > { %v2900_v39 = vpop.permute.xlu1 %441  ;;  %v2902_v38 = vpop.permute.xlu0 %438 }
  0xed   : > { %5548 = vst [vmem:[#allocation93_spill] sm:$0xff] %v2900_v39  ;;  %vm5619_vm12 = vcmp.eq.s32.totalorder (!%p2653_p4), %v2900_v39, 0 }
  0xee   : > { %v642_v46 = vsel (!%p2653_p4), %vm5619_vm12, %v5618_v47, -inf }
  0xf0   : > { %v2904_v37 = vpop.permute.xlu1 %447  ;;  %v2906_v36 = vpop.permute.xlu0 %444 }
  0xf4   : > { %v2908_v35 = vpop.permute.xlu1 %453  ;;  %v2910_v34 = vpop.permute.xlu0 %450 }
  0xf5   : > { %5549 = vst [vmem:[#allocation94_spill] sm:$0xff] %v2908_v35  ;;  %vm5626_vm12 = vcmp.eq.s32.totalorder (!%p2653_p4), %v2910_v34, 0 }
  0xf8   : > { %v2912_v33 = vpop.permute.xlu1 %459  ;;  %v2914_v32 = vpop.permute.xlu0 %456 }
  0xf9   : > { %5550 = vst [vmem:[#allocation95_spill] sm:$0xff] %v2912_v33  ;;  %5551 = vst [vmem:[#allocation96_spill] sm:$0xff] %v2914_v32 }
  0xfc   : > { %v2916_v31 = vpop.permute.xlu1 %465  ;;  %v2918_v30 = vpop.permute.xlu0 %462 }
  0xfd   : > { %5552 = vst [vmem:[#allocation97_spill] sm:$0xff] %v2916_v31  ;;  %5553 = vst [vmem:[#allocation98_spill] sm:$0xff] %v2918_v30 }
 0x100   : > { %v2920_v27 = vpop.permute.xlu1 %471  ;;  %v2922_v26 = vpop.permute.xlu0 %468 }
 0x101   : > { %5554 = vst [vmem:[#allocation99_spill] sm:$0xff] %v2920_v27  ;;  %5555 = vst [vmem:[#allocation100_spill] sm:$0xff] %v2922_v26 }
 0x104   : > { %v2924_v25 = vpop.permute.xlu1 %477  ;;  %v2926_v24 = vpop.permute.xlu0 %474 }
 0x105   : > { %5556 = vst [vmem:[#allocation101_spill] sm:$0xff] %v2924_v25  ;;  %5557 = vst [vmem:[#allocation102_spill] sm:$0xff] %v2926_v24 }
 0x108   : > { %v2928_v23 = vpop.permute.xlu1 %483  ;;  %v2930_v22 = vpop.permute.xlu0 %480 }
 0x109   : > { %5558 = vst [vmem:[#allocation103_spill] sm:$0xff] %v2928_v23  ;;  %5559 = vst [vmem:[#allocation104_spill] sm:$0xff] %v2930_v22 }
 0x10c   : > { %v2932_v21 = vpop.permute.xlu1 %489  ;;  %v2934_v20 = vpop.permute.xlu0 %486 }
 0x10d   : > { %5560 = vst [vmem:[#allocation105_spill] sm:$0xff] %v2932_v21  ;;  %5561 = vst [vmem:[#allocation106_spill] sm:$0xff] %v2934_v20 }
 0x110   : > { %v2936_v33 = vpop.permute.xlu1 %495  ;;  %v2938_v31 = vpop.permute.xlu0 %492 }
 0x111   : > { %5562 = vst [vmem:[#allocation107_spill] sm:$0xff] %v2936_v33  ;;  %5563 = vst [vmem:[#allocation108_spill] sm:$0xff] %v2938_v31 }
 0x114   : > { %v2940_v30 = vpop.permute.xlu1 %501  ;;  %v2942_v27 = vpop.permute.xlu0 %498 }
 0x115   : > { %5564 = vst [vmem:[#allocation109_spill] sm:$0xff] %v2940_v30  ;;  %5565 = vst [vmem:[#allocation110_spill] sm:$0xff] %v2942_v27 }
 0x118   : > { %v2944_v26 = vpop.permute.xlu1 %507  ;;  %v2946_v25 = vpop.permute.xlu0 %504 }
 0x119   : > { %5566 = vst [vmem:[#allocation111_spill] sm:$0xff] %v2944_v26 }
 0x11c   : > { %v2948_v24 = vpop.permute.xlu1 %513  ;;  %v2950_v23 = vpop.permute.xlu0 %510 }
 0x120   : > { %v2952_v22 = vpop.permute.xlu1 %519  ;;  %v2954_v21 = vpop.permute.xlu0 %516 }
 0x124   : > { %v2956_v20 = vpop.permute.xlu1 %525  ;;  %v2958_v33 = vpop.permute.xlu0 %522 }
 0x125   : > { %5567 = vst [vmem:[#allocation112_spill] sm:$0xff] %v2956_v20  ;;  %v615_v20 = vsel (!%p2653_p4), %vm551_vm4, %v2661_v6, -inf }
 0x127   : > { %546 = sbr.rel (%p2653_p4) target bundleno = 361 (0x169), region = 40 }
 0x128   : > { %v2960_v31 = vpop.permute.xlu1 %531  ;;  %v2962_v30 = vpop.permute.xlu0 %528 }
 0x129   : > { %5568 = vst [vmem:[#allocation113_spill] sm:$0xff] %v2960_v31  ;;  %5569 = vst [vmem:[#allocation114_spill] sm:$0xff] %v2962_v30  ;;  %v613_v31 = vsel (!%p2653_p4), %vm549_vm2, %v2651_v4, -inf  ;;  %v614_v30 = vsel (!%p2653_p4), %vm550_vm3, %v2658_v5, -inf  ;;  %vm575_vm2 = vcmp.eq.s32.totalorder (!%p2653_p4), %v2898_v40, 0  ;;  %vm5581_vm3 = vcmp.eq.s32.totalorder (!%p2653_p4), %v2868_v59, 0 }
 0x12c   : > { %v2964_v27 = vpop.permute.xlu1 %537  ;;  %v2966_v26 = vpop.permute.xlu0 %534 }
 0x12d   : > { %5570 = vst [vmem:[#allocation115_spill] sm:$0xff] %v2964_v27  ;;  %5571 = vst [vmem:[#allocation116_spill] sm:$0xff] %v2966_v26  ;;  %v611_v27 = vsel (!%p2653_p4), %vm547_vm0, %v2645_v2, -inf  ;;  %v612_v26 = vsel (!%p2653_p4), %vm548_vm1, %v2648_v3, -inf  ;;  %v616_v2 = vsel (!%p2653_p4), %vm552_vm5, %v2664_v7, -inf  ;;  %vm5572_vm0 = vcmp.eq.s32.totalorder (!%p2653_p4), %v2806_v57, 0 }
 0x12e   : > { %v617_v3 = vsel %vm5572_vm0, %v2667_v8, -inf  ;;  %vm5573_vm1 = vcmp.eq.s32.totalorder %v2804_v56, 0  ;;  %v619_v7 = vsel %vm5574_vm6, %v2673_v10, -inf  ;;  %vm5575_vm5 = vcmp.eq.s32.totalorder %v2844_v53, 0 }
 0x12f   : > { %v618_v4 = vsel %vm5573_vm1, %v2670_v9, -inf  ;;  %v620_v8 = vsel %vm5575_vm5, %v2676_v11, -inf  ;;  %vm5576_vm0 = vcmp.eq.s32.totalorder %v2862_v55, 0  ;;  %vm5577_vm1 = vcmp.eq.s32.totalorder %v2860_v1, 0 }
 0x130   : > { %v621_v9 = vsel %vm5576_vm0, %v2679_v12, -inf  ;;  %v622_v6 = vsel %vm5577_vm1, %v2682_v13, -inf  ;;  %v675_v10 = vmax.f32 %v611_v27, %v615_v20  ;;  %v676_v5 = vmax.f32 %v612_v26, %v616_v2  ;;  %v5582_v2 = vld [vmem:[#allocation95_spill] sm:$0xff] }
 0x131   : > { %v677_v53 = vmax.f32 %v613_v31, %v617_v3  ;;  %v678_v11 = vmax.f32 %v614_v30, %v618_v4  ;;  %vm5578_vm5 = vcmp.eq.s32.totalorder %v2866_v58, 0  ;;  %vm5579_vm0 = vcmp.eq.s32.totalorder %v2864_v54, 0  ;;  %v5583_v3 = vld [vmem:[#allocation98_spill] sm:$0xff]  ;;  %v5584_v4 = vld [vmem:[#allocation97_spill] sm:$0xff]  ;;  %v5585_v31 = vld [vmem:[#allocation27_spill] sm:$0xff] }
 0x132   : > { %v623_v12 = vsel %vm5578_vm5, %v2689_v16, -inf  ;;  %v624_v13 = vsel %vm5579_vm0, %v2692_v17, -inf  ;;  %vm5580_vm1 = vcmp.eq.s32.totalorder %v2870_v52, 0  ;;  %v626_v55 = vsel %vm5581_vm3, %v2698_v19, -inf  ;;  %v5587_v17 = vld [vmem:[#allocation28_spill] sm:$0xff]  ;;  %v5589_v16 = vld [vmem:[#allocation29_spill] sm:$0xff] }
 0x133   : > { %v625_v1 = vsel %vm5580_vm1, %v2695_v18, -inf  ;;  %vm583_vm6 = vcmp.eq.s32.totalorder %v2914_v32, 0  ;;  %vm584_vm4 = vcmp.eq.s32.totalorder %v5582_v2, 0  ;;  %v679_v20 = vmax.f32 %v675_v10, %v619_v7  ;;  %v5590_v52 = vld [vmem:[#allocation30_spill] sm:$0xff]  ;;  %v5591_v7 = vld [vmem:[#allocation100_spill] sm:$0xff] }
 0x134   : > { %v680_v26 = vmax.f32 %v676_v5, %v620_v8  ;;  %v681_v27 = vmax.f32 %v677_v53, %v621_v9  ;;  %v682_v30 = vmax.f32 %v678_v11, %v622_v6  ;;  %vm5586_vm0 = vcmp.eq.s32.totalorder %v2874_v61, 0  ;;  %v5592_v5 = vld [vmem:[#allocation99_spill] sm:$0xff]  ;;  %v5593_v6 = vld [vmem:[#allocation102_spill] sm:$0xff]  ;;  %v5594_v8 = vld [vmem:[#allocation101_spill] sm:$0xff] }
 0x135   : > { %v627_v18 = vsel %vm5586_vm0, %v5585_v31, -inf  ;;  %vm5588_vm1 = vcmp.eq.s32.totalorder %v2872_v51, 0  ;;  %v629_v59 = vsel %vm565_vm8, %v5589_v16, -inf  ;;  %v630_v54 = vsel %vm566_vm9, %v5590_v52, -inf  ;;  %v5595_v53 = vld [vmem:[#allocation31_spill] sm:$0xff]  ;;  %v5596_v31 = vld [vmem:[#allocation32_spill] sm:$0xff] }
 0x136   : > { %v628_v19 = vsel %vm5588_vm1, %v5587_v17, -inf  ;;  %vm587_vm3 = vcmp.eq.s32.totalorder %v5591_v7, 0  ;;  %vm588_vm5 = vcmp.eq.s32.totalorder %v5592_v5, 0  ;;  %vm589_vm7 = vcmp.eq.s32.totalorder %v5593_v6, 0  ;;  %v5598_v51 = vld [vmem:[#allocation34_spill] sm:$0xff] }
 0x137   : > { %vm590_vm0 = vcmp.eq.s32.totalorder %v5594_v8, 0  ;;  %v683_v9 = vmax.f32 %v679_v20, %v623_v12  ;;  %v684_v10 = vmax.f32 %v680_v26, %v624_v13  ;;  %v685_v11 = vmax.f32 %v681_v27, %v625_v1  ;;  %v5599_v12 = vld [vmem:[#allocation104_spill] sm:$0xff]  ;;  %v5600_v13 = vld [vmem:[#allocation103_spill] sm:$0xff]  ;;  %v5602_v1 = vld [vmem:[#allocation105_spill] sm:$0xff] }
 0x138   : > { %v686_v17 = vmax.f32 %v682_v30, %v626_v55  ;;  %v631_v16 = vsel %vm567_vm10, %v5595_v53, -inf  ;;  %v632_v52 = vsel %vm568_vm11, %v5596_v31, -inf  ;;  %v634_v61 = vsel %vm570_vm13, %v5598_v51, -inf  ;;  %v5601_v55 = vld [vmem:[#allocation106_spill] sm:$0xff]  ;;  %v5603_v53 = vld [vmem:[#allocation35_spill] sm:$0xff]  ;;  %v5604_v31 = vld [vmem:[#allocation36_spill] sm:$0xff] }
 0x139   : > { %vm591_vm8 = vcmp.eq.s32.totalorder %v5599_v12, 0  ;;  %vm592_vm9 = vcmp.eq.s32.totalorder %v5600_v13, 0  ;;  %v687_v20 = vmax.f32 %v683_v9, %v627_v18  ;;  %v688_v26 = vmax.f32 %v684_v10, %v628_v19  ;;  %v5609_v18 = vld [vmem:[#allocation108_spill] sm:$0xff]  ;;  %v5610_v19 = vld [vmem:[#allocation107_spill] sm:$0xff] }
 0x13a   : > { %v689_v27 = vmax.f32 %v685_v11, %v629_v59  ;;  %v690_v30 = vmax.f32 %v686_v17, %v630_v54  ;;  %v635_v62 = vsel %vm571_vm14, %v5603_v53, -inf  ;;  %v636_v51 = vsel %vm572_vm15, %v5604_v31, -inf  ;;  %v5611_v54 = vld [vmem:[#allocation110_spill] sm:$0xff]  ;;  %v5612_v59 = vld [vmem:[#allocation109_spill] sm:$0xff]  ;;  %v5613_v53 = vld [vmem:[#allocation39_spill] sm:$0xff] }
 0x13b   : > { %vm5606_vm11 = vcmp.eq.s32.totalorder %v2894_v44, 0  ;;  %vm595_vm13 = vcmp.eq.s32.totalorder %v5609_v18, 0  ;;  %v691_v9 = vmax.f32 %v687_v20, %v631_v16  ;;  %v692_v10 = vmax.f32 %v688_v26, %v632_v52  ;;  %v5614_v31 = vld [vmem:[#allocation40_spill] sm:$0xff]  ;;  %v5621_v26 = vld [vmem:[#allocation43_spill] sm:$0xff] }
 0x13c   : > { %v637_v48 = vsel %vm5606_vm11, %v5605_v49, -inf  ;;  %v693_v11 = vmax.f32 %v689_v27, %v633_v63  ;;  %v694_v17 = vmax.f32 %v690_v30, %v634_v61  ;;  %v639_v49 = vsel %vm575_vm2, %v5613_v53, -inf  ;;  %v5620_v63 = vld [vmem:[#allocation111_spill] sm:$0xff]  ;;  %v5623_v27 = vld [vmem:[#allocation44_spill] sm:$0xff]  ;;  %v5625_v30 = vld [vmem:[#allocation45_spill] sm:$0xff] }
 0x13d   : > { %vm5615_vm15 = vcmp.eq.s32.totalorder %v2896_v41, 0  ;;  %vm5617_vm11 = vcmp.eq.s32.totalorder %v2902_v38, 0  ;;  %v695_v61 = vmax.f32 %v691_v9, %v635_v62  ;;  %v696_v16 = vmax.f32 %v692_v10, %v636_v51  ;;  %v5630_v10 = vld [vmem:[#allocation47_spill] sm:$0xff] }
 0x13e   : > { %v640_v0 = vsel %vm5615_vm15, %v5614_v31, -inf  ;;  %v641_v44 = vsel %vm5617_vm11, %v5616_v45, -inf  ;;  %v697_v52 = vmax.f32 %v693_v11, %v637_v48  ;;  %v698_v20 = vmax.f32 %v694_v17, %v638_v50  ;;  %v5627_v31 = vld [vmem:[#allocation46_spill] sm:$0xff]  ;;  %v5629_v48 = vld [vmem:[#allocation112_spill] sm:$0xff] }
 0x13f   : > { %vm5622_vm15 = vcmp.eq.s32.totalorder %v2906_v36, 0  ;;  %vm5624_vm11 = vcmp.eq.s32.totalorder %v2904_v37, 0  ;;  %v645_v53 = vsel %vm5626_vm12, %v5625_v30, -inf  ;;  %vm5628_vm10 = vcmp.eq.s32.totalorder %v2908_v35, 0  ;;  %v5631_v17 = vld [vmem:[#allocation48_spill] sm:$0xff] }
 0x140   : > { %v643_v45 = vsel %vm5622_vm15, %v5621_v26, -inf  ;;  %v644_v47 = vsel %vm5624_vm11, %v5623_v27, -inf  ;;  %v646_v39 = vsel %vm5628_vm10, %v5627_v31, -inf  ;;  %vm603_vm2 = vcmp.eq.s32.totalorder %v2954_v21, 0  ;;  %v5632_v27 = vld [vmem:[#allocation49_spill] sm:$0xff]  ;;  %v5634_v31 = vld [vmem:[#allocation50_spill] sm:$0xff] }
 0x141   : > { %vm604_vm1 = vcmp.eq.s32.totalorder %v2952_v22, 0  ;;  %v699_v50 = vmax.f32 %v695_v61, %v639_v49  ;;  %v700_v62 = vmax.f32 %v696_v16, %v640_v0  ;;  %v701_v51 = vmax.f32 %v697_v52, %v641_v44  ;;  %v5636_v49 = vld [vmem:[#allocation114_spill] sm:$0xff]  ;;  %v5637_v44 = vld [vmem:[#allocation113_spill] sm:$0xff]  ;;  %v5639_v0 = vld [vmem:[#allocation115_spill] sm:$0xff] }
 0x142   : > { %v702_v9 = vmax.f32 %v698_v20, %v642_v46  ;;  %v647_v11 = vsel %vm583_vm6, %v5630_v10, -inf  ;;  %v648_v26 = vsel %vm584_vm4, %v5631_v17, -inf  ;;  %vm5633_vm10 = vcmp.eq.s32.totalorder %v5583_v3, 0  ;;  %v5638_v46 = vld [vmem:[#allocation116_spill] sm:$0xff]  ;;  %v5640_v20 = vld [vmem:[#allocation51_spill] sm:$0xff]  ;;  %v5642_v17 = vld [vmem:[#allocation53_spill] sm:$0xff] }
 0x143   : > { %v649_v30 = vsel %vm5633_vm10, %v5632_v27, -inf  ;;  %vm5635_vm11 = vcmp.eq.s32.totalorder %v5584_v4, 0  ;;  %vm607_vm12 = vcmp.eq.s32.totalorder %v5636_v49, 0  ;;  %vm608_vm15 = vcmp.eq.s32.totalorder %v5637_v44, 0  ;;  %v5641_v10 = vld [vmem:[#allocation52_spill] sm:$0xff] }
 0x144   : > { %v650_v35 = vsel %vm5635_vm11, %v5634_v31, -inf  ;;  %vm609_vm14 = vcmp.eq.s32.totalorder %v5638_v46, 0  ;;  %vm610_vm6 = vcmp.eq.s32.totalorder %v5639_v0, 0  ;;  %v703_v61 = vmax.f32 %v699_v50, %v643_v45  ;;  %v5643_v31 = vld [vmem:[#allocation54_spill] sm:$0xff]  ;;  %v5644_v50 = vld [vmem:[#allocation55_spill] sm:$0xff] }
 0x145   : > { %v704_v16 = vmax.f32 %v700_v62, %v644_v47  ;;  %v705_v2 = vmax.f32 %v701_v51, %v645_v53  ;;  %v706_v52 = vmax.f32 %v702_v9, %v646_v39  ;;  %v651_v3 = vsel %vm587_vm3, %v5640_v20, -inf  ;;  %v5645_v62 = vld [vmem:[#allocation56_spill] sm:$0xff]  ;;  %v5646_v51 = vld [vmem:[#allocation57_spill] sm:$0xff]  ;;  %v5648_v9 = vld [vmem:[#allocation58_spill] sm:$0xff] }
 0x146   : > { %v652_v4 = vsel %vm588_vm5, %v5641_v10, -inf  ;;  %v653_v27 = vsel %vm589_vm7, %v5642_v17, -inf  ;;  %v654_v32 = vsel %vm590_vm0, %v5643_v31, -inf  ;;  %v707_v45 = vmax.f32 %v703_v61, %v647_v11  ;;  %v5650_v61 = vld [vmem:[#allocation59_spill] sm:$0xff]  ;;  %v5659_v17 = vld [vmem:[#allocation64_spill] sm:$0xff]  ;;  %v5663_v31 = vld [vmem:[#allocation66_spill] sm:$0xff] }
 0x147   : > { %v708_v47 = vmax.f32 %v704_v16, %v648_v26  ;;  %v709_v53 = vmax.f32 %v705_v2, %v649_v30  ;;  %v710_v39 = vmax.f32 %v706_v52, %v650_v35  ;;  %v655_v7 = vsel %vm591_vm8, %v5644_v50, -inf  ;;  %v5651_v16 = vld [vmem:[#allocation60_spill] sm:$0xff]  ;;  %v5653_v2 = vld [vmem:[#allocation61_spill] sm:$0xff]  ;;  %v5655_v52 = vld [vmem:[#allocation62_spill] sm:$0xff] }
 0x148   : > { %v656_v5 = vsel %vm592_vm9, %v5645_v62, -inf  ;;  %vm5647_vm4 = vcmp.eq.s32.totalorder %v5601_v55, 0  ;;  %vm5649_vm7 = vcmp.eq.s32.totalorder %v5602_v1, 0  ;;  %v711_v11 = vmax.f32 %v707_v45, %v651_v3  ;;  %v5665_v50 = vld [vmem:[#allocation67_spill] sm:$0xff]  ;;  %v5666_v62 = vld [vmem:[#allocation68_spill] sm:$0xff] }
 0x149   : > { %v657_v6 = vsel %vm5647_vm4, %v5646_v51, -inf  ;;  %v658_v8 = vsel %vm5649_vm7, %v5648_v9, -inf  ;;  %v712_v26 = vmax.f32 %v708_v47, %v652_v4  ;;  %v713_v30 = vmax.f32 %v709_v53, %v653_v27  ;;  %v5657_v4 = vld [vmem:[#allocation63_spill] sm:$0xff]  ;;  %v5661_v27 = vld [vmem:[#allocation65_spill] sm:$0xff] }
 0x14a   : > { %v714_v35 = vmax.f32 %v710_v39, %v654_v32  ;;  %v659_v12 = vsel %vm595_vm13, %v5650_v61, -inf  ;;  %vm5652_vm5 = vcmp.eq.s32.totalorder %v5610_v19, 0  ;;  %vm5654_vm3 = vcmp.eq.s32.totalorder %v5611_v54, 0 }
 0x14b   : > { %v660_v13 = vsel %vm5652_vm5, %v5651_v16, -inf  ;;  %v661_v55 = vsel %vm5654_vm3, %v5653_v2, -inf  ;;  %vm5656_vm0 = vcmp.eq.s32.totalorder %v5612_v59, 0  ;;  %v715_v20 = vmax.f32 %v711_v11, %v655_v7 }
 0x14c   : > { %v662_v1 = vsel %vm5656_vm0, %v5655_v52, -inf  ;;  %v716_v3 = vmax.f32 %v712_v26, %v656_v5  ;;  %v717_v10 = vmax.f32 %v713_v30, %v657_v6  ;;  %v718_v32 = vmax.f32 %v714_v35, %v658_v8  ;;  %v5667_v5 = vld [vmem:[#allocation69_spill] sm:$0xff]  ;;  %v5669_v6 = vld [vmem:[#allocation70_spill] sm:$0xff]  ;;  %v5671_v35 = vld [vmem:[#allocation72_spill] sm:$0xff] }
 0x14d   : > { %vm5658_vm8 = vcmp.eq.s32.totalorder %v2946_v25, 0  ;;  %vm5660_vm9 = vcmp.eq.s32.totalorder %v5620_v63, 0  ;;  %vm5662_vm13 = vcmp.eq.s32.totalorder %v2950_v23, 0  ;;  %vm5664_vm10 = vcmp.eq.s32.totalorder %v2948_v24, 0 }
 0x14e   : > { %v663_v18 = vsel %vm5658_vm8, %v5657_v4, -inf  ;;  %v664_v19 = vsel %vm5660_vm9, %v5659_v17, -inf  ;;  %v665_v54 = vsel %vm5662_vm13, %v5661_v27, -inf  ;;  %v666_v59 = vsel %vm5664_vm10, %v5663_v31, -inf }
 0x14f   : > { %v719_v45 = vmax.f32 %v715_v20, %v659_v12  ;;  %v720_v47 = vmax.f32 %v716_v3, %v660_v13  ;;  %v721_v53 = vmax.f32 %v717_v10, %v661_v55  ;;  %v722_v39 = vmax.f32 %v718_v32, %v662_v1  ;;  %v5672_v12 = vld [vmem:[#allocation73_spill] sm:$0xff]  ;;  %v5673_v13 = vld [vmem:[#allocation74_spill] sm:$0xff]  ;;  %v5674_v55 = vld [vmem:[#allocation75_spill] sm:$0xff] }
 0x150   : > { %v667_v7 = vsel %vm603_vm2, %v5665_v50, -inf  ;;  %v668_v63 = vsel %vm604_vm1, %v5666_v62, -inf  ;;  %vm5668_vm11 = vcmp.eq.s32.totalorder %v2958_v33, 0  ;;  %vm5670_vm4 = vcmp.eq.s32.totalorder %v5629_v48, 0 }
 0x151   : > { %v669_v51 = vsel %vm5668_vm11, %v5667_v5, -inf  ;;  %v670_v9 = vsel %vm5670_vm4, %v5669_v6, -inf  ;;  %v723_v8 = vmax.f32 %v719_v45, %v663_v18  ;;  %v724_v11 = vmax.f32 %v720_v47, %v664_v19 }
 0x152   : > { %v725_v26 = vmax.f32 %v721_v53, %v665_v54  ;;  %v726_v30 = vmax.f32 %v722_v39, %v666_v59  ;;  %v671_v61 = vsel %vm607_vm12, %v5671_v35, -inf  ;;  %v672_v16 = vsel %vm608_vm15, %v5672_v12, -inf }
 0x153   : > { %v673_v2 = vsel %vm609_vm14, %v5673_v13, -inf  ;;  %v674_v48 = vsel %vm610_vm6, %v5674_v55, -inf  ;;  %v727_v52 = vmax.f32 %v723_v8, %v667_v7  ;;  %v728_v1 = vmax.f32 %v724_v11, %v668_v63 }
 0x154   : > { %v729_v20 = vmax.f32 %v725_v26, %v669_v51  ;;  %v730_v3 = vmax.f32 %v726_v30, %v670_v9 }
 0x155   : > { %v731_v10 = vmax.f32 %v727_v52, %v671_v61  ;;  %v732_v32 = vmax.f32 %v728_v1, %v672_v16 }
 0x156   : > { %v733_v49 = vmax.f32 %v729_v20, %v673_v2  ;;  %v734_v4 = vmax.f32 %v730_v3, %v674_v48 }
 0x157   : > { %v735_v18 = vmax.f32 %v731_v10, %v732_v32 }
 0x158   : > { %v736_v17 = vmax.f32 %v733_v49, %v734_v4 }
 0x15a   : > { %v737_v44 = vmax.f32 %v735_v18, %v736_v17 }
 0x15c   : > { %v738_v19 = vrot.slane %v737_v44, 4 }
 0x15e   : > { %v739_v27 = vmax.f32 %v737_v44, %v738_v19 }
 0x160   : > { %v740_v54 = vrot.slane %v739_v27, 2 }
 0x162   : > { %v741_v46 = vmax.f32 %v739_v27, %v740_v54 }
 0x164   : > { %v742_v31 = vrot.slane %v741_v46, 1 }
 0x166   : > { %v743_v59 = vmax.f32 %v741_v46, %v742_v31 }
 0x168   : > { %744 = vst [vmem:[#allocation3] sm:$0x1] %v743_v59 }
 0x169 PF: > { %p745_p5 = scmp.le.s32.totalorder %s2633_s13, 1  ;;  %p746_p6 = scmp.ge.s32.totalorder %s2636_s14, 1 }
 0x16b   : > { %p747_p7 = pnand %p746_p6, %p745_p5 }
 0x16c   : > { %vm751_vm1 = vcmp.eq.s32.totalorder (!%p747_p7), %v2686_v15, 1  ;;  %vm752_vm14 = vcmp.eq.s32.totalorder (!%p747_p7), %v2726_v29, 1  ;;  %vm753_vm2 = vcmp.eq.s32.totalorder (!%p747_p7), %v2684_v14, 1  ;;  %vm754_vm15 = vcmp.eq.s32.totalorder (!%p747_p7), %v2724_v28, 1  ;;  %v5675_v0 = vld [vmem:[#allocation71_spill] sm:$0xff] (!%p747_p7)  ;;  %v5676_v45 = vld [vmem:[#allocation77_spill] sm:$0xff] (!%p747_p7) }
 0x16d   : > { %750 = sbr.rel (%p747_p7) target bundleno = 434 (0x1b2), region = 44  ;;  %vm755_vm12 = vcmp.eq.s32.totalorder (!%p747_p7), %v2766_v43, 1  ;;  %vm756_vm6 = vcmp.eq.s32.totalorder (!%p747_p7), %v2764_v42, 1  ;;  %v5677_v47 = vld [vmem:[#allocation76_spill] sm:$0xff] (!%p747_p7)  ;;  %v5678_v53 = vld [vmem:[#allocation78_spill] sm:$0xff] (!%p747_p7)  ;;  %v5680_v50 = vld [vmem:[#allocation79_spill] sm:$0xff] (!%p747_p7) }
 0x16e   : > { %v5679_v39 = vld [vmem:[#allocation80_spill] sm:$0xff] (!%p747_p7)  ;;  %v5681_v7 = vld [vmem:[#allocation82_spill] sm:$0xff] (!%p747_p7)  ;;  %v5682_v62 = vld [vmem:[#allocation81_spill] sm:$0xff] (!%p747_p7)  ;;  %vm5705_vm7 = vcmp.eq.s32.totalorder (!%p747_p7), %v2846_v60, 1 }
 0x16f   : > { %v5683_v63 = vld [vmem:[#allocation84_spill] sm:$0xff] (!%p747_p7)  ;;  %v5684_v5 = vld [vmem:[#allocation83_spill] sm:$0xff] (!%p747_p7)  ;;  %v5685_v51 = vld [vmem:[#allocation86_spill] sm:$0xff] (!%p747_p7) }
 0x170   : > { %vm769_vm3 = vcmp.eq.s32.totalorder (!%p747_p7), %v5683_v63, 1  ;;  %vm770_vm0 = vcmp.eq.s32.totalorder (!%p747_p7), %v5684_v5, 1  ;;  %vm771_vm8 = vcmp.eq.s32.totalorder (!%p747_p7), %v5685_v51, 1  ;;  %v5686_v6 = vld [vmem:[#allocation85_spill] sm:$0xff] (!%p747_p7)  ;;  %v5687_v9 = vld [vmem:[#allocation88_spill] sm:$0xff] (!%p747_p7)  ;;  %v5688_v8 = vld [vmem:[#allocation87_spill] sm:$0xff] (!%p747_p7) }
 0x171   : > { %vm772_vm9 = vcmp.eq.s32.totalorder (!%p747_p7), %v5686_v6, 1  ;;  %vm773_vm13 = vcmp.eq.s32.totalorder (!%p747_p7), %v5687_v9, 1  ;;  %vm774_vm10 = vcmp.eq.s32.totalorder (!%p747_p7), %v5688_v8, 1  ;;  %v5689_v11 = vld [vmem:[#allocation90_spill] sm:$0xff] (!%p747_p7)  ;;  %v5690_v26 = vld [vmem:[#allocation89_spill] sm:$0xff] (!%p747_p7)  ;;  %v5691_v30 = vld [vmem:[#allocation92_spill] sm:$0xff] (!%p747_p7) }
 0x172   : > { %vm775_vm11 = vcmp.eq.s32.totalorder (!%p747_p7), %v5689_v11, 1  ;;  %vm776_vm4 = vcmp.eq.s32.totalorder (!%p747_p7), %v5690_v26, 1  ;;  %v5692_v35 = vld [vmem:[#allocation91_spill] sm:$0xff] (!%p747_p7)  ;;  %v5694_v16 = vld [vmem:[#allocation12_spill] sm:$0xff] (!%p747_p7)  ;;  %v5695_v2 = vld [vmem:[#allocation13_spill] sm:$0xff] (!%p747_p7) }
 0x173   : > { %v5693_v61 = vld [vmem:[#allocation11_spill] sm:$0xff] (!%p747_p7)  ;;  %v816_v13 = vsel (!%p747_p7), %vm752_vm14, %v5694_v16, -inf  ;;  %v817_v55 = vsel (!%p747_p7), %vm753_vm2, %v5695_v2, -inf  ;;  %v5696_v48 = vld [vmem:[#allocation14_spill] sm:$0xff] (!%p747_p7)  ;;  %v5698_v3 = vld [vmem:[#allocation16_spill] sm:$0xff] (!%p747_p7)  ;;  %vm5702_vm14 = vcmp.eq.s32.totalorder (!%p747_p7), %v2804_v56, 1 }
 0x174   : > { %v815_v12 = vsel %vm751_vm1, %v5693_v61, -inf  ;;  %v818_v52 = vsel %vm754_vm15, %v5696_v48, -inf  ;;  %v5697_v1 = vld [vmem:[#allocation15_spill] sm:$0xff]  ;;  %v820_v10 = vsel %vm756_vm6, %v5698_v3, -inf  ;;  %v5699_v32 = vld [vmem:[#allocation17_spill] sm:$0xff]  ;;  %vm5700_vm1 = vcmp.eq.s32.totalorder %v2806_v57, 1 }
 0x175   : > { %v819_v20 = vsel %vm755_vm12, %v5697_v1, -inf  ;;  %v821_v49 = vsel %vm5700_vm1, %v5699_v32, -inf  ;;  %v5701_v4 = vld [vmem:[#allocation18_spill] sm:$0xff]  ;;  %vm779_vm2 = vcmp.eq.s32.totalorder %v2898_v40, 1  ;;  %v5703_v17 = vld [vmem:[#allocation93_spill] sm:$0xff]  ;;  %v5704_v44 = vld [vmem:[#allocation19_spill] sm:$0xff]  ;;  %v880_v48 = vmax.f32 %v816_v13, %v820_v10 }
 0x176   : > { %v822_v18 = vsel %vm5702_vm14, %v5701_v4, -inf  ;;  %v823_v19 = vsel %vm5705_vm7, %v5704_v44, -inf  ;;  %v5706_v27 = vld [vmem:[#allocation20_spill] sm:$0xff]  ;;  %vm5707_vm6 = vcmp.eq.s32.totalorder %v5675_v0, 1  ;;  %v5708_v46 = vld [vmem:[#allocation21_spill] sm:$0xff]  ;;  %vm5709_vm1 = vcmp.eq.s32.totalorder %v5676_v45, 1 }
 0x177   : > { %v824_v54 = vsel %vm5707_vm6, %v5706_v27, -inf  ;;  %v825_v31 = vsel %vm5709_vm1, %v5708_v46, -inf  ;;  %v5710_v59 = vld [vmem:[#allocation22_spill] sm:$0xff]  ;;  %vm5711_vm14 = vcmp.eq.s32.totalorder %v5677_v47, 1  ;;  %v879_v2 = vmax.f32 %v815_v12, %v819_v20  ;;  %v5713_v3 = vld [vmem:[#allocation23_spill] sm:$0xff]  ;;  %v5715_v32 = vld [vmem:[#allocation24_spill] sm:$0xff] }
 0x178   : > { %v826_v61 = vsel %vm5711_vm14, %v5710_v59, -inf  ;;  %v5712_v16 = vld [vmem:[#allocation94_spill] sm:$0xff]  ;;  %v881_v0 = vmax.f32 %v817_v55, %v821_v49  ;;  %v882_v1 = vmax.f32 %v818_v52, %v822_v18  ;;  %vm5714_vm6 = vcmp.eq.s32.totalorder %v2866_v58, 1  ;;  %v5717_v4 = vld [vmem:[#allocation25_spill] sm:$0xff]  ;;  %v5721_v12 = vld [vmem:[#allocation96_spill] sm:$0xff] }
 0x179   : > { %v827_v45 = vsel %vm5714_vm6, %v5713_v3, -inf  ;;  %vm5716_vm1 = vcmp.eq.s32.totalorder %v5678_v53, 1  ;;  %vm5718_vm14 = vcmp.eq.s32.totalorder %v5679_v39, 1  ;;  %v5719_v27 = vld [vmem:[#allocation26_spill] sm:$0xff]  ;;  %vm5720_vm15 = vcmp.eq.s32.totalorder %v5680_v50, 1  ;;  %v5722_v13 = vld [vmem:[#allocation95_spill] sm:$0xff] }
 0x17a   : > { %v828_v47 = vsel %vm5716_vm1, %v5715_v32, -inf  ;;  %v829_v44 = vsel %vm5718_vm14, %v5717_v4, -inf  ;;  %v830_v46 = vsel %vm5720_vm15, %v5719_v27, -inf  ;;  %vm787_vm7 = vcmp.eq.s32.totalorder %v5721_v12, 1  ;;  %v5723_v55 = vld [vmem:[#allocation98_spill] sm:$0xff]  ;;  %v5724_v52 = vld [vmem:[#allocation97_spill] sm:$0xff] }
 0x17b   : > { %vm788_vm12 = vcmp.eq.s32.totalorder %v5722_v13, 1  ;;  %v883_v20 = vmax.f32 %v879_v2, %v823_v19  ;;  %v884_v10 = vmax.f32 %v880_v48, %v824_v54  ;;  %v885_v53 = vmax.f32 %v881_v0, %v825_v31  ;;  %v5725_v18 = vld [vmem:[#allocation27_spill] sm:$0xff]  ;;  %v5727_v59 = vld [vmem:[#allocation28_spill] sm:$0xff]  ;;  %v5729_v3 = vld [vmem:[#allocation29_spill] sm:$0xff] }
 0x17c   : > { %v886_v49 = vmax.f32 %v882_v1, %v826_v61  ;;  %vm5726_vm1 = vcmp.eq.s32.totalorder %v5681_v7, 1  ;;  %vm5728_vm14 = vcmp.eq.s32.totalorder %v5682_v62, 1  ;;  %v833_v32 = vsel %vm769_vm3, %v5729_v3, -inf  ;;  %v5730_v4 = vld [vmem:[#allocation30_spill] sm:$0xff]  ;;  %v5731_v19 = vld [vmem:[#allocation100_spill] sm:$0xff]  ;;  %v5732_v54 = vld [vmem:[#allocation99_spill] sm:$0xff] }
 0x17d   : > { %v831_v39 = vsel %vm5726_vm1, %v5725_v18, -inf  ;;  %v832_v50 = vsel %vm5728_vm14, %v5727_v59, -inf  ;;  %v834_v27 = vsel %vm770_vm0, %v5730_v4, -inf  ;;  %vm791_vm15 = vcmp.eq.s32.totalorder %v5731_v19, 1  ;;  %v5733_v31 = vld [vmem:[#allocation102_spill] sm:$0xff]  ;;  %v5734_v7 = vld [vmem:[#allocation101_spill] sm:$0xff] }
 0x17e   : > { %vm792_vm6 = vcmp.eq.s32.totalorder %v5732_v54, 1  ;;  %vm793_vm5 = vcmp.eq.s32.totalorder %v5733_v31, 1  ;;  %vm794_vm1 = vcmp.eq.s32.totalorder %v5734_v7, 1  ;;  %v887_v61 = vmax.f32 %v883_v20, %v827_v45  ;;  %v5735_v0 = vld [vmem:[#allocation31_spill] sm:$0xff]  ;;  %v5736_v1 = vld [vmem:[#allocation32_spill] sm:$0xff]  ;;  %v5737_v18 = vld [vmem:[#allocation33_spill] sm:$0xff] }
 0x17f   : > { %v888_v2 = vmax.f32 %v884_v10, %v828_v47  ;;  %v889_v62 = vmax.f32 %v885_v53, %v829_v44  ;;  %v890_v48 = vmax.f32 %v886_v49, %v830_v46  ;;  %v835_v63 = vsel %vm771_vm8, %v5735_v0, -inf  ;;  %v5738_v3 = vld [vmem:[#allocation34_spill] sm:$0xff]  ;;  %v5739_v45 = vld [vmem:[#allocation104_spill] sm:$0xff]  ;;  %v5740_v47 = vld [vmem:[#allocation103_spill] sm:$0xff] }
 0x180   : > { %v836_v5 = vsel %vm772_vm9, %v5736_v1, -inf  ;;  %v837_v59 = vsel %vm773_vm13, %v5737_v18, -inf  ;;  %v838_v4 = vsel %vm774_vm10, %v5738_v3, -inf  ;;  %vm795_vm3 = vcmp.eq.s32.totalorder %v5739_v45, 1  ;;  %v5741_v44 = vld [vmem:[#allocation106_spill] sm:$0xff]  ;;  %v5742_v51 = vld [vmem:[#allocation105_spill] sm:$0xff] }
 0x181   : > { %vm796_vm0 = vcmp.eq.s32.totalorder %v5740_v47, 1  ;;  %v891_v46 = vmax.f32 %v887_v61, %v831_v39  ;;  %v892_v20 = vmax.f32 %v888_v2, %v832_v50  ;;  %v893_v6 = vmax.f32 %v889_v62, %v833_v32  ;;  %v5743_v53 = vld [vmem:[#allocation35_spill] sm:$0xff]  ;;  %v5744_v49 = vld [vmem:[#allocation36_spill] sm:$0xff]  ;;  %v5745_v0 = vld [vmem:[#allocation37_spill] sm:$0xff] }
 0x182   : > { %v894_v10 = vmax.f32 %v890_v48, %v834_v27  ;;  %v839_v9 = vsel %vm775_vm11, %v5743_v53, -inf  ;;  %v840_v8 = vsel %vm776_vm4, %v5744_v49, -inf  ;;  %vm5746_vm9 = vcmp.eq.s32.totalorder %v5691_v30, 1  ;;  %v5747_v18 = vld [vmem:[#allocation38_spill] sm:$0xff]  ;;  %v5749_v39 = vld [vmem:[#allocation108_spill] sm:$0xff]  ;;  %v5750_v50 = vld [vmem:[#allocation107_spill] sm:$0xff] }
 0x183   : > { %v841_v1 = vsel %vm5746_vm9, %v5745_v0, -inf  ;;  %vm5748_vm13 = vcmp.eq.s32.totalorder %v5692_v35, 1  ;;  %vm799_vm10 = vcmp.eq.s32.totalorder %v5749_v39, 1  ;;  %v5751_v32 = vld [vmem:[#allocation110_spill] sm:$0xff]  ;;  %v5752_v11 = vld [vmem:[#allocation109_spill] sm:$0xff]  ;;  %v895_v27 = vmax.f32 %v891_v46, %v835_v63  ;;  %v5753_v62 = vld [vmem:[#allocation39_spill] sm:$0xff] }
 0x184   : > { %v842_v3 = vsel %vm5748_vm13, %v5747_v18, -inf  ;;  %v896_v61 = vmax.f32 %v892_v20, %v836_v5  ;;  %v897_v26 = vmax.f32 %v893_v6, %v837_v59  ;;  %v898_v2 = vmax.f32 %v894_v10, %v838_v4  ;;  %v5754_v48 = vld [vmem:[#allocation40_spill] sm:$0xff]  ;;  %v5756_v53 = vld [vmem:[#allocation41_spill] sm:$0xff]  ;;  %v5758_v0 = vld [vmem:[#allocation42_spill] sm:$0xff] }
 0x185   : > { %v843_v30 = vsel %vm779_vm2, %v5753_v62, -inf  ;;  %vm5755_vm4 = vcmp.eq.s32.totalorder %v2896_v41, 1  ;;  %vm5757_vm9 = vcmp.eq.s32.totalorder %v2902_v38, 1  ;;  %vm5759_vm13 = vcmp.eq.s32.totalorder %v5703_v17, 1  ;;  %v5760_v63 = vld [vmem:[#allocation111_spill] sm:$0xff]  ;;  %v5763_v10 = vld [vmem:[#allocation44_spill] sm:$0xff] }
 0x186   : > { %v844_v35 = vsel %vm5755_vm4, %v5754_v48, -inf  ;;  %v845_v49 = vsel %vm5757_vm9, %v5756_v53, -inf  ;;  %v846_v18 = vsel %vm5759_vm13, %v5758_v0, -inf  ;;  %v899_v5 = vmax.f32 %v895_v27, %v839_v9  ;;  %v5761_v20 = vld [vmem:[#allocation43_spill] sm:$0xff]  ;;  %v5765_v62 = vld [vmem:[#allocation45_spill] sm:$0xff]  ;;  %v5767_v53 = vld [vmem:[#allocation46_spill] sm:$0xff] }
 0x187   : > { %v900_v59 = vmax.f32 %v896_v61, %v840_v8  ;;  %v901_v4 = vmax.f32 %v897_v26, %v841_v1  ;;  %v902_v46 = vmax.f32 %v898_v2, %v842_v3  ;;  %vm5762_vm4 = vcmp.eq.s32.totalorder %v2906_v36, 1  ;;  %v5769_v9 = vld [vmem:[#allocation112_spill] sm:$0xff]  ;;  %v5770_v61 = vld [vmem:[#allocation47_spill] sm:$0xff] }
 0x188   : > { %v847_v6 = vsel %vm5762_vm4, %v5761_v20, -inf  ;;  %vm5764_vm9 = vcmp.eq.s32.totalorder %v2904_v37, 1  ;;  %vm5766_vm13 = vcmp.eq.s32.totalorder %v2910_v34, 1  ;;  %vm5768_vm8 = vcmp.eq.s32.totalorder %v5712_v16, 1  ;;  %v5771_v2 = vld [vmem:[#allocation48_spill] sm:$0xff]  ;;  %v5772_v20 = vld [vmem:[#allocation49_spill] sm:$0xff] }
 0x189   : > { %v848_v17 = vsel %vm5764_vm9, %v5763_v10, -inf  ;;  %v849_v48 = vsel %vm5766_vm13, %v5765_v62, -inf  ;;  %v850_v0 = vsel %vm5768_vm8, %v5767_v53, -inf  ;;  %vm807_vm2 = vcmp.eq.s32.totalorder %v2954_v21, 1  ;;  %v5774_v62 = vld [vmem:[#allocation50_spill] sm:$0xff]  ;;  %v5779_v12 = vld [vmem:[#allocation115_spill] sm:$0xff] }
 0x18a   : > { %vm808_vm14 = vcmp.eq.s32.totalorder %v2952_v22, 1  ;;  %v903_v8 = vmax.f32 %v899_v5, %v843_v30  ;;  %v904_v1 = vmax.f32 %v900_v59, %v844_v35  ;;  %v905_v3 = vmax.f32 %v901_v4, %v845_v49  ;;  %v5776_v30 = vld [vmem:[#allocation114_spill] sm:$0xff]  ;;  %v5777_v35 = vld [vmem:[#allocation113_spill] sm:$0xff]  ;;  %v5778_v49 = vld [vmem:[#allocation116_spill] sm:$0xff] }
 0x18b   : > { %v906_v27 = vmax.f32 %v902_v46, %v846_v18  ;;  %v851_v26 = vsel %vm787_vm7, %v5770_v61, -inf  ;;  %v852_v16 = vsel %vm788_vm12, %v5771_v2, -inf  ;;  %vm5773_vm8 = vcmp.eq.s32.totalorder %v5723_v55, 1  ;;  %v5780_v4 = vld [vmem:[#allocation51_spill] sm:$0xff]  ;;  %v5781_v46 = vld [vmem:[#allocation52_spill] sm:$0xff]  ;;  %v5782_v61 = vld [vmem:[#allocation53_spill] sm:$0xff] }
 0x18c   : > { %v853_v10 = vsel %vm5773_vm8, %v5772_v20, -inf  ;;  %vm5775_vm9 = vcmp.eq.s32.totalorder %v5724_v52, 1  ;;  %vm811_vm13 = vcmp.eq.s32.totalorder %v5776_v30, 1  ;;  %vm812_vm4 = vcmp.eq.s32.totalorder %v5777_v35, 1  ;;  %v5783_v20 = vld [vmem:[#allocation54_spill] sm:$0xff] }
 0x18d   : > { %v854_v53 = vsel %vm5775_vm9, %v5774_v62, -inf  ;;  %vm813_vm11 = vcmp.eq.s32.totalorder %v5778_v49, 1  ;;  %vm814_vm7 = vcmp.eq.s32.totalorder %v5779_v12, 1  ;;  %v907_v18 = vmax.f32 %v903_v8, %v847_v6  ;;  %v5784_v8 = vld [vmem:[#allocation55_spill] sm:$0xff] }
 0x18e   : > { %v908_v5 = vmax.f32 %v904_v1, %v848_v17  ;;  %v909_v13 = vmax.f32 %v905_v3, %v849_v48  ;;  %v910_v59 = vmax.f32 %v906_v27, %v850_v0  ;;  %v855_v55 = vsel %vm791_vm15, %v5780_v4, -inf  ;;  %v5785_v1 = vld [vmem:[#allocation56_spill] sm:$0xff]  ;;  %v5786_v3 = vld [vmem:[#allocation57_spill] sm:$0xff]  ;;  %v5788_v27 = vld [vmem:[#allocation58_spill] sm:$0xff] }
 0x18f   : > { %v856_v52 = vsel %vm792_vm6, %v5781_v46, -inf  ;;  %v857_v2 = vsel %vm793_vm5, %v5782_v61, -inf  ;;  %v858_v62 = vsel %vm794_vm1, %v5783_v20, -inf  ;;  %v911_v6 = vmax.f32 %v907_v18, %v851_v26  ;;  %v5790_v18 = vld [vmem:[#allocation59_spill] sm:$0xff]  ;;  %v5801_v20 = vld [vmem:[#allocation65_spill] sm:$0xff] }
 0x190   : > { %v912_v17 = vmax.f32 %v908_v5, %v852_v16  ;;  %v913_v48 = vmax.f32 %v909_v13, %v853_v10  ;;  %v914_v0 = vmax.f32 %v910_v59, %v854_v53  ;;  %v859_v19 = vsel %vm795_vm3, %v5784_v8, -inf  ;;  %v5791_v5 = vld [vmem:[#allocation60_spill] sm:$0xff]  ;;  %v5793_v13 = vld [vmem:[#allocation61_spill] sm:$0xff]  ;;  %v5795_v59 = vld [vmem:[#allocation62_spill] sm:$0xff] }
 0x191   : > { %v860_v54 = vsel %vm796_vm0, %v5785_v1, -inf  ;;  %vm5787_vm12 = vcmp.eq.s32.totalorder %v5741_v44, 1  ;;  %vm5789_vm5 = vcmp.eq.s32.totalorder %v5742_v51, 1  ;;  %v915_v26 = vmax.f32 %v911_v6, %v855_v55  ;;  %v5797_v61 = vld [vmem:[#allocation63_spill] sm:$0xff]  ;;  %v5806_v1 = vld [vmem:[#allocation68_spill] sm:$0xff] }
 0x192   : > { %v861_v31 = vsel %vm5787_vm12, %v5786_v3, -inf  ;;  %v862_v7 = vsel %vm5789_vm5, %v5788_v27, -inf  ;;  %v916_v16 = vmax.f32 %v912_v17, %v856_v52  ;;  %v917_v10 = vmax.f32 %v913_v48, %v857_v2  ;;  %v5799_v2 = vld [vmem:[#allocation64_spill] sm:$0xff]  ;;  %v5805_v8 = vld [vmem:[#allocation67_spill] sm:$0xff] }
 0x193   : > { %v918_v53 = vmax.f32 %v914_v0, %v858_v62  ;;  %v863_v45 = vsel %vm799_vm10, %v5790_v18, -inf  ;;  %vm5792_vm6 = vcmp.eq.s32.totalorder %v5750_v50, 1  ;;  %vm5794_vm15 = vcmp.eq.s32.totalorder %v5751_v32, 1  ;;  %v5803_v62 = vld [vmem:[#allocation66_spill] sm:$0xff] }
 0x194   : > { %v864_v47 = vsel %vm5792_vm6, %v5791_v5, -inf  ;;  %v865_v44 = vsel %vm5794_vm15, %v5793_v13, -inf  ;;  %vm5796_vm1 = vcmp.eq.s32.totalorder %v5752_v11, 1  ;;  %v919_v4 = vmax.f32 %v915_v26, %v859_v19 }
 0x195   : > { %v866_v51 = vsel %vm5796_vm1, %v5795_v59, -inf  ;;  %v920_v55 = vmax.f32 %v916_v16, %v860_v54  ;;  %v921_v46 = vmax.f32 %v917_v10, %v861_v31  ;;  %v922_v52 = vmax.f32 %v918_v53, %v862_v7  ;;  %v5807_v54 = vld [vmem:[#allocation69_spill] sm:$0xff]  ;;  %v5809_v31 = vld [vmem:[#allocation70_spill] sm:$0xff]  ;;  %v5811_v53 = vld [vmem:[#allocation72_spill] sm:$0xff] }
 0x196   : > { %vm5798_vm3 = vcmp.eq.s32.totalorder %v2946_v25, 1  ;;  %vm5800_vm0 = vcmp.eq.s32.totalorder %v5760_v63, 1  ;;  %vm5802_vm10 = vcmp.eq.s32.totalorder %v2950_v23, 1  ;;  %vm5804_vm8 = vcmp.eq.s32.totalorder %v2948_v24, 1 }
 0x197   : > { %v867_v39 = vsel %vm5798_vm3, %v5797_v61, -inf  ;;  %v868_v50 = vsel %vm5800_vm0, %v5799_v2, -inf  ;;  %v869_v32 = vsel %vm5802_vm10, %v5801_v20, -inf  ;;  %v870_v11 = vsel %vm5804_vm8, %v5803_v62, -inf }
 0x198   : > { %v923_v6 = vmax.f32 %v919_v4, %v863_v45  ;;  %v924_v17 = vmax.f32 %v920_v55, %v864_v47  ;;  %v925_v48 = vmax.f32 %v921_v46, %v865_v44  ;;  %v926_v0 = vmax.f32 %v922_v52, %v866_v51  ;;  %v5812_v45 = vld [vmem:[#allocation73_spill] sm:$0xff]  ;;  %v5813_v47 = vld [vmem:[#allocation74_spill] sm:$0xff]  ;;  %v5814_v44 = vld [vmem:[#allocation75_spill] sm:$0xff] }
 0x199   : > { %v871_v19 = vsel %vm807_vm2, %v5805_v8, -inf  ;;  %v872_v63 = vsel %vm808_vm14, %v5806_v1, -inf  ;;  %vm5808_vm9 = vcmp.eq.s32.totalorder %v2958_v33, 1  ;;  %vm5810_vm12 = vcmp.eq.s32.totalorder %v5769_v9, 1 }
 0x19a   : > { %v873_v3 = vsel %vm5808_vm9, %v5807_v54, -inf  ;;  %v874_v27 = vsel %vm5810_vm12, %v5809_v31, -inf  ;;  %v927_v7 = vmax.f32 %v923_v6, %v867_v39  ;;  %v928_v26 = vmax.f32 %v924_v17, %v868_v50 }
 0x19b   : > { %v929_v16 = vmax.f32 %v925_v48, %v869_v32  ;;  %v930_v10 = vmax.f32 %v926_v0, %v870_v11  ;;  %v875_v18 = vsel %vm811_vm13, %v5811_v53, -inf  ;;  %v876_v5 = vsel %vm812_vm4, %v5812_v45, -inf }
 0x19c   : > { %v877_v13 = vsel %vm813_vm11, %v5813_v47, -inf  ;;  %v878_v9 = vsel %vm814_vm7, %v5814_v44, -inf  ;;  %v931_v59 = vmax.f32 %v927_v7, %v871_v19  ;;  %v932_v51 = vmax.f32 %v928_v26, %v872_v63 }
 0x19d   : > { %v933_v4 = vmax.f32 %v929_v16, %v873_v3  ;;  %v934_v55 = vmax.f32 %v930_v10, %v874_v27 }
 0x19e   : > { %v935_v46 = vmax.f32 %v931_v59, %v875_v18  ;;  %v936_v52 = vmax.f32 %v932_v51, %v876_v5 }
 0x19f   : > { %v937_v30 = vmax.f32 %v933_v4, %v877_v13  ;;  %v938_v61 = vmax.f32 %v934_v55, %v878_v9 }
 0x1a0   : > { %v939_v39 = vmax.f32 %v935_v46, %v936_v52 }
 0x1a1   : > { %v940_v2 = vmax.f32 %v937_v30, %v938_v61 }
 0x1a3   : > { %v941_v35 = vmax.f32 %v939_v39, %v940_v2 }
 0x1a5   : > { %v942_v50 = vrot.slane %v941_v35, 4 }
 0x1a7   : > { %v943_v20 = vmax.f32 %v941_v35, %v942_v50 }
 0x1a9   : > { %v944_v32 = vrot.slane %v943_v20, 2 }
 0x1ab   : > { %v945_v49 = vmax.f32 %v943_v20, %v944_v32 }
 0x1ad   : > { %v946_v62 = vrot.slane %v945_v49, 1 }
 0x1af   : > { %v947_v11 = vmax.f32 %v945_v49, %v946_v62 }
 0x1b1   : > { %948 = vst [vmem:[#allocation3 + $0x1] sm:$0x1] %v947_v11 }
 0x1b2 PF: > { %p949_p8 = scmp.le.s32.totalorder %s2633_s13, 2  ;;  %p950_p9 = scmp.ge.s32.totalorder %s2636_s14, 2 }
 0x1b4   : > { %p951_p10 = pnand %p950_p9, %p949_p8 }
 0x1b5   : > { %vm955_vm14 = vcmp.eq.s32.totalorder (!%p951_p10), %v2686_v15, 2  ;;  %vm956_vm11 = vcmp.eq.s32.totalorder (!%p951_p10), %v2726_v29, 2  ;;  %vm957_vm2 = vcmp.eq.s32.totalorder (!%p951_p10), %v2684_v14, 2  ;;  %vm958_vm4 = vcmp.eq.s32.totalorder (!%p951_p10), %v2724_v28, 2  ;;  %v5815_v12 = vld [vmem:[#allocation71_spill] sm:$0xff] (!%p951_p10)  ;;  %v5816_v6 = vld [vmem:[#allocation77_spill] sm:$0xff] (!%p951_p10) }
 0x1b6   : > { %954 = sbr.rel (%p951_p10) target bundleno = 507 (0x1fb), region = 48  ;;  %vm959_vm13 = vcmp.eq.s32.totalorder (!%p951_p10), %v2766_v43, 2  ;;  %vm960_vm7 = vcmp.eq.s32.totalorder (!%p951_p10), %v2764_v42, 2  ;;  %v5817_v17 = vld [vmem:[#allocation76_spill] sm:$0xff] (!%p951_p10)  ;;  %v5818_v48 = vld [vmem:[#allocation78_spill] sm:$0xff] (!%p951_p10)  ;;  %v5820_v8 = vld [vmem:[#allocation79_spill] sm:$0xff] (!%p951_p10) }
 0x1b7   : > { %v5819_v0 = vld [vmem:[#allocation80_spill] sm:$0xff] (!%p951_p10)  ;;  %v5821_v19 = vld [vmem:[#allocation82_spill] sm:$0xff] (!%p951_p10)  ;;  %v5822_v1 = vld [vmem:[#allocation81_spill] sm:$0xff] (!%p951_p10)  ;;  %vm5845_vm5 = vcmp.eq.s32.totalorder (!%p951_p10), %v2846_v60, 2 }
 0x1b8   : > { %v5823_v63 = vld [vmem:[#allocation84_spill] sm:$0xff] (!%p951_p10)  ;;  %v5824_v54 = vld [vmem:[#allocation83_spill] sm:$0xff] (!%p951_p10)  ;;  %v5825_v3 = vld [vmem:[#allocation86_spill] sm:$0xff] (!%p951_p10) }
 0x1b9   : > { %vm973_vm15 = vcmp.eq.s32.totalorder (!%p951_p10), %v5823_v63, 2  ;;  %vm974_vm1 = vcmp.eq.s32.totalorder (!%p951_p10), %v5824_v54, 2  ;;  %vm975_vm3 = vcmp.eq.s32.totalorder (!%p951_p10), %v5825_v3, 2  ;;  %v5826_v31 = vld [vmem:[#allocation85_spill] sm:$0xff] (!%p951_p10)  ;;  %v5827_v27 = vld [vmem:[#allocation88_spill] sm:$0xff] (!%p951_p10)  ;;  %v5828_v7 = vld [vmem:[#allocation87_spill] sm:$0xff] (!%p951_p10) }
 0x1ba   : > { %vm976_vm0 = vcmp.eq.s32.totalorder (!%p951_p10), %v5826_v31, 2  ;;  %vm977_vm10 = vcmp.eq.s32.totalorder (!%p951_p10), %v5827_v27, 2  ;;  %vm978_vm8 = vcmp.eq.s32.totalorder (!%p951_p10), %v5828_v7, 2  ;;  %v5829_v26 = vld [vmem:[#allocation90_spill] sm:$0xff] (!%p951_p10)  ;;  %v5830_v16 = vld [vmem:[#allocation89_spill] sm:$0xff] (!%p951_p10)  ;;  %v5831_v10 = vld [vmem:[#allocation92_spill] sm:$0xff] (!%p951_p10) }
 0x1bb   : > { %vm979_vm9 = vcmp.eq.s32.totalorder (!%p951_p10), %v5829_v26, 2  ;;  %vm980_vm12 = vcmp.eq.s32.totalorder (!%p951_p10), %v5830_v16, 2  ;;  %v5832_v53 = vld [vmem:[#allocation91_spill] sm:$0xff] (!%p951_p10)  ;;  %v5834_v5 = vld [vmem:[#allocation12_spill] sm:$0xff] (!%p951_p10)  ;;  %v5835_v13 = vld [vmem:[#allocation13_spill] sm:$0xff] (!%p951_p10) }
 0x1bc   : > { %v5833_v18 = vld [vmem:[#allocation11_spill] sm:$0xff] (!%p951_p10)  ;;  %v1020_v47 = vsel (!%p951_p10), %vm956_vm11, %v5834_v5, -inf  ;;  %v1021_v44 = vsel (!%p951_p10), %vm957_vm2, %v5835_v13, -inf  ;;  %v5836_v9 = vld [vmem:[#allocation14_spill] sm:$0xff] (!%p951_p10)  ;;  %v5838_v55 = vld [vmem:[#allocation16_spill] sm:$0xff] (!%p951_p10)  ;;  %vm5842_vm11 = vcmp.eq.s32.totalorder (!%p951_p10), %v2804_v56, 2 }
 0x1bd   : > { %v1019_v45 = vsel %vm955_vm14, %v5833_v18, -inf  ;;  %v1022_v59 = vsel %vm958_vm4, %v5836_v9, -inf  ;;  %v5837_v51 = vld [vmem:[#allocation15_spill] sm:$0xff]  ;;  %v1024_v46 = vsel %vm960_vm7, %v5838_v55, -inf  ;;  %v5839_v52 = vld [vmem:[#allocation17_spill] sm:$0xff]  ;;  %vm5840_vm14 = vcmp.eq.s32.totalorder %v2806_v57, 2 }
 0x1be   : > { %v1023_v4 = vsel %vm959_vm13, %v5837_v51, -inf  ;;  %v1025_v30 = vsel %vm5840_vm14, %v5839_v52, -inf  ;;  %v5841_v61 = vld [vmem:[#allocation18_spill] sm:$0xff]  ;;  %vm983_vm2 = vcmp.eq.s32.totalorder %v2898_v40, 2  ;;  %v5843_v2 = vld [vmem:[#allocation93_spill] sm:$0xff]  ;;  %v5844_v35 = vld [vmem:[#allocation19_spill] sm:$0xff]  ;;  %v1084_v9 = vmax.f32 %v1020_v47, %v1024_v46 }
 0x1bf   : > { %v1026_v39 = vsel %vm5842_vm11, %v5841_v61, -inf  ;;  %v1027_v50 = vsel %vm5845_vm5, %v5844_v35, -inf  ;;  %v5846_v20 = vld [vmem:[#allocation20_spill] sm:$0xff]  ;;  %vm5847_vm7 = vcmp.eq.s32.totalorder %v5815_v12, 2  ;;  %v5848_v49 = vld [vmem:[#allocation21_spill] sm:$0xff]  ;;  %vm5849_vm14 = vcmp.eq.s32.totalorder %v5816_v6, 2 }
 0x1c0   : > { %v1028_v32 = vsel %vm5847_vm7, %v5846_v20, -inf  ;;  %v1029_v62 = vsel %vm5849_vm14, %v5848_v49, -inf  ;;  %v5850_v11 = vld [vmem:[#allocation22_spill] sm:$0xff]  ;;  %vm5851_vm11 = vcmp.eq.s32.totalorder %v5817_v17, 2  ;;  %v1083_v13 = vmax.f32 %v1019_v45, %v1023_v4  ;;  %v5853_v55 = vld [vmem:[#allocation23_spill] sm:$0xff]  ;;  %v5855_v52 = vld [vmem:[#allocation24_spill] sm:$0xff] }
 0x1c1   : > { %v1030_v18 = vsel %vm5851_vm11, %v5850_v11, -inf  ;;  %v5852_v5 = vld [vmem:[#allocation94_spill] sm:$0xff]  ;;  %v1085_v12 = vmax.f32 %v1021_v44, %v1025_v30  ;;  %v1086_v51 = vmax.f32 %v1022_v59, %v1026_v39  ;;  %vm5854_vm7 = vcmp.eq.s32.totalorder %v2866_v58, 2  ;;  %v5857_v61 = vld [vmem:[#allocation25_spill] sm:$0xff]  ;;  %v5861_v45 = vld [vmem:[#allocation96_spill] sm:$0xff] }
 0x1c2   : > { %v1031_v6 = vsel %vm5854_vm7, %v5853_v55, -inf  ;;  %vm5856_vm14 = vcmp.eq.s32.totalorder %v5818_v48, 2  ;;  %vm5858_vm11 = vcmp.eq.s32.totalorder %v5819_v0, 2  ;;  %v5859_v20 = vld [vmem:[#allocation26_spill] sm:$0xff]  ;;  %vm5860_vm4 = vcmp.eq.s32.totalorder %v5820_v8, 2  ;;  %v5862_v47 = vld [vmem:[#allocation95_spill] sm:$0xff] }
 0x1c3   : > { %v1032_v17 = vsel %vm5856_vm14, %v5855_v52, -inf  ;;  %v1033_v35 = vsel %vm5858_vm11, %v5857_v61, -inf  ;;  %v1034_v49 = vsel %vm5860_vm4, %v5859_v20, -inf  ;;  %vm991_vm5 = vcmp.eq.s32.totalorder %v5861_v45, 2  ;;  %v5863_v44 = vld [vmem:[#allocation98_spill] sm:$0xff]  ;;  %v5864_v59 = vld [vmem:[#allocation97_spill] sm:$0xff] }
 0x1c4   : > { %vm992_vm13 = vcmp.eq.s32.totalorder %v5862_v47, 2  ;;  %v1087_v4 = vmax.f32 %v1083_v13, %v1027_v50  ;;  %v1088_v46 = vmax.f32 %v1084_v9, %v1028_v32  ;;  %v1089_v48 = vmax.f32 %v1085_v12, %v1029_v62  ;;  %v5865_v39 = vld [vmem:[#allocation27_spill] sm:$0xff]  ;;  %v5867_v11 = vld [vmem:[#allocation28_spill] sm:$0xff]  ;;  %v5869_v55 = vld [vmem:[#allocation29_spill] sm:$0xff] }
 0x1c5   : > { %v1090_v30 = vmax.f32 %v1086_v51, %v1030_v18  ;;  %vm5866_vm14 = vcmp.eq.s32.totalorder %v5821_v19, 2  ;;  %vm5868_vm11 = vcmp.eq.s32.totalorder %v5822_v1, 2  ;;  %v1037_v52 = vsel %vm973_vm15, %v5869_v55, -inf  ;;  %v5870_v61 = vld [vmem:[#allocation30_spill] sm:$0xff]  ;;  %v5871_v50 = vld [vmem:[#allocation100_spill] sm:$0xff]  ;;  %v5872_v32 = vld [vmem:[#allocation99_spill] sm:$0xff] }
 0x1c6   : > { %v1035_v0 = vsel %vm5866_vm14, %v5865_v39, -inf  ;;  %v1036_v8 = vsel %vm5868_vm11, %v5867_v11, -inf  ;;  %v1038_v20 = vsel %vm974_vm1, %v5870_v61, -inf  ;;  %vm995_vm4 = vcmp.eq.s32.totalorder %v5871_v50, 2  ;;  %v5873_v62 = vld [vmem:[#allocation102_spill] sm:$0xff]  ;;  %v5874_v19 = vld [vmem:[#allocation101_spill] sm:$0xff] }
 0x1c7   : > { %vm996_vm7 = vcmp.eq.s32.totalorder %v5872_v32, 2  ;;  %vm997_vm6 = vcmp.eq.s32.totalorder %v5873_v62, 2  ;;  %vm998_vm14 = vcmp.eq.s32.totalorder %v5874_v19, 2  ;;  %v1091_v18 = vmax.f32 %v1087_v4, %v1031_v6  ;;  %v5875_v12 = vld [vmem:[#allocation31_spill] sm:$0xff]  ;;  %v5876_v51 = vld [vmem:[#allocation32_spill] sm:$0xff]  ;;  %v5877_v39 = vld [vmem:[#allocation33_spill] sm:$0xff] }
 0x1c8   : > { %v1092_v13 = vmax.f32 %v1088_v46, %v1032_v17  ;;  %v1093_v1 = vmax.f32 %v1089_v48, %v1033_v35  ;;  %v1094_v9 = vmax.f32 %v1090_v30, %v1034_v49  ;;  %v1039_v63 = vsel %vm975_vm3, %v5875_v12, -inf  ;;  %v5878_v55 = vld [vmem:[#allocation34_spill] sm:$0xff]  ;;  %v5879_v6 = vld [vmem:[#allocation104_spill] sm:$0xff]  ;;  %v5880_v17 = vld [vmem:[#allocation103_spill] sm:$0xff] }
 0x1c9   : > { %v1040_v54 = vsel %vm976_vm0, %v5876_v51, -inf  ;;  %v1041_v11 = vsel %vm977_vm10, %v5877_v39, -inf  ;;  %v1042_v61 = vsel %vm978_vm8, %v5878_v55, -inf  ;;  %vm999_vm15 = vcmp.eq.s32.totalorder %v5879_v6, 2  ;;  %v5881_v35 = vld [vmem:[#allocation106_spill] sm:$0xff]  ;;  %v5882_v3 = vld [vmem:[#allocation105_spill] sm:$0xff] }
 0x1ca   : > { %vm1000_vm1 = vcmp.eq.s32.totalorder %v5880_v17, 2  ;;  %v1095_v49 = vmax.f32 %v1091_v18, %v1035_v0  ;;  %v1096_v4 = vmax.f32 %v1092_v13, %v1036_v8  ;;  %v1097_v31 = vmax.f32 %v1093_v1, %v1037_v52  ;;  %v5883_v48 = vld [vmem:[#allocation35_spill] sm:$0xff]  ;;  %v5884_v30 = vld [vmem:[#allocation36_spill] sm:$0xff]  ;;  %v5885_v12 = vld [vmem:[#allocation37_spill] sm:$0xff] }
 0x1cb   : > { %v1098_v46 = vmax.f32 %v1094_v9, %v1038_v20  ;;  %v1043_v27 = vsel %vm979_vm9, %v5883_v48, -inf  ;;  %v1044_v7 = vsel %vm980_vm12, %v5884_v30, -inf  ;;  %vm5886_vm0 = vcmp.eq.s32.totalorder %v5831_v10, 2  ;;  %v5887_v39 = vld [vmem:[#allocation38_spill] sm:$0xff]  ;;  %v5889_v0 = vld [vmem:[#allocation108_spill] sm:$0xff]  ;;  %v5890_v8 = vld [vmem:[#allocation107_spill] sm:$0xff] }
 0x1cc   : > { %v1045_v51 = vsel %vm5886_vm0, %v5885_v12, -inf  ;;  %vm5888_vm10 = vcmp.eq.s32.totalorder %v5832_v53, 2  ;;  %vm1003_vm8 = vcmp.eq.s32.totalorder %v5889_v0, 2  ;;  %v5891_v52 = vld [vmem:[#allocation110_spill] sm:$0xff]  ;;  %v5892_v26 = vld [vmem:[#allocation109_spill] sm:$0xff]  ;;  %v1099_v20 = vmax.f32 %v1095_v49, %v1039_v63  ;;  %v5893_v1 = vld [vmem:[#allocation39_spill] sm:$0xff] }
 0x1cd   : > { %v1046_v55 = vsel %vm5888_vm10, %v5887_v39, -inf  ;;  %v1100_v18 = vmax.f32 %v1096_v4, %v1040_v54  ;;  %v1101_v16 = vmax.f32 %v1097_v31, %v1041_v11  ;;  %v1102_v13 = vmax.f32 %v1098_v46, %v1042_v61  ;;  %v5894_v9 = vld [vmem:[#allocation40_spill] sm:$0xff]  ;;  %v5896_v48 = vld [vmem:[#allocation41_spill] sm:$0xff]  ;;  %v5898_v12 = vld [vmem:[#allocation42_spill] sm:$0xff] }
 0x1ce   : > { %v1047_v10 = vsel %vm983_vm2, %v5893_v1, -inf  ;;  %vm5895_vm12 = vcmp.eq.s32.totalorder %v2896_v41, 2  ;;  %vm5897_vm0 = vcmp.eq.s32.totalorder %v2902_v38, 2  ;;  %vm5899_vm10 = vcmp.eq.s32.totalorder %v5843_v2, 2  ;;  %v5900_v63 = vld [vmem:[#allocation111_spill] sm:$0xff]  ;;  %v5903_v46 = vld [vmem:[#allocation44_spill] sm:$0xff] }
 0x1cf   : > { %v1048_v53 = vsel %vm5895_vm12, %v5894_v9, -inf  ;;  %v1049_v30 = vsel %vm5897_vm0, %v5896_v48, -inf  ;;  %v1050_v39 = vsel %vm5899_vm10, %v5898_v12, -inf  ;;  %v1103_v54 = vmax.f32 %v1099_v20, %v1043_v27  ;;  %v5901_v4 = vld [vmem:[#allocation43_spill] sm:$0xff]  ;;  %v5905_v1 = vld [vmem:[#allocation45_spill] sm:$0xff]  ;;  %v5907_v48 = vld [vmem:[#allocation46_spill] sm:$0xff] }
 0x1d0   : > { %v1104_v11 = vmax.f32 %v1100_v18, %v1044_v7  ;;  %v1105_v61 = vmax.f32 %v1101_v16, %v1045_v51  ;;  %v1106_v49 = vmax.f32 %v1102_v13, %v1046_v55  ;;  %vm5902_vm12 = vcmp.eq.s32.totalorder %v2906_v36, 2  ;;  %v5909_v27 = vld [vmem:[#allocation112_spill] sm:$0xff]  ;;  %v5910_v18 = vld [vmem:[#allocation47_spill] sm:$0xff] }
 0x1d1   : > { %v1051_v31 = vsel %vm5902_vm12, %v5901_v4, -inf  ;;  %vm5904_vm0 = vcmp.eq.s32.totalorder %v2904_v37, 2  ;;  %vm5906_vm10 = vcmp.eq.s32.totalorder %v2910_v34, 2  ;;  %vm5908_vm3 = vcmp.eq.s32.totalorder %v5852_v5, 2  ;;  %v5911_v13 = vld [vmem:[#allocation48_spill] sm:$0xff]  ;;  %v5912_v4 = vld [vmem:[#allocation49_spill] sm:$0xff] }
 0x1d2   : > { %v1052_v2 = vsel %vm5904_vm0, %v5903_v46, -inf  ;;  %v1053_v9 = vsel %vm5906_vm10, %v5905_v1, -inf  ;;  %v1054_v12 = vsel %vm5908_vm3, %v5907_v48, -inf  ;;  %vm1011_vm2 = vcmp.eq.s32.totalorder %v2954_v21, 2  ;;  %v5914_v1 = vld [vmem:[#allocation50_spill] sm:$0xff]  ;;  %v5919_v45 = vld [vmem:[#allocation115_spill] sm:$0xff] }
 0x1d3   : > { %vm1012_vm11 = vcmp.eq.s32.totalorder %v2952_v22, 2  ;;  %v1107_v7 = vmax.f32 %v1103_v54, %v1047_v10  ;;  %v1108_v51 = vmax.f32 %v1104_v11, %v1048_v53  ;;  %v1109_v55 = vmax.f32 %v1105_v61, %v1049_v30  ;;  %v5916_v10 = vld [vmem:[#allocation114_spill] sm:$0xff]  ;;  %v5917_v53 = vld [vmem:[#allocation113_spill] sm:$0xff]  ;;  %v5918_v30 = vld [vmem:[#allocation116_spill] sm:$0xff] }
 0x1d4   : > { %v1110_v20 = vmax.f32 %v1106_v49, %v1050_v39  ;;  %v1055_v16 = vsel %vm991_vm5, %v5910_v18, -inf  ;;  %v1056_v5 = vsel %vm992_vm13, %v5911_v13, -inf  ;;  %vm5913_vm3 = vcmp.eq.s32.totalorder %v5863_v44, 2  ;;  %v5920_v61 = vld [vmem:[#allocation51_spill] sm:$0xff]  ;;  %v5921_v49 = vld [vmem:[#allocation52_spill] sm:$0xff]  ;;  %v5922_v18 = vld [vmem:[#allocation53_spill] sm:$0xff] }
 0x1d5   : > { %v1057_v46 = vsel %vm5913_vm3, %v5912_v4, -inf  ;;  %vm5915_vm0 = vcmp.eq.s32.totalorder %v5864_v59, 2  ;;  %vm1015_vm10 = vcmp.eq.s32.totalorder %v5916_v10, 2  ;;  %vm1016_vm12 = vcmp.eq.s32.totalorder %v5917_v53, 2  ;;  %v5923_v4 = vld [vmem:[#allocation54_spill] sm:$0xff] }
 0x1d6   : > { %v1058_v48 = vsel %vm5915_vm0, %v5914_v1, -inf  ;;  %vm1017_vm9 = vcmp.eq.s32.totalorder %v5918_v30, 2  ;;  %vm1018_vm5 = vcmp.eq.s32.totalorder %v5919_v45, 2  ;;  %v1111_v39 = vmax.f32 %v1107_v7, %v1051_v31  ;;  %v5924_v7 = vld [vmem:[#allocation55_spill] sm:$0xff] }
 0x1d7   : > { %v1112_v54 = vmax.f32 %v1108_v51, %v1052_v2  ;;  %v1113_v47 = vmax.f32 %v1109_v55, %v1053_v9  ;;  %v1114_v11 = vmax.f32 %v1110_v20, %v1054_v12  ;;  %v1059_v44 = vsel %vm995_vm4, %v5920_v61, -inf  ;;  %v5925_v51 = vld [vmem:[#allocation56_spill] sm:$0xff]  ;;  %v5926_v55 = vld [vmem:[#allocation57_spill] sm:$0xff]  ;;  %v5928_v20 = vld [vmem:[#allocation58_spill] sm:$0xff] }
 0x1d8   : > { %v1060_v59 = vsel %vm996_vm7, %v5921_v49, -inf  ;;  %v1061_v13 = vsel %vm997_vm6, %v5922_v18, -inf  ;;  %v1062_v1 = vsel %vm998_vm14, %v5923_v4, -inf  ;;  %v1115_v31 = vmax.f32 %v1111_v39, %v1055_v16  ;;  %v5930_v39 = vld [vmem:[#allocation59_spill] sm:$0xff]  ;;  %v5941_v4 = vld [vmem:[#allocation65_spill] sm:$0xff] }
 0x1d9   : > { %v1116_v2 = vmax.f32 %v1112_v54, %v1056_v5  ;;  %v1117_v9 = vmax.f32 %v1113_v47, %v1057_v46  ;;  %v1118_v12 = vmax.f32 %v1114_v11, %v1058_v48  ;;  %v1063_v50 = vsel %vm999_vm15, %v5924_v7, -inf  ;;  %v5931_v54 = vld [vmem:[#allocation60_spill] sm:$0xff]  ;;  %v5933_v47 = vld [vmem:[#allocation61_spill] sm:$0xff]  ;;  %v5935_v11 = vld [vmem:[#allocation62_spill] sm:$0xff] }
 0x1da   : > { %v1064_v32 = vsel %vm1000_vm1, %v5925_v51, -inf  ;;  %vm5927_vm13 = vcmp.eq.s32.totalorder %v5881_v35, 2  ;;  %vm5929_vm6 = vcmp.eq.s32.totalorder %v5882_v3, 2  ;;  %v1119_v16 = vmax.f32 %v1115_v31, %v1059_v44  ;;  %v5937_v18 = vld [vmem:[#allocation63_spill] sm:$0xff]  ;;  %v5946_v51 = vld [vmem:[#allocation68_spill] sm:$0xff] }
 0x1db   : > { %v1065_v62 = vsel %vm5927_vm13, %v5926_v55, -inf  ;;  %v1066_v19 = vsel %vm5929_vm6, %v5928_v20, -inf  ;;  %v1120_v5 = vmax.f32 %v1116_v2, %v1060_v59  ;;  %v1121_v46 = vmax.f32 %v1117_v9, %v1061_v13  ;;  %v5939_v13 = vld [vmem:[#allocation64_spill] sm:$0xff]  ;;  %v5945_v7 = vld [vmem:[#allocation67_spill] sm:$0xff] }
 0x1dc   : > { %v1122_v48 = vmax.f32 %v1118_v12, %v1062_v1  ;;  %v1067_v6 = vsel %vm1003_vm8, %v5930_v39, -inf  ;;  %vm5932_vm7 = vcmp.eq.s32.totalorder %v5890_v8, 2  ;;  %vm5934_vm4 = vcmp.eq.s32.totalorder %v5891_v52, 2  ;;  %v5943_v1 = vld [vmem:[#allocation66_spill] sm:$0xff] }
 0x1dd   : > { %v1068_v17 = vsel %vm5932_vm7, %v5931_v54, -inf  ;;  %v1069_v35 = vsel %vm5934_vm4, %v5933_v47, -inf  ;;  %vm5936_vm14 = vcmp.eq.s32.totalorder %v5892_v26, 2  ;;  %v1123_v61 = vmax.f32 %v1119_v16, %v1063_v50 }
 0x1de   : > { %v1070_v3 = vsel %vm5936_vm14, %v5935_v11, -inf  ;;  %v1124_v44 = vmax.f32 %v1120_v5, %v1064_v32  ;;  %v1125_v49 = vmax.f32 %v1121_v46, %v1065_v62  ;;  %v1126_v59 = vmax.f32 %v1122_v48, %v1066_v19  ;;  %v5947_v32 = vld [vmem:[#allocation69_spill] sm:$0xff]  ;;  %v5949_v62 = vld [vmem:[#allocation70_spill] sm:$0xff]  ;;  %v5951_v48 = vld [vmem:[#allocation72_spill] sm:$0xff] }
 0x1df   : > { %vm5938_vm15 = vcmp.eq.s32.totalorder %v2946_v25, 2  ;;  %vm5940_vm1 = vcmp.eq.s32.totalorder %v5900_v63, 2  ;;  %vm5942_vm8 = vcmp.eq.s32.totalorder %v2950_v23, 2  ;;  %vm5944_vm3 = vcmp.eq.s32.totalorder %v2948_v24, 2 }
 0x1e0   : > { %v1071_v0 = vsel %vm5938_vm15, %v5937_v18, -inf  ;;  %v1072_v8 = vsel %vm5940_vm1, %v5939_v13, -inf  ;;  %v1073_v52 = vsel %vm5942_vm8, %v5941_v4, -inf  ;;  %v1074_v26 = vsel %vm5944_vm3, %v5943_v1, -inf }
 0x1e1   : > { %v1127_v31 = vmax.f32 %v1123_v61, %v1067_v6  ;;  %v1128_v2 = vmax.f32 %v1124_v44, %v1068_v17  ;;  %v1129_v9 = vmax.f32 %v1125_v49, %v1069_v35  ;;  %v1130_v12 = vmax.f32 %v1126_v59, %v1070_v3  ;;  %v5952_v6 = vld [vmem:[#allocation73_spill] sm:$0xff]  ;;  %v5953_v17 = vld [vmem:[#allocation74_spill] sm:$0xff]  ;;  %v5954_v35 = vld [vmem:[#allocation75_spill] sm:$0xff] }
 0x1e2   : > { %v1075_v50 = vsel %vm1011_vm2, %v5945_v7, -inf  ;;  %v1076_v63 = vsel %vm1012_vm11, %v5946_v51, -inf  ;;  %vm5948_vm0 = vcmp.eq.s32.totalorder %v2958_v33, 2  ;;  %vm5950_vm13 = vcmp.eq.s32.totalorder %v5909_v27, 2 }
 0x1e3   : > { %v1077_v55 = vsel %vm5948_vm0, %v5947_v32, -inf  ;;  %v1078_v20 = vsel %vm5950_vm13, %v5949_v62, -inf  ;;  %v1131_v19 = vmax.f32 %v1127_v31, %v1071_v0  ;;  %v1132_v16 = vmax.f32 %v1128_v2, %v1072_v8 }
 0x1e4   : > { %v1133_v5 = vmax.f32 %v1129_v9, %v1073_v52  ;;  %v1134_v46 = vmax.f32 %v1130_v12, %v1074_v26  ;;  %v1079_v39 = vsel %vm1015_vm10, %v5951_v48, -inf  ;;  %v1080_v54 = vsel %vm1016_vm12, %v5952_v6, -inf }
 0x1e5   : > { %v1081_v47 = vsel %vm1017_vm9, %v5953_v17, -inf  ;;  %v1082_v27 = vsel %vm1018_vm5, %v5954_v35, -inf  ;;  %v1135_v11 = vmax.f32 %v1131_v19, %v1075_v50  ;;  %v1136_v3 = vmax.f32 %v1132_v16, %v1076_v63 }
 0x1e6   : > { %v1137_v61 = vmax.f32 %v1133_v5, %v1077_v55  ;;  %v1138_v44 = vmax.f32 %v1134_v46, %v1078_v20 }
 0x1e7   : > { %v1139_v49 = vmax.f32 %v1135_v11, %v1079_v39  ;;  %v1140_v59 = vmax.f32 %v1136_v3, %v1080_v54 }
 0x1e8   : > { %v1141_v10 = vmax.f32 %v1137_v61, %v1081_v47  ;;  %v1142_v18 = vmax.f32 %v1138_v44, %v1082_v27 }
 0x1e9   : > { %v1143_v0 = vmax.f32 %v1139_v49, %v1140_v59 }
 0x1ea   : > { %v1144_v13 = vmax.f32 %v1141_v10, %v1142_v18 }
 0x1ec   : > { %v1145_v53 = vmax.f32 %v1143_v0, %v1144_v13 }
 0x1ee   : > { %v1146_v8 = vrot.slane %v1145_v53, 4 }
 0x1f0   : > { %v1147_v4 = vmax.f32 %v1145_v53, %v1146_v8 }
 0x1f2   : > { %v1148_v52 = vrot.slane %v1147_v4, 2 }
 0x1f4   : > { %v1149_v30 = vmax.f32 %v1147_v4, %v1148_v52 }
 0x1f6   : > { %v1150_v1 = vrot.slane %v1149_v30, 1 }
 0x1f8   : > { %v1151_v26 = vmax.f32 %v1149_v30, %v1150_v1 }
 0x1fa   : > { %1152 = vst [vmem:[#allocation3 + $0x2] sm:$0x1] %v1151_v26 }
 0x1fb PF: > { %p1153_p11 = scmp.le.s32.totalorder %s2633_s13, 3  ;;  %p1154_p12 = scmp.ge.s32.totalorder %s2636_s14, 3 }
 0x1fd   : > { %p1155_p13 = pnand %p1154_p12, %p1153_p11 }
 0x1fe   : > { %vm1159_vm11 = vcmp.eq.s32.totalorder (!%p1155_p13), %v2686_v15, 3  ;;  %vm1160_vm9 = vcmp.eq.s32.totalorder (!%p1155_p13), %v2726_v29, 3  ;;  %vm1161_vm2 = vcmp.eq.s32.totalorder (!%p1155_p13), %v2684_v14, 3  ;;  %vm1162_vm12 = vcmp.eq.s32.totalorder (!%p1155_p13), %v2724_v28, 3  ;;  %v5955_v45 = vld [vmem:[#allocation71_spill] sm:$0xff] (!%p1155_p13)  ;;  %v5956_v31 = vld [vmem:[#allocation77_spill] sm:$0xff] (!%p1155_p13) }
 0x1ff   : > { %1158 = sbr.rel (%p1155_p13) target bundleno = 580 (0x244), region = 52  ;;  %vm1163_vm10 = vcmp.eq.s32.totalorder (!%p1155_p13), %v2766_v43, 3  ;;  %vm1164_vm5 = vcmp.eq.s32.totalorder (!%p1155_p13), %v2764_v42, 3  ;;  %v5957_v2 = vld [vmem:[#allocation76_spill] sm:$0xff] (!%p1155_p13)  ;;  %v5958_v9 = vld [vmem:[#allocation78_spill] sm:$0xff] (!%p1155_p13)  ;;  %v5960_v7 = vld [vmem:[#allocation79_spill] sm:$0xff] (!%p1155_p13) }
 0x200   : > { %v5959_v12 = vld [vmem:[#allocation80_spill] sm:$0xff] (!%p1155_p13)  ;;  %v5961_v50 = vld [vmem:[#allocation82_spill] sm:$0xff] (!%p1155_p13)  ;;  %v5962_v51 = vld [vmem:[#allocation81_spill] sm:$0xff] (!%p1155_p13)  ;;  %vm5985_vm6 = vcmp.eq.s32.totalorder (!%p1155_p13), %v2846_v60, 3 }
 0x201   : > { %v5963_v63 = vld [vmem:[#allocation84_spill] sm:$0xff] (!%p1155_p13)  ;;  %v5964_v32 = vld [vmem:[#allocation83_spill] sm:$0xff] (!%p1155_p13)  ;;  %v5965_v55 = vld [vmem:[#allocation86_spill] sm:$0xff] (!%p1155_p13) }
 0x202   : > { %vm1177_vm4 = vcmp.eq.s32.totalorder (!%p1155_p13), %v5963_v63, 3  ;;  %vm1178_vm14 = vcmp.eq.s32.totalorder (!%p1155_p13), %v5964_v32, 3  ;;  %vm1179_vm15 = vcmp.eq.s32.totalorder (!%p1155_p13), %v5965_v55, 3  ;;  %v5966_v62 = vld [vmem:[#allocation85_spill] sm:$0xff] (!%p1155_p13)  ;;  %v5967_v20 = vld [vmem:[#allocation88_spill] sm:$0xff] (!%p1155_p13)  ;;  %v5968_v19 = vld [vmem:[#allocation87_spill] sm:$0xff] (!%p1155_p13) }
 0x203   : > { %vm1180_vm1 = vcmp.eq.s32.totalorder (!%p1155_p13), %v5966_v62, 3  ;;  %vm1181_vm8 = vcmp.eq.s32.totalorder (!%p1155_p13), %v5967_v20, 3  ;;  %vm1182_vm3 = vcmp.eq.s32.totalorder (!%p1155_p13), %v5968_v19, 3  ;;  %v5969_v16 = vld [vmem:[#allocation90_spill] sm:$0xff] (!%p1155_p13)  ;;  %v5970_v5 = vld [vmem:[#allocation89_spill] sm:$0xff] (!%p1155_p13)  ;;  %v5971_v46 = vld [vmem:[#allocation92_spill] sm:$0xff] (!%p1155_p13) }
 0x204   : > { %vm1183_vm0 = vcmp.eq.s32.totalorder (!%p1155_p13), %v5969_v16, 3  ;;  %vm1184_vm13 = vcmp.eq.s32.totalorder (!%p1155_p13), %v5970_v5, 3  ;;  %v5972_v48 = vld [vmem:[#allocation91_spill] sm:$0xff] (!%p1155_p13)  ;;  %v5974_v54 = vld [vmem:[#allocation12_spill] sm:$0xff] (!%p1155_p13)  ;;  %v5975_v47 = vld [vmem:[#allocation13_spill] sm:$0xff] (!%p1155_p13) }
 0x205   : > { %v5973_v39 = vld [vmem:[#allocation11_spill] sm:$0xff] (!%p1155_p13)  ;;  %v1224_v17 = vsel (!%p1155_p13), %vm1160_vm9, %v5974_v54, -inf  ;;  %v1225_v35 = vsel (!%p1155_p13), %vm1161_vm2, %v5975_v47, -inf  ;;  %v5976_v27 = vld [vmem:[#allocation14_spill] sm:$0xff] (!%p1155_p13)  ;;  %v5978_v44 = vld [vmem:[#allocation16_spill] sm:$0xff] (!%p1155_p13)  ;;  %vm5982_vm9 = vcmp.eq.s32.totalorder (!%p1155_p13), %v2804_v56, 3 }
 0x206   : > { %v1223_v6 = vsel %vm1159_vm11, %v5973_v39, -inf  ;;  %v1226_v11 = vsel %vm1162_vm12, %v5976_v27, -inf  ;;  %v5977_v3 = vld [vmem:[#allocation15_spill] sm:$0xff]  ;;  %v1228_v49 = vsel %vm1164_vm5, %v5978_v44, -inf  ;;  %v5979_v59 = vld [vmem:[#allocation17_spill] sm:$0xff]  ;;  %vm5980_vm11 = vcmp.eq.s32.totalorder %v2806_v57, 3 }
 0x207   : > { %v1227_v61 = vsel %vm1163_vm10, %v5977_v3, -inf  ;;  %v1229_v10 = vsel %vm5980_vm11, %v5979_v59, -inf  ;;  %v5981_v18 = vld [vmem:[#allocation18_spill] sm:$0xff]  ;;  %vm1187_vm2 = vcmp.eq.s32.totalorder %v2898_v40, 3  ;;  %v5983_v13 = vld [vmem:[#allocation93_spill] sm:$0xff]  ;;  %v5984_v53 = vld [vmem:[#allocation19_spill] sm:$0xff]  ;;  %v1288_v27 = vmax.f32 %v1224_v17, %v1228_v49 }
 0x208   : > { %v1230_v0 = vsel %vm5982_vm9, %v5981_v18, -inf  ;;  %v1231_v8 = vsel %vm5985_vm6, %v5984_v53, -inf  ;;  %v5986_v4 = vld [vmem:[#allocation20_spill] sm:$0xff]  ;;  %vm5987_vm5 = vcmp.eq.s32.totalorder %v5955_v45, 3  ;;  %v5988_v30 = vld [vmem:[#allocation21_spill] sm:$0xff]  ;;  %vm5989_vm11 = vcmp.eq.s32.totalorder %v5956_v31, 3 }
 0x209   : > { %v1232_v52 = vsel %vm5987_vm5, %v5986_v4, -inf  ;;  %v1233_v1 = vsel %vm5989_vm11, %v5988_v30, -inf  ;;  %v5990_v26 = vld [vmem:[#allocation22_spill] sm:$0xff]  ;;  %vm5991_vm9 = vcmp.eq.s32.totalorder %v5957_v2, 3  ;;  %v1287_v47 = vmax.f32 %v1223_v6, %v1227_v61  ;;  %v5993_v44 = vld [vmem:[#allocation23_spill] sm:$0xff]  ;;  %v5995_v59 = vld [vmem:[#allocation24_spill] sm:$0xff] }
 0x20a   : > { %v1234_v39 = vsel %vm5991_vm9, %v5990_v26, -inf  ;;  %v5992_v54 = vld [vmem:[#allocation94_spill] sm:$0xff]  ;;  %v1289_v45 = vmax.f32 %v1225_v35, %v1229_v10  ;;  %v1290_v3 = vmax.f32 %v1226_v11, %v1230_v0  ;;  %vm5994_vm5 = vcmp.eq.s32.totalorder %v2866_v58, 3  ;;  %v5997_v18 = vld [vmem:[#allocation25_spill] sm:$0xff]  ;;  %v6001_v6 = vld [vmem:[#allocation96_spill] sm:$0xff] }
 0x20b   : > { %v1235_v31 = vsel %vm5994_vm5, %v5993_v44, -inf  ;;  %vm5996_vm11 = vcmp.eq.s32.totalorder %v5958_v9, 3  ;;  %vm5998_vm9 = vcmp.eq.s32.totalorder %v5959_v12, 3  ;;  %v5999_v4 = vld [vmem:[#allocation26_spill] sm:$0xff]  ;;  %vm6000_vm12 = vcmp.eq.s32.totalorder %v5960_v7, 3  ;;  %v6002_v17 = vld [vmem:[#allocation95_spill] sm:$0xff] }
 0x20c   : > { %v1236_v2 = vsel %vm5996_vm11, %v5995_v59, -inf  ;;  %v1237_v53 = vsel %vm5998_vm9, %v5997_v18, -inf  ;;  %v1238_v30 = vsel %vm6000_vm12, %v5999_v4, -inf  ;;  %vm1195_vm6 = vcmp.eq.s32.totalorder %v6001_v6, 3  ;;  %v6003_v35 = vld [vmem:[#allocation98_spill] sm:$0xff]  ;;  %v6004_v11 = vld [vmem:[#allocation97_spill] sm:$0xff] }
 0x20d   : > { %vm1196_vm10 = vcmp.eq.s32.totalorder %v6002_v17, 3  ;;  %v1291_v61 = vmax.f32 %v1287_v47, %v1231_v8  ;;  %v1292_v49 = vmax.f32 %v1288_v27, %v1232_v52  ;;  %v1293_v9 = vmax.f32 %v1289_v45, %v1233_v1  ;;  %v6005_v0 = vld [vmem:[#allocation27_spill] sm:$0xff]  ;;  %v6007_v26 = vld [vmem:[#allocation28_spill] sm:$0xff]  ;;  %v6009_v44 = vld [vmem:[#allocation29_spill] sm:$0xff] }
 0x20e   : > { %v1294_v10 = vmax.f32 %v1290_v3, %v1234_v39  ;;  %vm6006_vm11 = vcmp.eq.s32.totalorder %v5961_v50, 3  ;;  %vm6008_vm9 = vcmp.eq.s32.totalorder %v5962_v51, 3  ;;  %v1241_v59 = vsel %vm1177_vm4, %v6009_v44, -inf  ;;  %v6010_v18 = vld [vmem:[#allocation30_spill] sm:$0xff]  ;;  %v6011_v8 = vld [vmem:[#allocation100_spill] sm:$0xff]  ;;  %v6012_v52 = vld [vmem:[#allocation99_spill] sm:$0xff] }
 0x20f   : > { %v1239_v12 = vsel %vm6006_vm11, %v6005_v0, -inf  ;;  %v1240_v7 = vsel %vm6008_vm9, %v6007_v26, -inf  ;;  %v1242_v4 = vsel %vm1178_vm14, %v6010_v18, -inf  ;;  %vm1199_vm12 = vcmp.eq.s32.totalorder %v6011_v8, 3  ;;  %v6013_v1 = vld [vmem:[#allocation102_spill] sm:$0xff]  ;;  %v6014_v50 = vld [vmem:[#allocation101_spill] sm:$0xff] }
 0x210   : > { %vm1200_vm5 = vcmp.eq.s32.totalorder %v6012_v52, 3  ;;  %vm1201_vm7 = vcmp.eq.s32.totalorder %v6013_v1, 3  ;;  %vm1202_vm11 = vcmp.eq.s32.totalorder %v6014_v50, 3  ;;  %v1295_v39 = vmax.f32 %v1291_v61, %v1235_v31  ;;  %v6015_v45 = vld [vmem:[#allocation31_spill] sm:$0xff]  ;;  %v6016_v3 = vld [vmem:[#allocation32_spill] sm:$0xff]  ;;  %v6017_v0 = vld [vmem:[#allocation33_spill] sm:$0xff] }
 0x211   : > { %v1296_v47 = vmax.f32 %v1292_v49, %v1236_v2  ;;  %v1297_v51 = vmax.f32 %v1293_v9, %v1237_v53  ;;  %v1298_v27 = vmax.f32 %v1294_v10, %v1238_v30  ;;  %v1243_v63 = vsel %vm1179_vm15, %v6015_v45, -inf  ;;  %v6018_v44 = vld [vmem:[#allocation34_spill] sm:$0xff]  ;;  %v6019_v31 = vld [vmem:[#allocation104_spill] sm:$0xff]  ;;  %v6020_v2 = vld [vmem:[#allocation103_spill] sm:$0xff] }
 0x212   : > { %v1244_v32 = vsel %vm1180_vm1, %v6016_v3, -inf  ;;  %v1245_v26 = vsel %vm1181_vm8, %v6017_v0, -inf  ;;  %v1246_v18 = vsel %vm1182_vm3, %v6018_v44, -inf  ;;  %vm1203_vm4 = vcmp.eq.s32.totalorder %v6019_v31, 3  ;;  %v6021_v53 = vld [vmem:[#allocation106_spill] sm:$0xff]  ;;  %v6022_v55 = vld [vmem:[#allocation105_spill] sm:$0xff] }
 0x213   : > { %vm1204_vm14 = vcmp.eq.s32.totalorder %v6020_v2, 3  ;;  %v1299_v30 = vmax.f32 %v1295_v39, %v1239_v12  ;;  %v1300_v61 = vmax.f32 %v1296_v47, %v1240_v7  ;;  %v1301_v62 = vmax.f32 %v1297_v51, %v1241_v59  ;;  %v6023_v9 = vld [vmem:[#allocation35_spill] sm:$0xff]  ;;  %v6024_v10 = vld [vmem:[#allocation36_spill] sm:$0xff]  ;;  %v6025_v45 = vld [vmem:[#allocation37_spill] sm:$0xff] }
 0x214   : > { %v1302_v49 = vmax.f32 %v1298_v27, %v1242_v4  ;;  %v1247_v20 = vsel %vm1183_vm0, %v6023_v9, -inf  ;;  %v1248_v19 = vsel %vm1184_vm13, %v6024_v10, -inf  ;;  %vm6026_vm1 = vcmp.eq.s32.totalorder %v5971_v46, 3  ;;  %v6027_v0 = vld [vmem:[#allocation38_spill] sm:$0xff]  ;;  %v6029_v12 = vld [vmem:[#allocation108_spill] sm:$0xff]  ;;  %v6030_v7 = vld [vmem:[#allocation107_spill] sm:$0xff] }
 0x215   : > { %v1249_v3 = vsel %vm6026_vm1, %v6025_v45, -inf  ;;  %vm6028_vm8 = vcmp.eq.s32.totalorder %v5972_v48, 3  ;;  %vm1207_vm3 = vcmp.eq.s32.totalorder %v6029_v12, 3  ;;  %v6031_v59 = vld [vmem:[#allocation110_spill] sm:$0xff]  ;;  %v6032_v16 = vld [vmem:[#allocation109_spill] sm:$0xff]  ;;  %v1303_v4 = vmax.f32 %v1299_v30, %v1243_v63  ;;  %v6033_v51 = vld [vmem:[#allocation39_spill] sm:$0xff] }
 0x216   : > { %v1250_v44 = vsel %vm6028_vm8, %v6027_v0, -inf  ;;  %v1304_v39 = vmax.f32 %v1300_v61, %v1244_v32  ;;  %v1305_v5 = vmax.f32 %v1301_v62, %v1245_v26  ;;  %v1306_v47 = vmax.f32 %v1302_v49, %v1246_v18  ;;  %v6034_v27 = vld [vmem:[#allocation40_spill] sm:$0xff]  ;;  %v6036_v9 = vld [vmem:[#allocation41_spill] sm:$0xff]  ;;  %v6038_v45 = vld [vmem:[#allocation42_spill] sm:$0xff] }
 0x217   : > { %v1251_v46 = vsel %vm1187_vm2, %v6033_v51, -inf  ;;  %vm6035_vm13 = vcmp.eq.s32.totalorder %v2896_v41, 3  ;;  %vm6037_vm1 = vcmp.eq.s32.totalorder %v2902_v38, 3  ;;  %vm6039_vm8 = vcmp.eq.s32.totalorder %v5983_v13, 3  ;;  %v6040_v63 = vld [vmem:[#allocation111_spill] sm:$0xff]  ;;  %v6043_v49 = vld [vmem:[#allocation44_spill] sm:$0xff] }
 0x218   : > { %v1252_v48 = vsel %vm6035_vm13, %v6034_v27, -inf  ;;  %v1253_v10 = vsel %vm6037_vm1, %v6036_v9, -inf  ;;  %v1254_v0 = vsel %vm6039_vm8, %v6038_v45, -inf  ;;  %v1307_v32 = vmax.f32 %v1303_v4, %v1247_v20  ;;  %v6041_v61 = vld [vmem:[#allocation43_spill] sm:$0xff]  ;;  %v6045_v51 = vld [vmem:[#allocation45_spill] sm:$0xff]  ;;  %v6047_v9 = vld [vmem:[#allocation46_spill] sm:$0xff] }
 0x219   : > { %v1308_v26 = vmax.f32 %v1304_v39, %v1248_v19  ;;  %v1309_v18 = vmax.f32 %v1305_v5, %v1249_v3  ;;  %v1310_v30 = vmax.f32 %v1306_v47, %v1250_v44  ;;  %vm6042_vm13 = vcmp.eq.s32.totalorder %v2906_v36, 3  ;;  %v6049_v20 = vld [vmem:[#allocation112_spill] sm:$0xff]  ;;  %v6050_v39 = vld [vmem:[#allocation47_spill] sm:$0xff] }
 0x21a   : > { %v1255_v62 = vsel %vm6042_vm13, %v6041_v61, -inf  ;;  %vm6044_vm1 = vcmp.eq.s32.totalorder %v2904_v37, 3  ;;  %vm6046_vm8 = vcmp.eq.s32.totalorder %v2910_v34, 3  ;;  %vm6048_vm15 = vcmp.eq.s32.totalorder %v5992_v54, 3  ;;  %v6051_v47 = vld [vmem:[#allocation48_spill] sm:$0xff]  ;;  %v6052_v61 = vld [vmem:[#allocation49_spill] sm:$0xff] }
 0x21b   : > { %v1256_v13 = vsel %vm6044_vm1, %v6043_v49, -inf  ;;  %v1257_v27 = vsel %vm6046_vm8, %v6045_v51, -inf  ;;  %v1258_v45 = vsel %vm6048_vm15, %v6047_v9, -inf  ;;  %vm1215_vm2 = vcmp.eq.s32.totalorder %v2954_v21, 3  ;;  %v6054_v51 = vld [vmem:[#allocation50_spill] sm:$0xff]  ;;  %v6059_v6 = vld [vmem:[#allocation115_spill] sm:$0xff] }
 0x21c   : > { %vm1216_vm9 = vcmp.eq.s32.totalorder %v2952_v22, 3  ;;  %v1311_v19 = vmax.f32 %v1307_v32, %v1251_v46  ;;  %v1312_v3 = vmax.f32 %v1308_v26, %v1252_v48  ;;  %v1313_v44 = vmax.f32 %v1309_v18, %v1253_v10  ;;  %v6056_v46 = vld [vmem:[#allocation114_spill] sm:$0xff]  ;;  %v6057_v48 = vld [vmem:[#allocation113_spill] sm:$0xff]  ;;  %v6058_v10 = vld [vmem:[#allocation116_spill] sm:$0xff] }
 0x21d   : > { %v1314_v4 = vmax.f32 %v1310_v30, %v1254_v0  ;;  %v1259_v5 = vsel %vm1195_vm6, %v6050_v39, -inf  ;;  %v1260_v54 = vsel %vm1196_vm10, %v6051_v47, -inf  ;;  %vm6053_vm15 = vcmp.eq.s32.totalorder %v6003_v35, 3  ;;  %v6060_v18 = vld [vmem:[#allocation51_spill] sm:$0xff]  ;;  %v6061_v30 = vld [vmem:[#allocation52_spill] sm:$0xff]  ;;  %v6062_v39 = vld [vmem:[#allocation53_spill] sm:$0xff] }
 0x21e   : > { %v1261_v49 = vsel %vm6053_vm15, %v6052_v61, -inf  ;;  %vm6055_vm1 = vcmp.eq.s32.totalorder %v6004_v11, 3  ;;  %vm1219_vm8 = vcmp.eq.s32.totalorder %v6056_v46, 3  ;;  %vm1220_vm13 = vcmp.eq.s32.totalorder %v6057_v48, 3  ;;  %v6063_v61 = vld [vmem:[#allocation54_spill] sm:$0xff] }
 0x21f   : > { %v1262_v9 = vsel %vm6055_vm1, %v6054_v51, -inf  ;;  %vm1221_vm0 = vcmp.eq.s32.totalorder %v6058_v10, 3  ;;  %vm1222_vm6 = vcmp.eq.s32.totalorder %v6059_v6, 3  ;;  %v1315_v0 = vmax.f32 %v1311_v19, %v1255_v62  ;;  %v6064_v19 = vld [vmem:[#allocation55_spill] sm:$0xff] }
 0x220   : > { %v1316_v32 = vmax.f32 %v1312_v3, %v1256_v13  ;;  %v1317_v17 = vmax.f32 %v1313_v44, %v1257_v27  ;;  %v1318_v26 = vmax.f32 %v1314_v4, %v1258_v45  ;;  %v1263_v35 = vsel %vm1199_vm12, %v6060_v18, -inf  ;;  %v6065_v3 = vld [vmem:[#allocation56_spill] sm:$0xff]  ;;  %v6066_v44 = vld [vmem:[#allocation57_spill] sm:$0xff]  ;;  %v6068_v4 = vld [vmem:[#allocation58_spill] sm:$0xff] }
 0x221   : > { %v1264_v11 = vsel %vm1200_vm5, %v6061_v30, -inf  ;;  %v1265_v47 = vsel %vm1201_vm7, %v6062_v39, -inf  ;;  %v1266_v51 = vsel %vm1202_vm11, %v6063_v61, -inf  ;;  %v1319_v62 = vmax.f32 %v1315_v0, %v1259_v5  ;;  %v6070_v0 = vld [vmem:[#allocation59_spill] sm:$0xff]  ;;  %v6081_v61 = vld [vmem:[#allocation65_spill] sm:$0xff] }
 0x222   : > { %v1320_v13 = vmax.f32 %v1316_v32, %v1260_v54  ;;  %v1321_v27 = vmax.f32 %v1317_v17, %v1261_v49  ;;  %v1322_v45 = vmax.f32 %v1318_v26, %v1262_v9  ;;  %v1267_v8 = vsel %vm1203_vm4, %v6064_v19, -inf  ;;  %v6071_v32 = vld [vmem:[#allocation60_spill] sm:$0xff]  ;;  %v6073_v17 = vld [vmem:[#allocation61_spill] sm:$0xff]  ;;  %v6075_v26 = vld [vmem:[#allocation62_spill] sm:$0xff] }
 0x223   : > { %v1268_v52 = vsel %vm1204_vm14, %v6065_v3, -inf  ;;  %vm6067_vm10 = vcmp.eq.s32.totalorder %v6021_v53, 3  ;;  %vm6069_vm7 = vcmp.eq.s32.totalorder %v6022_v55, 3  ;;  %v1323_v5 = vmax.f32 %v1319_v62, %v1263_v35  ;;  %v6077_v39 = vld [vmem:[#allocation63_spill] sm:$0xff]  ;;  %v6086_v3 = vld [vmem:[#allocation68_spill] sm:$0xff] }
 0x224   : > { %v1269_v1 = vsel %vm6067_vm10, %v6066_v44, -inf  ;;  %v1270_v50 = vsel %vm6069_vm7, %v6068_v4, -inf  ;;  %v1324_v54 = vmax.f32 %v1320_v13, %v1264_v11  ;;  %v1325_v49 = vmax.f32 %v1321_v27, %v1265_v47  ;;  %v6079_v47 = vld [vmem:[#allocation64_spill] sm:$0xff]  ;;  %v6085_v19 = vld [vmem:[#allocation67_spill] sm:$0xff] }
 0x225   : > { %v1326_v9 = vmax.f32 %v1322_v45, %v1266_v51  ;;  %v1271_v31 = vsel %vm1207_vm3, %v6070_v0, -inf  ;;  %vm6072_vm5 = vcmp.eq.s32.totalorder %v6030_v7, 3  ;;  %vm6074_vm12 = vcmp.eq.s32.totalorder %v6031_v59, 3  ;;  %v6083_v51 = vld [vmem:[#allocation66_spill] sm:$0xff] }
 0x226   : > { %v1272_v2 = vsel %vm6072_vm5, %v6071_v32, -inf  ;;  %v1273_v53 = vsel %vm6074_vm12, %v6073_v17, -inf  ;;  %vm6076_vm11 = vcmp.eq.s32.totalorder %v6032_v16, 3  ;;  %v1327_v18 = vmax.f32 %v1323_v5, %v1267_v8 }
 0x227   : > { %v1274_v55 = vsel %vm6076_vm11, %v6075_v26, -inf  ;;  %v1328_v35 = vmax.f32 %v1324_v54, %v1268_v52  ;;  %v1329_v30 = vmax.f32 %v1325_v49, %v1269_v1  ;;  %v1330_v11 = vmax.f32 %v1326_v9, %v1270_v50  ;;  %v6087_v52 = vld [vmem:[#allocation69_spill] sm:$0xff]  ;;  %v6089_v1 = vld [vmem:[#allocation70_spill] sm:$0xff]  ;;  %v6091_v9 = vld [vmem:[#allocation72_spill] sm:$0xff] }
 0x228   : > { %vm6078_vm4 = vcmp.eq.s32.totalorder %v2946_v25, 3  ;;  %vm6080_vm14 = vcmp.eq.s32.totalorder %v6040_v63, 3  ;;  %vm6082_vm3 = vcmp.eq.s32.totalorder %v2950_v23, 3  ;;  %vm6084_vm15 = vcmp.eq.s32.totalorder %v2948_v24, 3 }
 0x229   : > { %v1275_v12 = vsel %vm6078_vm4, %v6077_v39, -inf  ;;  %v1276_v7 = vsel %vm6080_vm14, %v6079_v47, -inf  ;;  %v1277_v59 = vsel %vm6082_vm3, %v6081_v61, -inf  ;;  %v1278_v16 = vsel %vm6084_vm15, %v6083_v51, -inf }
 0x22a   : > { %v1331_v62 = vmax.f32 %v1327_v18, %v1271_v31  ;;  %v1332_v13 = vmax.f32 %v1328_v35, %v1272_v2  ;;  %v1333_v27 = vmax.f32 %v1329_v30, %v1273_v53  ;;  %v1334_v45 = vmax.f32 %v1330_v11, %v1274_v55  ;;  %v6092_v31 = vld [vmem:[#allocation73_spill] sm:$0xff]  ;;  %v6093_v2 = vld [vmem:[#allocation74_spill] sm:$0xff]  ;;  %v6094_v53 = vld [vmem:[#allocation75_spill] sm:$0xff] }
 0x22b   : > { %v1279_v8 = vsel %vm1215_vm2, %v6085_v19, -inf  ;;  %v1280_v63 = vsel %vm1216_vm9, %v6086_v3, -inf  ;;  %vm6088_vm1 = vcmp.eq.s32.totalorder %v2958_v33, 3  ;;  %vm6090_vm10 = vcmp.eq.s32.totalorder %v6049_v20, 3 }
 0x22c   : > { %v1281_v44 = vsel %vm6088_vm1, %v6087_v52, -inf  ;;  %v1282_v4 = vsel %vm6090_vm10, %v6089_v1, -inf  ;;  %v1335_v50 = vmax.f32 %v1331_v62, %v1275_v12  ;;  %v1336_v5 = vmax.f32 %v1332_v13, %v1276_v7 }
 0x22d   : > { %v1337_v54 = vmax.f32 %v1333_v27, %v1277_v59  ;;  %v1338_v49 = vmax.f32 %v1334_v45, %v1278_v16  ;;  %v1283_v0 = vsel %vm1219_vm8, %v6091_v9, -inf  ;;  %v1284_v32 = vsel %vm1220_vm13, %v6092_v31, -inf }
 0x22e   : > { %v1285_v17 = vsel %vm1221_vm0, %v6093_v2, -inf  ;;  %v1286_v20 = vsel %vm1222_vm6, %v6094_v53, -inf  ;;  %v1339_v26 = vmax.f32 %v1335_v50, %v1279_v8  ;;  %v1340_v55 = vmax.f32 %v1336_v5, %v1280_v63 }
 0x22f   : > { %v1341_v18 = vmax.f32 %v1337_v54, %v1281_v44  ;;  %v1342_v35 = vmax.f32 %v1338_v49, %v1282_v4 }
 0x230   : > { %v1343_v30 = vmax.f32 %v1339_v26, %v1283_v0  ;;  %v1344_v11 = vmax.f32 %v1340_v55, %v1284_v32 }
 0x231   : > { %v1345_v46 = vmax.f32 %v1341_v18, %v1285_v17  ;;  %v1346_v39 = vmax.f32 %v1342_v35, %v1286_v20 }
 0x232   : > { %v1347_v12 = vmax.f32 %v1343_v30, %v1344_v11 }
 0x233   : > { %v1348_v47 = vmax.f32 %v1345_v46, %v1346_v39 }
 0x235   : > { %v1349_v48 = vmax.f32 %v1347_v12, %v1348_v47 }
 0x237   : > { %v1350_v7 = vrot.slane %v1349_v48, 4 }
 0x239   : > { %v1351_v61 = vmax.f32 %v1349_v48, %v1350_v7 }
 0x23b   : > { %v1352_v59 = vrot.slane %v1351_v61, 2 }
 0x23d   : > { %v1353_v10 = vmax.f32 %v1351_v61, %v1352_v59 }
 0x23f   : > { %v1354_v51 = vrot.slane %v1353_v10, 1 }
 0x241   : > { %v1355_v16 = vmax.f32 %v1353_v10, %v1354_v51 }
 0x243   : > { %1356 = vst [vmem:[#allocation3 + $0x3] sm:$0x1] %v1355_v16 }
 0x244 PF: > { %p1357_p0 = scmp.le.s32.totalorder %s2633_s13, 4  ;;  %p1358_p1 = scmp.ge.s32.totalorder %s2636_s14, 4 }
 0x246   : > { %p1359_p2 = pnand %p1358_p1, %p1357_p0 }
 0x247   : > { %vm1363_vm9 = vcmp.eq.s32.totalorder (!%p1359_p2), %v2686_v15, 4  ;;  %vm1364_vm0 = vcmp.eq.s32.totalorder (!%p1359_p2), %v2726_v29, 4  ;;  %vm1365_vm2 = vcmp.eq.s32.totalorder (!%p1359_p2), %v2684_v14, 4  ;;  %vm1366_vm13 = vcmp.eq.s32.totalorder (!%p1359_p2), %v2724_v28, 4  ;;  %v6095_v6 = vld [vmem:[#allocation71_spill] sm:$0xff] (!%p1359_p2)  ;;  %v6096_v62 = vld [vmem:[#allocation77_spill] sm:$0xff] (!%p1359_p2) }
 0x248   : > { %1362 = sbr.rel (%p1359_p2) target bundleno = 653 (0x28d), region = 56  ;;  %vm1367_vm8 = vcmp.eq.s32.totalorder (!%p1359_p2), %v2766_v43, 4  ;;  %vm1368_vm6 = vcmp.eq.s32.totalorder (!%p1359_p2), %v2764_v42, 4  ;;  %v6097_v13 = vld [vmem:[#allocation76_spill] sm:$0xff] (!%p1359_p2)  ;;  %v6098_v27 = vld [vmem:[#allocation78_spill] sm:$0xff] (!%p1359_p2)  ;;  %v6100_v19 = vld [vmem:[#allocation79_spill] sm:$0xff] (!%p1359_p2) }
 0x249   : > { %v6099_v45 = vld [vmem:[#allocation80_spill] sm:$0xff] (!%p1359_p2)  ;;  %v6101_v8 = vld [vmem:[#allocation82_spill] sm:$0xff] (!%p1359_p2)  ;;  %v6102_v3 = vld [vmem:[#allocation81_spill] sm:$0xff] (!%p1359_p2)  ;;  %vm6125_vm7 = vcmp.eq.s32.totalorder (!%p1359_p2), %v2846_v60, 4 }
 0x24a   : > { %v6103_v63 = vld [vmem:[#allocation84_spill] sm:$0xff] (!%p1359_p2)  ;;  %v6104_v52 = vld [vmem:[#allocation83_spill] sm:$0xff] (!%p1359_p2)  ;;  %v6105_v44 = vld [vmem:[#allocation86_spill] sm:$0xff] (!%p1359_p2) }
 0x24b   : > { %vm1381_vm12 = vcmp.eq.s32.totalorder (!%p1359_p2), %v6103_v63, 4  ;;  %vm1382_vm11 = vcmp.eq.s32.totalorder (!%p1359_p2), %v6104_v52, 4  ;;  %vm1383_vm4 = vcmp.eq.s32.totalorder (!%p1359_p2), %v6105_v44, 4  ;;  %v6106_v1 = vld [vmem:[#allocation85_spill] sm:$0xff] (!%p1359_p2)  ;;  %v6107_v4 = vld [vmem:[#allocation88_spill] sm:$0xff] (!%p1359_p2)  ;;  %v6108_v50 = vld [vmem:[#allocation87_spill] sm:$0xff] (!%p1359_p2) }
 0x24c   : > { %vm1384_vm14 = vcmp.eq.s32.totalorder (!%p1359_p2), %v6106_v1, 4  ;;  %vm1385_vm3 = vcmp.eq.s32.totalorder (!%p1359_p2), %v6107_v4, 4  ;;  %vm1386_vm15 = vcmp.eq.s32.totalorder (!%p1359_p2), %v6108_v50, 4  ;;  %v6109_v5 = vld [vmem:[#allocation90_spill] sm:$0xff] (!%p1359_p2)  ;;  %v6110_v54 = vld [vmem:[#allocation89_spill] sm:$0xff] (!%p1359_p2)  ;;  %v6111_v49 = vld [vmem:[#allocation92_spill] sm:$0xff] (!%p1359_p2) }
 0x24d   : > { %vm1387_vm1 = vcmp.eq.s32.totalorder (!%p1359_p2), %v6109_v5, 4  ;;  %vm1388_vm10 = vcmp.eq.s32.totalorder (!%p1359_p2), %v6110_v54, 4  ;;  %v6112_v9 = vld [vmem:[#allocation91_spill] sm:$0xff] (!%p1359_p2)  ;;  %v6114_v32 = vld [vmem:[#allocation12_spill] sm:$0xff] (!%p1359_p2)  ;;  %v6115_v17 = vld [vmem:[#allocation13_spill] sm:$0xff] (!%p1359_p2) }
 0x24e   : > { %v6113_v0 = vld [vmem:[#allocation11_spill] sm:$0xff] (!%p1359_p2)  ;;  %v1428_v2 = vsel (!%p1359_p2), %vm1364_vm0, %v6114_v32, -inf  ;;  %v1429_v53 = vsel (!%p1359_p2), %vm1365_vm2, %v6115_v17, -inf  ;;  %v6116_v20 = vld [vmem:[#allocation14_spill] sm:$0xff] (!%p1359_p2)  ;;  %v6118_v35 = vld [vmem:[#allocation16_spill] sm:$0xff] (!%p1359_p2)  ;;  %vm6122_vm0 = vcmp.eq.s32.totalorder (!%p1359_p2), %v2804_v56, 4 }
 0x24f   : > { %v1427_v31 = vsel %vm1363_vm9, %v6113_v0, -inf  ;;  %v1430_v26 = vsel %vm1366_vm13, %v6116_v20, -inf  ;;  %v6117_v55 = vld [vmem:[#allocation15_spill] sm:$0xff]  ;;  %v1432_v30 = vsel %vm1368_vm6, %v6118_v35, -inf  ;;  %v6119_v11 = vld [vmem:[#allocation17_spill] sm:$0xff]  ;;  %vm6120_vm9 = vcmp.eq.s32.totalorder %v2806_v57, 4 }
 0x250   : > { %v1431_v18 = vsel %vm1367_vm8, %v6117_v55, -inf  ;;  %v1433_v46 = vsel %vm6120_vm9, %v6119_v11, -inf  ;;  %v6121_v39 = vld [vmem:[#allocation18_spill] sm:$0xff]  ;;  %vm1391_vm2 = vcmp.eq.s32.totalorder %v2898_v40, 4  ;;  %v6123_v47 = vld [vmem:[#allocation93_spill] sm:$0xff]  ;;  %v6124_v48 = vld [vmem:[#allocation19_spill] sm:$0xff]  ;;  %v1492_v20 = vmax.f32 %v1428_v2, %v1432_v30 }
 0x251   : > { %v1434_v12 = vsel %vm6122_vm0, %v6121_v39, -inf  ;;  %v1435_v7 = vsel %vm6125_vm7, %v6124_v48, -inf  ;;  %v6126_v61 = vld [vmem:[#allocation20_spill] sm:$0xff]  ;;  %vm6127_vm6 = vcmp.eq.s32.totalorder %v6095_v6, 4  ;;  %v6128_v10 = vld [vmem:[#allocation21_spill] sm:$0xff]  ;;  %vm6129_vm9 = vcmp.eq.s32.totalorder %v6096_v62, 4 }
 0x252   : > { %v1436_v59 = vsel %vm6127_vm6, %v6126_v61, -inf  ;;  %v1437_v51 = vsel %vm6129_vm9, %v6128_v10, -inf  ;;  %v6130_v16 = vld [vmem:[#allocation22_spill] sm:$0xff]  ;;  %vm6131_vm0 = vcmp.eq.s32.totalorder %v6097_v13, 4  ;;  %v1491_v17 = vmax.f32 %v1427_v31, %v1431_v18  ;;  %v6133_v35 = vld [vmem:[#allocation23_spill] sm:$0xff]  ;;  %v6135_v11 = vld [vmem:[#allocation24_spill] sm:$0xff] }
 0x253   : > { %v1438_v0 = vsel %vm6131_vm0, %v6130_v16, -inf  ;;  %v6132_v32 = vld [vmem:[#allocation94_spill] sm:$0xff]  ;;  %v1493_v6 = vmax.f32 %v1429_v53, %v1433_v46  ;;  %v1494_v55 = vmax.f32 %v1430_v26, %v1434_v12  ;;  %vm6134_vm6 = vcmp.eq.s32.totalorder %v2866_v58, 4  ;;  %v6137_v39 = vld [vmem:[#allocation25_spill] sm:$0xff]  ;;  %v6141_v31 = vld [vmem:[#allocation96_spill] sm:$0xff] }
 0x254   : > { %v1439_v62 = vsel %vm6134_vm6, %v6133_v35, -inf  ;;  %vm6136_vm9 = vcmp.eq.s32.totalorder %v6098_v27, 4  ;;  %vm6138_vm0 = vcmp.eq.s32.totalorder %v6099_v45, 4  ;;  %v6139_v61 = vld [vmem:[#allocation26_spill] sm:$0xff]  ;;  %vm6140_vm13 = vcmp.eq.s32.totalorder %v6100_v19, 4  ;;  %v6142_v2 = vld [vmem:[#allocation95_spill] sm:$0xff] }
 0x255   : > { %v1440_v13 = vsel %vm6136_vm9, %v6135_v11, -inf  ;;  %v1441_v48 = vsel %vm6138_vm0, %v6137_v39, -inf  ;;  %v1442_v10 = vsel %vm6140_vm13, %v6139_v61, -inf  ;;  %vm1399_vm7 = vcmp.eq.s32.totalorder %v6141_v31, 4  ;;  %v6143_v53 = vld [vmem:[#allocation98_spill] sm:$0xff]  ;;  %v6144_v26 = vld [vmem:[#allocation97_spill] sm:$0xff] }
 0x256   : > { %vm1400_vm8 = vcmp.eq.s32.totalorder %v6142_v2, 4  ;;  %v1495_v18 = vmax.f32 %v1491_v17, %v1435_v7  ;;  %v1496_v30 = vmax.f32 %v1492_v20, %v1436_v59  ;;  %v1497_v27 = vmax.f32 %v1493_v6, %v1437_v51  ;;  %v6145_v12 = vld [vmem:[#allocation27_spill] sm:$0xff]  ;;  %v6147_v16 = vld [vmem:[#allocation28_spill] sm:$0xff]  ;;  %v6149_v35 = vld [vmem:[#allocation29_spill] sm:$0xff] }
 0x257   : > { %v1498_v46 = vmax.f32 %v1494_v55, %v1438_v0  ;;  %vm6146_vm9 = vcmp.eq.s32.totalorder %v6101_v8, 4  ;;  %vm6148_vm0 = vcmp.eq.s32.totalorder %v6102_v3, 4  ;;  %v1445_v11 = vsel %vm1381_vm12, %v6149_v35, -inf  ;;  %v6150_v39 = vld [vmem:[#allocation30_spill] sm:$0xff]  ;;  %v6151_v7 = vld [vmem:[#allocation100_spill] sm:$0xff]  ;;  %v6152_v59 = vld [vmem:[#allocation99_spill] sm:$0xff] }
 0x258   : > { %v1443_v45 = vsel %vm6146_vm9, %v6145_v12, -inf  ;;  %v1444_v19 = vsel %vm6148_vm0, %v6147_v16, -inf  ;;  %v1446_v61 = vsel %vm1382_vm11, %v6150_v39, -inf  ;;  %vm1403_vm13 = vcmp.eq.s32.totalorder %v6151_v7, 4  ;;  %v6153_v51 = vld [vmem:[#allocation102_spill] sm:$0xff]  ;;  %v6154_v8 = vld [vmem:[#allocation101_spill] sm:$0xff] }
 0x259   : > { %vm1404_vm6 = vcmp.eq.s32.totalorder %v6152_v59, 4  ;;  %vm1405_vm5 = vcmp.eq.s32.totalorder %v6153_v51, 4  ;;  %vm1406_vm9 = vcmp.eq.s32.totalorder %v6154_v8, 4  ;;  %v1499_v0 = vmax.f32 %v1495_v18, %v1439_v62  ;;  %v6155_v6 = vld [vmem:[#allocation31_spill] sm:$0xff]  ;;  %v6156_v55 = vld [vmem:[#allocation32_spill] sm:$0xff]  ;;  %v6157_v12 = vld [vmem:[#allocation33_spill] sm:$0xff] }
 0x25a   : > { %v1500_v17 = vmax.f32 %v1496_v30, %v1440_v13  ;;  %v1501_v3 = vmax.f32 %v1497_v27, %v1441_v48  ;;  %v1502_v20 = vmax.f32 %v1498_v46, %v1442_v10  ;;  %v1447_v63 = vsel %vm1383_vm4, %v6155_v6, -inf  ;;  %v6158_v35 = vld [vmem:[#allocation34_spill] sm:$0xff]  ;;  %v6159_v62 = vld [vmem:[#allocation104_spill] sm:$0xff]  ;;  %v6160_v13 = vld [vmem:[#allocation103_spill] sm:$0xff] }
 0x25b   : > { %v1448_v52 = vsel %vm1384_vm14, %v6156_v55, -inf  ;;  %v1449_v16 = vsel %vm1385_vm3, %v6157_v12, -inf  ;;  %v1450_v39 = vsel %vm1386_vm15, %v6158_v35, -inf  ;;  %vm1407_vm12 = vcmp.eq.s32.totalorder %v6159_v62, 4  ;;  %v6161_v48 = vld [vmem:[#allocation106_spill] sm:$0xff]  ;;  %v6162_v44 = vld [vmem:[#allocation105_spill] sm:$0xff] }
 0x25c   : > { %vm1408_vm11 = vcmp.eq.s32.totalorder %v6160_v13, 4  ;;  %v1503_v10 = vmax.f32 %v1499_v0, %v1443_v45  ;;  %v1504_v18 = vmax.f32 %v1500_v17, %v1444_v19  ;;  %v1505_v1 = vmax.f32 %v1501_v3, %v1445_v11  ;;  %v6163_v27 = vld [vmem:[#allocation35_spill] sm:$0xff]  ;;  %v6164_v46 = vld [vmem:[#allocation36_spill] sm:$0xff]  ;;  %v6165_v6 = vld [vmem:[#allocation37_spill] sm:$0xff] }
 0x25d   : > { %v1506_v30 = vmax.f32 %v1502_v20, %v1446_v61  ;;  %v1451_v4 = vsel %vm1387_vm1, %v6163_v27, -inf  ;;  %v1452_v50 = vsel %vm1388_vm10, %v6164_v46, -inf  ;;  %vm6166_vm14 = vcmp.eq.s32.totalorder %v6111_v49, 4  ;;  %v6167_v12 = vld [vmem:[#allocation38_spill] sm:$0xff]  ;;  %v6169_v45 = vld [vmem:[#allocation108_spill] sm:$0xff]  ;;  %v6170_v19 = vld [vmem:[#allocation107_spill] sm:$0xff] }
 0x25e   : > { %v1453_v55 = vsel %vm6166_vm14, %v6165_v6, -inf  ;;  %vm6168_vm3 = vcmp.eq.s32.totalorder %v6112_v9, 4  ;;  %vm1411_vm15 = vcmp.eq.s32.totalorder %v6169_v45, 4  ;;  %v6171_v11 = vld [vmem:[#allocation110_spill] sm:$0xff]  ;;  %v6172_v5 = vld [vmem:[#allocation109_spill] sm:$0xff]  ;;  %v1507_v61 = vmax.f32 %v1503_v10, %v1447_v63  ;;  %v6173_v3 = vld [vmem:[#allocation39_spill] sm:$0xff] }
 0x25f   : > { %v1454_v35 = vsel %vm6168_vm3, %v6167_v12, -inf  ;;  %v1508_v0 = vmax.f32 %v1504_v18, %v1448_v52  ;;  %v1509_v54 = vmax.f32 %v1505_v1, %v1449_v16  ;;  %v1510_v17 = vmax.f32 %v1506_v30, %v1450_v39  ;;  %v6174_v20 = vld [vmem:[#allocation40_spill] sm:$0xff]  ;;  %v6176_v27 = vld [vmem:[#allocation41_spill] sm:$0xff]  ;;  %v6178_v6 = vld [vmem:[#allocation42_spill] sm:$0xff] }
 0x260   : > { %v1455_v49 = vsel %vm1391_vm2, %v6173_v3, -inf  ;;  %vm6175_vm10 = vcmp.eq.s32.totalorder %v2896_v41, 4  ;;  %vm6177_vm14 = vcmp.eq.s32.totalorder %v2902_v38, 4  ;;  %vm6179_vm3 = vcmp.eq.s32.totalorder %v6123_v47, 4  ;;  %v6180_v63 = vld [vmem:[#allocation111_spill] sm:$0xff]  ;;  %v6183_v30 = vld [vmem:[#allocation44_spill] sm:$0xff] }
 0x261   : > { %v1456_v9 = vsel %vm6175_vm10, %v6174_v20, -inf  ;;  %v1457_v46 = vsel %vm6177_vm14, %v6176_v27, -inf  ;;  %v1458_v12 = vsel %vm6179_vm3, %v6178_v6, -inf  ;;  %v1511_v52 = vmax.f32 %v1507_v61, %v1451_v4  ;;  %v6181_v18 = vld [vmem:[#allocation43_spill] sm:$0xff]  ;;  %v6185_v3 = vld [vmem:[#allocation45_spill] sm:$0xff]  ;;  %v6187_v27 = vld [vmem:[#allocation46_spill] sm:$0xff] }
 0x262   : > { %v1512_v16 = vmax.f32 %v1508_v0, %v1452_v50  ;;  %v1513_v39 = vmax.f32 %v1509_v54, %v1453_v55  ;;  %v1514_v10 = vmax.f32 %v1510_v17, %v1454_v35  ;;  %vm6182_vm10 = vcmp.eq.s32.totalorder %v2906_v36, 4  ;;  %v6189_v4 = vld [vmem:[#allocation112_spill] sm:$0xff]  ;;  %v6190_v0 = vld [vmem:[#allocation47_spill] sm:$0xff] }
 0x263   : > { %v1459_v1 = vsel %vm6182_vm10, %v6181_v18, -inf  ;;  %vm6184_vm14 = vcmp.eq.s32.totalorder %v2904_v37, 4  ;;  %vm6186_vm3 = vcmp.eq.s32.totalorder %v2910_v34, 4  ;;  %vm6188_vm4 = vcmp.eq.s32.totalorder %v6132_v32, 4  ;;  %v6191_v17 = vld [vmem:[#allocation48_spill] sm:$0xff]  ;;  %v6192_v18 = vld [vmem:[#allocation49_spill] sm:$0xff] }
 0x264   : > { %v1460_v47 = vsel %vm6184_vm14, %v6183_v30, -inf  ;;  %v1461_v20 = vsel %vm6186_vm3, %v6185_v3, -inf  ;;  %v1462_v6 = vsel %vm6188_vm4, %v6187_v27, -inf  ;;  %vm1419_vm2 = vcmp.eq.s32.totalorder %v2954_v21, 4  ;;  %v6194_v3 = vld [vmem:[#allocation50_spill] sm:$0xff]  ;;  %v6199_v31 = vld [vmem:[#allocation115_spill] sm:$0xff] }
 0x265   : > { %vm1420_vm0 = vcmp.eq.s32.totalorder %v2952_v22, 4  ;;  %v1515_v50 = vmax.f32 %v1511_v52, %v1455_v49  ;;  %v1516_v55 = vmax.f32 %v1512_v16, %v1456_v9  ;;  %v1517_v35 = vmax.f32 %v1513_v39, %v1457_v46  ;;  %v6196_v49 = vld [vmem:[#allocation114_spill] sm:$0xff]  ;;  %v6197_v9 = vld [vmem:[#allocation113_spill] sm:$0xff]  ;;  %v6198_v46 = vld [vmem:[#allocation116_spill] sm:$0xff] }
 0x266   : > { %v1518_v61 = vmax.f32 %v1514_v10, %v1458_v12  ;;  %v1463_v54 = vsel %vm1399_vm7, %v6190_v0, -inf  ;;  %v1464_v32 = vsel %vm1400_vm8, %v6191_v17, -inf  ;;  %vm6193_vm4 = vcmp.eq.s32.totalorder %v6143_v53, 4  ;;  %v6200_v39 = vld [vmem:[#allocation51_spill] sm:$0xff]  ;;  %v6201_v10 = vld [vmem:[#allocation52_spill] sm:$0xff]  ;;  %v6202_v0 = vld [vmem:[#allocation53_spill] sm:$0xff] }
 0x267   : > { %v1465_v30 = vsel %vm6193_vm4, %v6192_v18, -inf  ;;  %vm6195_vm14 = vcmp.eq.s32.totalorder %v6144_v26, 4  ;;  %vm1423_vm3 = vcmp.eq.s32.totalorder %v6196_v49, 4  ;;  %vm1424_vm10 = vcmp.eq.s32.totalorder %v6197_v9, 4  ;;  %v6203_v18 = vld [vmem:[#allocation54_spill] sm:$0xff] }
 0x268   : > { %v1466_v27 = vsel %vm6195_vm14, %v6194_v3, -inf  ;;  %vm1425_vm1 = vcmp.eq.s32.totalorder %v6198_v46, 4  ;;  %vm1426_vm7 = vcmp.eq.s32.totalorder %v6199_v31, 4  ;;  %v1519_v12 = vmax.f32 %v1515_v50, %v1459_v1  ;;  %v6204_v50 = vld [vmem:[#allocation55_spill] sm:$0xff] }
 0x269   : > { %v1520_v52 = vmax.f32 %v1516_v55, %v1460_v47  ;;  %v1521_v2 = vmax.f32 %v1517_v35, %v1461_v20  ;;  %v1522_v16 = vmax.f32 %v1518_v61, %v1462_v6  ;;  %v1467_v53 = vsel %vm1403_vm13, %v6200_v39, -inf  ;;  %v6205_v55 = vld [vmem:[#allocation56_spill] sm:$0xff]  ;;  %v6206_v35 = vld [vmem:[#allocation57_spill] sm:$0xff]  ;;  %v6208_v61 = vld [vmem:[#allocation58_spill] sm:$0xff] }
 0x26a   : > { %v1468_v26 = vsel %vm1404_vm6, %v6201_v10, -inf  ;;  %v1469_v17 = vsel %vm1405_vm5, %v6202_v0, -inf  ;;  %v1470_v3 = vsel %vm1406_vm9, %v6203_v18, -inf  ;;  %v1523_v1 = vmax.f32 %v1519_v12, %v1463_v54  ;;  %v6210_v12 = vld [vmem:[#allocation59_spill] sm:$0xff]  ;;  %v6221_v18 = vld [vmem:[#allocation65_spill] sm:$0xff] }
 0x26b   : > { %v1524_v47 = vmax.f32 %v1520_v52, %v1464_v32  ;;  %v1525_v20 = vmax.f32 %v1521_v2, %v1465_v30  ;;  %v1526_v6 = vmax.f32 %v1522_v16, %v1466_v27  ;;  %v1471_v7 = vsel %vm1407_vm12, %v6204_v50, -inf  ;;  %v6211_v52 = vld [vmem:[#allocation60_spill] sm:$0xff]  ;;  %v6213_v2 = vld [vmem:[#allocation61_spill] sm:$0xff]  ;;  %v6215_v16 = vld [vmem:[#allocation62_spill] sm:$0xff] }
 0x26c   : > { %v1472_v59 = vsel %vm1408_vm11, %v6205_v55, -inf  ;;  %vm6207_vm8 = vcmp.eq.s32.totalorder %v6161_v48, 4  ;;  %vm6209_vm5 = vcmp.eq.s32.totalorder %v6162_v44, 4  ;;  %v1527_v54 = vmax.f32 %v1523_v1, %v1467_v53  ;;  %v6217_v0 = vld [vmem:[#allocation63_spill] sm:$0xff]  ;;  %v6226_v55 = vld [vmem:[#allocation68_spill] sm:$0xff] }
 0x26d   : > { %v1473_v51 = vsel %vm6207_vm8, %v6206_v35, -inf  ;;  %v1474_v8 = vsel %vm6209_vm5, %v6208_v61, -inf  ;;  %v1528_v32 = vmax.f32 %v1524_v47, %v1468_v26  ;;  %v1529_v30 = vmax.f32 %v1525_v20, %v1469_v17  ;;  %v6219_v17 = vld [vmem:[#allocation64_spill] sm:$0xff]  ;;  %v6225_v50 = vld [vmem:[#allocation67_spill] sm:$0xff] }
 0x26e   : > { %v1530_v27 = vmax.f32 %v1526_v6, %v1470_v3  ;;  %v1475_v62 = vsel %vm1411_vm15, %v6210_v12, -inf  ;;  %vm6212_vm6 = vcmp.eq.s32.totalorder %v6170_v19, 4  ;;  %vm6214_vm13 = vcmp.eq.s32.totalorder %v6171_v11, 4  ;;  %v6223_v3 = vld [vmem:[#allocation66_spill] sm:$0xff] }
 0x26f   : > { %v1476_v13 = vsel %vm6212_vm6, %v6211_v52, -inf  ;;  %v1477_v48 = vsel %vm6214_vm13, %v6213_v2, -inf  ;;  %vm6216_vm9 = vcmp.eq.s32.totalorder %v6172_v5, 4  ;;  %v1531_v39 = vmax.f32 %v1527_v54, %v1471_v7 }
 0x270   : > { %v1478_v44 = vsel %vm6216_vm9, %v6215_v16, -inf  ;;  %v1532_v53 = vmax.f32 %v1528_v32, %v1472_v59  ;;  %v1533_v10 = vmax.f32 %v1529_v30, %v1473_v51  ;;  %v1534_v26 = vmax.f32 %v1530_v27, %v1474_v8  ;;  %v6227_v59 = vld [vmem:[#allocation69_spill] sm:$0xff]  ;;  %v6229_v51 = vld [vmem:[#allocation70_spill] sm:$0xff]  ;;  %v6231_v27 = vld [vmem:[#allocation72_spill] sm:$0xff] }
 0x271   : > { %vm6218_vm12 = vcmp.eq.s32.totalorder %v2946_v25, 4  ;;  %vm6220_vm11 = vcmp.eq.s32.totalorder %v6180_v63, 4  ;;  %vm6222_vm15 = vcmp.eq.s32.totalorder %v2950_v23, 4  ;;  %vm6224_vm4 = vcmp.eq.s32.totalorder %v2948_v24, 4 }
 0x272   : > { %v1479_v45 = vsel %vm6218_vm12, %v6217_v0, -inf  ;;  %v1480_v19 = vsel %vm6220_vm11, %v6219_v17, -inf  ;;  %v1481_v11 = vsel %vm6222_vm15, %v6221_v18, -inf  ;;  %v1482_v5 = vsel %vm6224_vm4, %v6223_v3, -inf }
 0x273   : > { %v1535_v1 = vmax.f32 %v1531_v39, %v1475_v62  ;;  %v1536_v47 = vmax.f32 %v1532_v53, %v1476_v13  ;;  %v1537_v20 = vmax.f32 %v1533_v10, %v1477_v48  ;;  %v1538_v6 = vmax.f32 %v1534_v26, %v1478_v44  ;;  %v6232_v62 = vld [vmem:[#allocation73_spill] sm:$0xff]  ;;  %v6233_v13 = vld [vmem:[#allocation74_spill] sm:$0xff]  ;;  %v6234_v48 = vld [vmem:[#allocation75_spill] sm:$0xff] }
 0x274   : > { %v1483_v7 = vsel %vm1419_vm2, %v6225_v50, -inf  ;;  %v1484_v63 = vsel %vm1420_vm0, %v6226_v55, -inf  ;;  %vm6228_vm14 = vcmp.eq.s32.totalorder %v2958_v33, 4  ;;  %vm6230_vm8 = vcmp.eq.s32.totalorder %v6189_v4, 4 }
 0x275   : > { %v1485_v35 = vsel %vm6228_vm14, %v6227_v59, -inf  ;;  %v1486_v61 = vsel %vm6230_vm8, %v6229_v51, -inf  ;;  %v1539_v8 = vmax.f32 %v1535_v1, %v1479_v45  ;;  %v1540_v54 = vmax.f32 %v1536_v47, %v1480_v19 }
 0x276   : > { %v1541_v32 = vmax.f32 %v1537_v20, %v1481_v11  ;;  %v1542_v30 = vmax.f32 %v1538_v6, %v1482_v5  ;;  %v1487_v12 = vsel %vm1423_vm3, %v6231_v27, -inf  ;;  %v1488_v52 = vsel %vm1424_vm10, %v6232_v62, -inf }
 0x277   : > { %v1489_v2 = vsel %vm1425_vm1, %v6233_v13, -inf  ;;  %v1490_v4 = vsel %vm1426_vm7, %v6234_v48, -inf  ;;  %v1543_v16 = vmax.f32 %v1539_v8, %v1483_v7  ;;  %v1544_v44 = vmax.f32 %v1540_v54, %v1484_v63 }
 0x278   : > { %v1545_v39 = vmax.f32 %v1541_v32, %v1485_v35  ;;  %v1546_v53 = vmax.f32 %v1542_v30, %v1486_v61 }
 0x279   : > { %v1547_v10 = vmax.f32 %v1543_v16, %v1487_v12  ;;  %v1548_v26 = vmax.f32 %v1544_v44, %v1488_v52 }
 0x27a   : > { %v1549_v49 = vmax.f32 %v1545_v39, %v1489_v2  ;;  %v1550_v0 = vmax.f32 %v1546_v53, %v1490_v4 }
 0x27b   : > { %v1551_v45 = vmax.f32 %v1547_v10, %v1548_v26 }
 0x27c   : > { %v1552_v17 = vmax.f32 %v1549_v49, %v1550_v0 }
 0x27e   : > { %v1553_v9 = vmax.f32 %v1551_v45, %v1552_v17 }
 0x280   : > { %v1554_v19 = vrot.slane %v1553_v9, 4 }
 0x282   : > { %v1555_v18 = vmax.f32 %v1553_v9, %v1554_v19 }
 0x284   : > { %v1556_v11 = vrot.slane %v1555_v18, 2 }
 0x286   : > { %v1557_v46 = vmax.f32 %v1555_v18, %v1556_v11 }
 0x288   : > { %v1558_v3 = vrot.slane %v1557_v46, 1 }
 0x28a   : > { %v1559_v5 = vmax.f32 %v1557_v46, %v1558_v3 }
 0x28c   : > { %1560 = vst [vmem:[#allocation3 + $0x4] sm:$0x1] %v1559_v5 }
 0x28d PF: > { %p1561_p3 = scmp.le.s32.totalorder %s2633_s13, 5  ;;  %p1562_p4 = scmp.ge.s32.totalorder %s2636_s14, 5 }
 0x28f   : > { %p1563_p5 = pnand %p1562_p4, %p1561_p3 }
 0x290   : > { %vm1567_vm0 = vcmp.eq.s32.totalorder (!%p1563_p5), %v2686_v15, 5  ;;  %vm1568_vm1 = vcmp.eq.s32.totalorder (!%p1563_p5), %v2726_v29, 5  ;;  %vm1569_vm2 = vcmp.eq.s32.totalorder (!%p1563_p5), %v2684_v14, 5  ;;  %vm1570_vm10 = vcmp.eq.s32.totalorder (!%p1563_p5), %v2724_v28, 5  ;;  %v6235_v31 = vld [vmem:[#allocation71_spill] sm:$0xff] (!%p1563_p5)  ;;  %v6236_v1 = vld [vmem:[#allocation77_spill] sm:$0xff] (!%p1563_p5) }
 0x291   : > { %1566 = sbr.rel (%p1563_p5) target bundleno = 726 (0x2d6), region = 60  ;;  %vm1571_vm3 = vcmp.eq.s32.totalorder (!%p1563_p5), %v2766_v43, 5  ;;  %vm1572_vm7 = vcmp.eq.s32.totalorder (!%p1563_p5), %v2764_v42, 5  ;;  %v6237_v47 = vld [vmem:[#allocation76_spill] sm:$0xff] (!%p1563_p5)  ;;  %v6238_v20 = vld [vmem:[#allocation78_spill] sm:$0xff] (!%p1563_p5)  ;;  %v6240_v50 = vld [vmem:[#allocation79_spill] sm:$0xff] (!%p1563_p5) }
 0x292   : > { %v6239_v6 = vld [vmem:[#allocation80_spill] sm:$0xff] (!%p1563_p5)  ;;  %v6241_v7 = vld [vmem:[#allocation82_spill] sm:$0xff] (!%p1563_p5)  ;;  %v6242_v55 = vld [vmem:[#allocation81_spill] sm:$0xff] (!%p1563_p5)  ;;  %vm6265_vm5 = vcmp.eq.s32.totalorder (!%p1563_p5), %v2846_v60, 5 }
 0x293   : > { %v6243_v63 = vld [vmem:[#allocation84_spill] sm:$0xff] (!%p1563_p5)  ;;  %v6244_v59 = vld [vmem:[#allocation83_spill] sm:$0xff] (!%p1563_p5)  ;;  %v6245_v35 = vld [vmem:[#allocation86_spill] sm:$0xff] (!%p1563_p5) }
 0x294   : > { %vm1585_vm13 = vcmp.eq.s32.totalorder (!%p1563_p5), %v6243_v63, 5  ;;  %vm1586_vm9 = vcmp.eq.s32.totalorder (!%p1563_p5), %v6244_v59, 5  ;;  %vm1587_vm12 = vcmp.eq.s32.totalorder (!%p1563_p5), %v6245_v35, 5  ;;  %v6246_v51 = vld [vmem:[#allocation85_spill] sm:$0xff] (!%p1563_p5)  ;;  %v6247_v61 = vld [vmem:[#allocation88_spill] sm:$0xff] (!%p1563_p5)  ;;  %v6248_v8 = vld [vmem:[#allocation87_spill] sm:$0xff] (!%p1563_p5) }
 0x295   : > { %vm1588_vm11 = vcmp.eq.s32.totalorder (!%p1563_p5), %v6246_v51, 5  ;;  %vm1589_vm15 = vcmp.eq.s32.totalorder (!%p1563_p5), %v6247_v61, 5  ;;  %vm1590_vm4 = vcmp.eq.s32.totalorder (!%p1563_p5), %v6248_v8, 5  ;;  %v6249_v54 = vld [vmem:[#allocation90_spill] sm:$0xff] (!%p1563_p5)  ;;  %v6250_v32 = vld [vmem:[#allocation89_spill] sm:$0xff] (!%p1563_p5)  ;;  %v6251_v30 = vld [vmem:[#allocation92_spill] sm:$0xff] (!%p1563_p5) }
 0x296   : > { %vm1591_vm14 = vcmp.eq.s32.totalorder (!%p1563_p5), %v6249_v54, 5  ;;  %vm1592_vm8 = vcmp.eq.s32.totalorder (!%p1563_p5), %v6250_v32, 5  ;;  %v6252_v27 = vld [vmem:[#allocation91_spill] sm:$0xff] (!%p1563_p5)  ;;  %v6254_v52 = vld [vmem:[#allocation12_spill] sm:$0xff] (!%p1563_p5)  ;;  %v6255_v2 = vld [vmem:[#allocation13_spill] sm:$0xff] (!%p1563_p5) }
 0x297   : > { %v6253_v12 = vld [vmem:[#allocation11_spill] sm:$0xff] (!%p1563_p5)  ;;  %v1632_v13 = vsel (!%p1563_p5), %vm1568_vm1, %v6254_v52, -inf  ;;  %v1633_v48 = vsel (!%p1563_p5), %vm1569_vm2, %v6255_v2, -inf  ;;  %v6256_v4 = vld [vmem:[#allocation14_spill] sm:$0xff] (!%p1563_p5)  ;;  %v6258_v53 = vld [vmem:[#allocation16_spill] sm:$0xff] (!%p1563_p5)  ;;  %vm6262_vm1 = vcmp.eq.s32.totalorder (!%p1563_p5), %v2804_v56, 5 }
 0x298   : > { %v1631_v62 = vsel %vm1567_vm0, %v6253_v12, -inf  ;;  %v1634_v16 = vsel %vm1570_vm10, %v6256_v4, -inf  ;;  %v6257_v44 = vld [vmem:[#allocation15_spill] sm:$0xff]  ;;  %v1636_v10 = vsel %vm1572_vm7, %v6258_v53, -inf  ;;  %v6259_v26 = vld [vmem:[#allocation17_spill] sm:$0xff]  ;;  %vm6260_vm0 = vcmp.eq.s32.totalorder %v2806_v57, 5 }
 0x299   : > { %v1635_v39 = vsel %vm1571_vm3, %v6257_v44, -inf  ;;  %v1637_v49 = vsel %vm6260_vm0, %v6259_v26, -inf  ;;  %v6261_v0 = vld [vmem:[#allocation18_spill] sm:$0xff]  ;;  %vm1595_vm2 = vcmp.eq.s32.totalorder %v2898_v40, 5  ;;  %v6263_v17 = vld [vmem:[#allocation93_spill] sm:$0xff]  ;;  %v6264_v9 = vld [vmem:[#allocation19_spill] sm:$0xff]  ;;  %v1696_v4 = vmax.f32 %v1632_v13, %v1636_v10 }
 0x29a   : > { %v1638_v45 = vsel %vm6262_vm1, %v6261_v0, -inf  ;;  %v1639_v19 = vsel %vm6265_vm5, %v6264_v9, -inf  ;;  %v6266_v18 = vld [vmem:[#allocation20_spill] sm:$0xff]  ;;  %vm6267_vm7 = vcmp.eq.s32.totalorder %v6235_v31, 5  ;;  %v6268_v46 = vld [vmem:[#allocation21_spill] sm:$0xff]  ;;  %vm6269_vm0 = vcmp.eq.s32.totalorder %v6236_v1, 5 }
 0x29b   : > { %v1640_v11 = vsel %vm6267_vm7, %v6266_v18, -inf  ;;  %v1641_v3 = vsel %vm6269_vm0, %v6268_v46, -inf  ;;  %v6270_v5 = vld [vmem:[#allocation22_spill] sm:$0xff]  ;;  %vm6271_vm1 = vcmp.eq.s32.totalorder %v6237_v47, 5  ;;  %v1695_v2 = vmax.f32 %v1631_v62, %v1635_v39  ;;  %v6273_v53 = vld [vmem:[#allocation23_spill] sm:$0xff]  ;;  %v6275_v26 = vld [vmem:[#allocation24_spill] sm:$0xff] }
 0x29c   : > { %v1642_v12 = vsel %vm6271_vm1, %v6270_v5, -inf  ;;  %v6272_v52 = vld [vmem:[#allocation94_spill] sm:$0xff]  ;;  %v1697_v31 = vmax.f32 %v1633_v48, %v1637_v49  ;;  %v1698_v44 = vmax.f32 %v1634_v16, %v1638_v45  ;;  %vm6274_vm7 = vcmp.eq.s32.totalorder %v2866_v58, 5  ;;  %v6277_v0 = vld [vmem:[#allocation25_spill] sm:$0xff]  ;;  %v6281_v62 = vld [vmem:[#allocation96_spill] sm:$0xff] }
 0x29d   : > { %v1643_v1 = vsel %vm6274_vm7, %v6273_v53, -inf  ;;  %vm6276_vm0 = vcmp.eq.s32.totalorder %v6238_v20, 5  ;;  %vm6278_vm1 = vcmp.eq.s32.totalorder %v6239_v6, 5  ;;  %v6279_v18 = vld [vmem:[#allocation26_spill] sm:$0xff]  ;;  %vm6280_vm10 = vcmp.eq.s32.totalorder %v6240_v50, 5  ;;  %v6282_v13 = vld [vmem:[#allocation95_spill] sm:$0xff] }
 0x29e   : > { %v1644_v47 = vsel %vm6276_vm0, %v6275_v26, -inf  ;;  %v1645_v9 = vsel %vm6278_vm1, %v6277_v0, -inf  ;;  %v1646_v46 = vsel %vm6280_vm10, %v6279_v18, -inf  ;;  %vm1603_vm5 = vcmp.eq.s32.totalorder %v6281_v62, 5  ;;  %v6283_v48 = vld [vmem:[#allocation98_spill] sm:$0xff]  ;;  %v6284_v16 = vld [vmem:[#allocation97_spill] sm:$0xff] }
 0x29f   : > { %vm1604_vm3 = vcmp.eq.s32.totalorder %v6282_v13, 5  ;;  %v1699_v39 = vmax.f32 %v1695_v2, %v1639_v19  ;;  %v1700_v10 = vmax.f32 %v1696_v4, %v1640_v11  ;;  %v1701_v20 = vmax.f32 %v1697_v31, %v1641_v3  ;;  %v6285_v45 = vld [vmem:[#allocation27_spill] sm:$0xff]  ;;  %v6287_v5 = vld [vmem:[#allocation28_spill] sm:$0xff]  ;;  %v6289_v53 = vld [vmem:[#allocation29_spill] sm:$0xff] }
 0x2a0   : > { %v1702_v49 = vmax.f32 %v1698_v44, %v1642_v12  ;;  %vm6286_vm0 = vcmp.eq.s32.totalorder %v6241_v7, 5  ;;  %vm6288_vm1 = vcmp.eq.s32.totalorder %v6242_v55, 5  ;;  %v1649_v26 = vsel %vm1585_vm13, %v6289_v53, -inf  ;;  %v6290_v0 = vld [vmem:[#allocation30_spill] sm:$0xff]  ;;  %v6291_v19 = vld [vmem:[#allocation100_spill] sm:$0xff]  ;;  %v6292_v11 = vld [vmem:[#allocation99_spill] sm:$0xff] }
 0x2a1   : > { %v1647_v6 = vsel %vm6286_vm0, %v6285_v45, -inf  ;;  %v1648_v50 = vsel %vm6288_vm1, %v6287_v5, -inf  ;;  %v1650_v18 = vsel %vm1586_vm9, %v6290_v0, -inf  ;;  %vm1607_vm10 = vcmp.eq.s32.totalorder %v6291_v19, 5  ;;  %v6293_v3 = vld [vmem:[#allocation102_spill] sm:$0xff]  ;;  %v6294_v7 = vld [vmem:[#allocation101_spill] sm:$0xff] }
 0x2a2   : > { %vm1608_vm7 = vcmp.eq.s32.totalorder %v6292_v11, 5  ;;  %vm1609_vm6 = vcmp.eq.s32.totalorder %v6293_v3, 5  ;;  %vm1610_vm0 = vcmp.eq.s32.totalorder %v6294_v7, 5  ;;  %v1703_v12 = vmax.f32 %v1699_v39, %v1643_v1  ;;  %v6295_v31 = vld [vmem:[#allocation31_spill] sm:$0xff]  ;;  %v6296_v44 = vld [vmem:[#allocation32_spill] sm:$0xff]  ;;  %v6297_v45 = vld [vmem:[#allocation33_spill] sm:$0xff] }
 0x2a3   : > { %v1704_v2 = vmax.f32 %v1700_v10, %v1644_v47  ;;  %v1705_v55 = vmax.f32 %v1701_v20, %v1645_v9  ;;  %v1706_v4 = vmax.f32 %v1702_v49, %v1646_v46  ;;  %v1651_v63 = vsel %vm1587_vm12, %v6295_v31, -inf  ;;  %v6298_v53 = vld [vmem:[#allocation34_spill] sm:$0xff]  ;;  %v6299_v1 = vld [vmem:[#allocation104_spill] sm:$0xff]  ;;  %v6300_v47 = vld [vmem:[#allocation103_spill] sm:$0xff] }
 0x2a4   : > { %v1652_v59 = vsel %vm1588_vm11, %v6296_v44, -inf  ;;  %v1653_v5 = vsel %vm1589_vm15, %v6297_v45, -inf  ;;  %v1654_v0 = vsel %vm1590_vm4, %v6298_v53, -inf  ;;  %vm1611_vm13 = vcmp.eq.s32.totalorder %v6299_v1, 5  ;;  %v6301_v9 = vld [vmem:[#allocation106_spill] sm:$0xff]  ;;  %v6302_v35 = vld [vmem:[#allocation105_spill] sm:$0xff] }
 0x2a5   : > { %vm1612_vm9 = vcmp.eq.s32.totalorder %v6300_v47, 5  ;;  %v1707_v46 = vmax.f32 %v1703_v12, %v1647_v6  ;;  %v1708_v39 = vmax.f32 %v1704_v2, %v1648_v50  ;;  %v1709_v51 = vmax.f32 %v1705_v55, %v1649_v26  ;;  %v6303_v20 = vld [vmem:[#allocation35_spill] sm:$0xff]  ;;  %v6304_v49 = vld [vmem:[#allocation36_spill] sm:$0xff]  ;;  %v6305_v31 = vld [vmem:[#allocation37_spill] sm:$0xff] }
 0x2a6   : > { %v1710_v10 = vmax.f32 %v1706_v4, %v1650_v18  ;;  %v1655_v61 = vsel %vm1591_vm14, %v6303_v20, -inf  ;;  %v1656_v8 = vsel %vm1592_vm8, %v6304_v49, -inf  ;;  %vm6306_vm11 = vcmp.eq.s32.totalorder %v6251_v30, 5  ;;  %v6307_v45 = vld [vmem:[#allocation38_spill] sm:$0xff]  ;;  %v6309_v6 = vld [vmem:[#allocation108_spill] sm:$0xff]  ;;  %v6310_v50 = vld [vmem:[#allocation107_spill] sm:$0xff] }
 0x2a7   : > { %v1657_v44 = vsel %vm6306_vm11, %v6305_v31, -inf  ;;  %vm6308_vm15 = vcmp.eq.s32.totalorder %v6252_v27, 5  ;;  %vm1615_vm4 = vcmp.eq.s32.totalorder %v6309_v6, 5  ;;  %v6311_v26 = vld [vmem:[#allocation110_spill] sm:$0xff]  ;;  %v6312_v54 = vld [vmem:[#allocation109_spill] sm:$0xff]  ;;  %v1711_v18 = vmax.f32 %v1707_v46, %v1651_v63  ;;  %v6313_v55 = vld [vmem:[#allocation39_spill] sm:$0xff] }
 0x2a8   : > { %v1658_v53 = vsel %vm6308_vm15, %v6307_v45, -inf  ;;  %v1712_v12 = vmax.f32 %v1708_v39, %v1652_v59  ;;  %v1713_v32 = vmax.f32 %v1709_v51, %v1653_v5  ;;  %v1714_v2 = vmax.f32 %v1710_v10, %v1654_v0  ;;  %v6314_v4 = vld [vmem:[#allocation40_spill] sm:$0xff]  ;;  %v6316_v20 = vld [vmem:[#allocation41_spill] sm:$0xff]  ;;  %v6318_v31 = vld [vmem:[#allocation42_spill] sm:$0xff] }
 0x2a9   : > { %v1659_v30 = vsel %vm1595_vm2, %v6313_v55, -inf  ;;  %vm6315_vm8 = vcmp.eq.s32.totalorder %v2896_v41, 5  ;;  %vm6317_vm11 = vcmp.eq.s32.totalorder %v2902_v38, 5  ;;  %vm6319_vm15 = vcmp.eq.s32.totalorder %v6263_v17, 5  ;;  %v6320_v63 = vld [vmem:[#allocation111_spill] sm:$0xff]  ;;  %v6323_v10 = vld [vmem:[#allocation44_spill] sm:$0xff] }
 0x2aa   : > { %v1660_v27 = vsel %vm6315_vm8, %v6314_v4, -inf  ;;  %v1661_v49 = vsel %vm6317_vm11, %v6316_v20, -inf  ;;  %v1662_v45 = vsel %vm6319_vm15, %v6318_v31, -inf  ;;  %v1715_v59 = vmax.f32 %v1711_v18, %v1655_v61  ;;  %v6321_v39 = vld [vmem:[#allocation43_spill] sm:$0xff]  ;;  %v6325_v55 = vld [vmem:[#allocation45_spill] sm:$0xff]  ;;  %v6327_v20 = vld [vmem:[#allocation46_spill] sm:$0xff] }
 0x2ab   : > { %v1716_v5 = vmax.f32 %v1712_v12, %v1656_v8  ;;  %v1717_v0 = vmax.f32 %v1713_v32, %v1657_v44  ;;  %v1718_v46 = vmax.f32 %v1714_v2, %v1658_v53  ;;  %vm6322_vm8 = vcmp.eq.s32.totalorder %v2906_v36, 5  ;;  %v6329_v61 = vld [vmem:[#allocation112_spill] sm:$0xff]  ;;  %v6330_v12 = vld [vmem:[#allocation47_spill] sm:$0xff] }
 0x2ac   : > { %v1663_v51 = vsel %vm6322_vm8, %v6321_v39, -inf  ;;  %vm6324_vm11 = vcmp.eq.s32.totalorder %v2904_v37, 5  ;;  %vm6326_vm15 = vcmp.eq.s32.totalorder %v2910_v34, 5  ;;  %vm6328_vm12 = vcmp.eq.s32.totalorder %v6272_v52, 5  ;;  %v6331_v2 = vld [vmem:[#allocation48_spill] sm:$0xff]  ;;  %v6332_v39 = vld [vmem:[#allocation49_spill] sm:$0xff] }
 0x2ad   : > { %v1664_v17 = vsel %vm6324_vm11, %v6323_v10, -inf  ;;  %v1665_v4 = vsel %vm6326_vm15, %v6325_v55, -inf  ;;  %v1666_v31 = vsel %vm6328_vm12, %v6327_v20, -inf  ;;  %vm1623_vm2 = vcmp.eq.s32.totalorder %v2954_v21, 5  ;;  %v6334_v55 = vld [vmem:[#allocation50_spill] sm:$0xff]  ;;  %v6339_v62 = vld [vmem:[#allocation115_spill] sm:$0xff] }
 0x2ae   : > { %vm1624_vm1 = vcmp.eq.s32.totalorder %v2952_v22, 5  ;;  %v1719_v8 = vmax.f32 %v1715_v59, %v1659_v30  ;;  %v1720_v44 = vmax.f32 %v1716_v5, %v1660_v27  ;;  %v1721_v53 = vmax.f32 %v1717_v0, %v1661_v49  ;;  %v6336_v30 = vld [vmem:[#allocation114_spill] sm:$0xff]  ;;  %v6337_v27 = vld [vmem:[#allocation113_spill] sm:$0xff]  ;;  %v6338_v49 = vld [vmem:[#allocation116_spill] sm:$0xff] }
 0x2af   : > { %v1722_v18 = vmax.f32 %v1718_v46, %v1662_v45  ;;  %v1667_v32 = vsel %vm1603_vm5, %v6330_v12, -inf  ;;  %v1668_v52 = vsel %vm1604_vm3, %v6331_v2, -inf  ;;  %vm6333_vm12 = vcmp.eq.s32.totalorder %v6283_v48, 5  ;;  %v6340_v0 = vld [vmem:[#allocation51_spill] sm:$0xff]  ;;  %v6341_v46 = vld [vmem:[#allocation52_spill] sm:$0xff]  ;;  %v6342_v12 = vld [vmem:[#allocation53_spill] sm:$0xff] }
 0x2b0   : > { %v1669_v10 = vsel %vm6333_vm12, %v6332_v39, -inf  ;;  %vm6335_vm11 = vcmp.eq.s32.totalorder %v6284_v16, 5  ;;  %vm1627_vm15 = vcmp.eq.s32.totalorder %v6336_v30, 5  ;;  %vm1628_vm8 = vcmp.eq.s32.totalorder %v6337_v27, 5  ;;  %v6343_v39 = vld [vmem:[#allocation54_spill] sm:$0xff] }
 0x2b1   : > { %v1670_v20 = vsel %vm6335_vm11, %v6334_v55, -inf  ;;  %vm1629_vm14 = vcmp.eq.s32.totalorder %v6338_v49, 5  ;;  %vm1630_vm5 = vcmp.eq.s32.totalorder %v6339_v62, 5  ;;  %v1723_v45 = vmax.f32 %v1719_v8, %v1663_v51  ;;  %v6344_v8 = vld [vmem:[#allocation55_spill] sm:$0xff] }
 0x2b2   : > { %v1724_v59 = vmax.f32 %v1720_v44, %v1664_v17  ;;  %v1725_v13 = vmax.f32 %v1721_v53, %v1665_v4  ;;  %v1726_v5 = vmax.f32 %v1722_v18, %v1666_v31  ;;  %v1671_v48 = vsel %vm1607_vm10, %v6340_v0, -inf  ;;  %v6345_v44 = vld [vmem:[#allocation56_spill] sm:$0xff]  ;;  %v6346_v53 = vld [vmem:[#allocation57_spill] sm:$0xff]  ;;  %v6348_v18 = vld [vmem:[#allocation58_spill] sm:$0xff] }
 0x2b3   : > { %v1672_v16 = vsel %vm1608_vm7, %v6341_v46, -inf  ;;  %v1673_v2 = vsel %vm1609_vm6, %v6342_v12, -inf  ;;  %v1674_v55 = vsel %vm1610_vm0, %v6343_v39, -inf  ;;  %v1727_v51 = vmax.f32 %v1723_v45, %v1667_v32  ;;  %v6350_v45 = vld [vmem:[#allocation59_spill] sm:$0xff]  ;;  %v6361_v39 = vld [vmem:[#allocation65_spill] sm:$0xff] }
 0x2b4   : > { %v1728_v17 = vmax.f32 %v1724_v59, %v1668_v52  ;;  %v1729_v4 = vmax.f32 %v1725_v13, %v1669_v10  ;;  %v1730_v31 = vmax.f32 %v1726_v5, %v1670_v20  ;;  %v1675_v19 = vsel %vm1611_vm13, %v6344_v8, -inf  ;;  %v6351_v59 = vld [vmem:[#allocation60_spill] sm:$0xff]  ;;  %v6353_v13 = vld [vmem:[#allocation61_spill] sm:$0xff]  ;;  %v6355_v5 = vld [vmem:[#allocation62_spill] sm:$0xff] }
 0x2b5   : > { %v1676_v11 = vsel %vm1612_vm9, %v6345_v44, -inf  ;;  %vm6347_vm3 = vcmp.eq.s32.totalorder %v6301_v9, 5  ;;  %vm6349_vm6 = vcmp.eq.s32.totalorder %v6302_v35, 5  ;;  %v1731_v32 = vmax.f32 %v1727_v51, %v1671_v48  ;;  %v6357_v12 = vld [vmem:[#allocation63_spill] sm:$0xff]  ;;  %v6366_v44 = vld [vmem:[#allocation68_spill] sm:$0xff] }
 0x2b6   : > { %v1677_v3 = vsel %vm6347_vm3, %v6346_v53, -inf  ;;  %v1678_v7 = vsel %vm6349_vm6, %v6348_v18, -inf  ;;  %v1732_v52 = vmax.f32 %v1728_v17, %v1672_v16  ;;  %v1733_v10 = vmax.f32 %v1729_v4, %v1673_v2  ;;  %v6359_v2 = vld [vmem:[#allocation64_spill] sm:$0xff]  ;;  %v6365_v8 = vld [vmem:[#allocation67_spill] sm:$0xff] }
 0x2b7   : > { %v1734_v20 = vmax.f32 %v1730_v31, %v1674_v55  ;;  %v1679_v1 = vsel %vm1615_vm4, %v6350_v45, -inf  ;;  %vm6352_vm7 = vcmp.eq.s32.totalorder %v6310_v50, 5  ;;  %vm6354_vm10 = vcmp.eq.s32.totalorder %v6311_v26, 5  ;;  %v6363_v55 = vld [vmem:[#allocation66_spill] sm:$0xff] }
 0x2b8   : > { %v1680_v47 = vsel %vm6352_vm7, %v6351_v59, -inf  ;;  %v1681_v9 = vsel %vm6354_vm10, %v6353_v13, -inf  ;;  %vm6356_vm0 = vcmp.eq.s32.totalorder %v6312_v54, 5  ;;  %v1735_v0 = vmax.f32 %v1731_v32, %v1675_v19 }
 0x2b9   : > { %v1682_v35 = vsel %vm6356_vm0, %v6355_v5, -inf  ;;  %v1736_v48 = vmax.f32 %v1732_v52, %v1676_v11  ;;  %v1737_v46 = vmax.f32 %v1733_v10, %v1677_v3  ;;  %v1738_v16 = vmax.f32 %v1734_v20, %v1678_v7  ;;  %v6367_v11 = vld [vmem:[#allocation69_spill] sm:$0xff]  ;;  %v6369_v3 = vld [vmem:[#allocation70_spill] sm:$0xff]  ;;  %v6371_v20 = vld [vmem:[#allocation72_spill] sm:$0xff] }
 0x2ba   : > { %vm6358_vm13 = vcmp.eq.s32.totalorder %v2946_v25, 5  ;;  %vm6360_vm9 = vcmp.eq.s32.totalorder %v6320_v63, 5  ;;  %vm6362_vm4 = vcmp.eq.s32.totalorder %v2950_v23, 5  ;;  %vm6364_vm12 = vcmp.eq.s32.totalorder %v2948_v24, 5 }
 0x2bb   : > { %v1683_v6 = vsel %vm6358_vm13, %v6357_v12, -inf  ;;  %v1684_v50 = vsel %vm6360_vm9, %v6359_v2, -inf  ;;  %v1685_v26 = vsel %vm6362_vm4, %v6361_v39, -inf  ;;  %v1686_v54 = vsel %vm6364_vm12, %v6363_v55, -inf }
 0x2bc   : > { %v1739_v51 = vmax.f32 %v1735_v0, %v1679_v1  ;;  %v1740_v17 = vmax.f32 %v1736_v48, %v1680_v47  ;;  %v1741_v4 = vmax.f32 %v1737_v46, %v1681_v9  ;;  %v1742_v31 = vmax.f32 %v1738_v16, %v1682_v35  ;;  %v6372_v1 = vld [vmem:[#allocation73_spill] sm:$0xff]  ;;  %v6373_v47 = vld [vmem:[#allocation74_spill] sm:$0xff]  ;;  %v6374_v9 = vld [vmem:[#allocation75_spill] sm:$0xff] }
 0x2bd   : > { %v1687_v19 = vsel %vm1623_vm2, %v6365_v8, -inf  ;;  %v1688_v63 = vsel %vm1624_vm1, %v6366_v44, -inf  ;;  %vm6368_vm11 = vcmp.eq.s32.totalorder %v2958_v33, 5  ;;  %vm6370_vm3 = vcmp.eq.s32.totalorder %v6329_v61, 5 }
 0x2be   : > { %v1689_v53 = vsel %vm6368_vm11, %v6367_v11, -inf  ;;  %v1690_v18 = vsel %vm6370_vm3, %v6369_v3, -inf  ;;  %v1743_v7 = vmax.f32 %v1739_v51, %v1683_v6  ;;  %v1744_v32 = vmax.f32 %v1740_v17, %v1684_v50 }
 0x2bf   : > { %v1745_v52 = vmax.f32 %v1741_v4, %v1685_v26  ;;  %v1746_v10 = vmax.f32 %v1742_v31, %v1686_v54  ;;  %v1691_v45 = vsel %vm1627_vm15, %v6371_v20, -inf  ;;  %v1692_v59 = vsel %vm1628_vm8, %v6372_v1, -inf }
 0x2c0   : > { %v1693_v13 = vsel %vm1629_vm14, %v6373_v47, -inf  ;;  %v1694_v61 = vsel %vm1630_vm5, %v6374_v9, -inf  ;;  %v1747_v5 = vmax.f32 %v1743_v7, %v1687_v19  ;;  %v1748_v35 = vmax.f32 %v1744_v32, %v1688_v63 }
 0x2c1   : > { %v1749_v0 = vmax.f32 %v1745_v52, %v1689_v53  ;;  %v1750_v48 = vmax.f32 %v1746_v10, %v1690_v18 }
 0x2c2   : > { %v1751_v46 = vmax.f32 %v1747_v5, %v1691_v45  ;;  %v1752_v16 = vmax.f32 %v1748_v35, %v1692_v59 }
 0x2c3   : > { %v1753_v30 = vmax.f32 %v1749_v0, %v1693_v13  ;;  %v1754_v12 = vmax.f32 %v1750_v48, %v1694_v61 }
 0x2c4   : > { %v1755_v6 = vmax.f32 %v1751_v46, %v1752_v16 }
 0x2c5   : > { %v1756_v2 = vmax.f32 %v1753_v30, %v1754_v12 }
 0x2c7   : > { %v1757_v27 = vmax.f32 %v1755_v6, %v1756_v2 }
 0x2c9   : > { %v1758_v50 = vrot.slane %v1757_v27, 4 }
 0x2cb   : > { %v1759_v39 = vmax.f32 %v1757_v27, %v1758_v50 }
 0x2cd   : > { %v1760_v26 = vrot.slane %v1759_v39, 2 }
 0x2cf   : > { %v1761_v49 = vmax.f32 %v1759_v39, %v1760_v26 }
 0x2d1   : > { %v1762_v55 = vrot.slane %v1761_v49, 1 }
 0x2d3   : > { %v1763_v54 = vmax.f32 %v1761_v49, %v1762_v55 }
 0x2d5   : > { %1764 = vst [vmem:[#allocation3 + $0x5] sm:$0x1] %v1763_v54 }
 0x2d6 PF: > { %p1765_p6 = scmp.le.s32.totalorder %s2633_s13, 6  ;;  %p1766_p7 = scmp.ge.s32.totalorder %s2636_s14, 6 }
 0x2d8   : > { %p1767_p8 = pnand %p1766_p7, %p1765_p6 }
 0x2d9   : > { %vm1771_vm1 = vcmp.eq.s32.totalorder (!%p1767_p8), %v2686_v15, 6  ;;  %vm1772_vm14 = vcmp.eq.s32.totalorder (!%p1767_p8), %v2726_v29, 6  ;;  %vm1773_vm2 = vcmp.eq.s32.totalorder (!%p1767_p8), %v2684_v14, 6  ;;  %vm1774_vm8 = vcmp.eq.s32.totalorder (!%p1767_p8), %v2724_v28, 6  ;;  %v6375_v62 = vld [vmem:[#allocation71_spill] sm:$0xff] (!%p1767_p8)  ;;  %v6376_v51 = vld [vmem:[#allocation77_spill] sm:$0xff] (!%p1767_p8) }
 0x2da   : > { %1770 = sbr.rel (%p1767_p8) target bundleno = 799 (0x31f), region = 64  ;;  %vm1775_vm15 = vcmp.eq.s32.totalorder (!%p1767_p8), %v2766_v43, 6  ;;  %vm1776_vm5 = vcmp.eq.s32.totalorder (!%p1767_p8), %v2764_v42, 6  ;;  %v6377_v17 = vld [vmem:[#allocation76_spill] sm:$0xff] (!%p1767_p8)  ;;  %v6378_v4 = vld [vmem:[#allocation78_spill] sm:$0xff] (!%p1767_p8)  ;;  %v6380_v8 = vld [vmem:[#allocation79_spill] sm:$0xff] (!%p1767_p8) }
 0x2db   : > { %v6379_v31 = vld [vmem:[#allocation80_spill] sm:$0xff] (!%p1767_p8)  ;;  %v6381_v19 = vld [vmem:[#allocation82_spill] sm:$0xff] (!%p1767_p8)  ;;  %v6382_v44 = vld [vmem:[#allocation81_spill] sm:$0xff] (!%p1767_p8)  ;;  %vm6405_vm6 = vcmp.eq.s32.totalorder (!%p1767_p8), %v2846_v60, 6 }
 0x2dc   : > { %v6383_v63 = vld [vmem:[#allocation84_spill] sm:$0xff] (!%p1767_p8)  ;;  %v6384_v11 = vld [vmem:[#allocation83_spill] sm:$0xff] (!%p1767_p8)  ;;  %v6385_v53 = vld [vmem:[#allocation86_spill] sm:$0xff] (!%p1767_p8) }
 0x2dd   : > { %vm1789_vm10 = vcmp.eq.s32.totalorder (!%p1767_p8), %v6383_v63, 6  ;;  %vm1790_vm0 = vcmp.eq.s32.totalorder (!%p1767_p8), %v6384_v11, 6  ;;  %vm1791_vm13 = vcmp.eq.s32.totalorder (!%p1767_p8), %v6385_v53, 6  ;;  %v6386_v3 = vld [vmem:[#allocation85_spill] sm:$0xff] (!%p1767_p8)  ;;  %v6387_v18 = vld [vmem:[#allocation88_spill] sm:$0xff] (!%p1767_p8)  ;;  %v6388_v7 = vld [vmem:[#allocation87_spill] sm:$0xff] (!%p1767_p8) }
 0x2de   : > { %vm1792_vm9 = vcmp.eq.s32.totalorder (!%p1767_p8), %v6386_v3, 6  ;;  %vm1793_vm4 = vcmp.eq.s32.totalorder (!%p1767_p8), %v6387_v18, 6  ;;  %vm1794_vm12 = vcmp.eq.s32.totalorder (!%p1767_p8), %v6388_v7, 6  ;;  %v6389_v32 = vld [vmem:[#allocation90_spill] sm:$0xff] (!%p1767_p8)  ;;  %v6390_v52 = vld [vmem:[#allocation89_spill] sm:$0xff] (!%p1767_p8)  ;;  %v6391_v10 = vld [vmem:[#allocation92_spill] sm:$0xff] (!%p1767_p8) }
 0x2df   : > { %vm1795_vm11 = vcmp.eq.s32.totalorder (!%p1767_p8), %v6389_v32, 6  ;;  %vm1796_vm3 = vcmp.eq.s32.totalorder (!%p1767_p8), %v6390_v52, 6  ;;  %v6392_v20 = vld [vmem:[#allocation91_spill] sm:$0xff] (!%p1767_p8)  ;;  %v6394_v59 = vld [vmem:[#allocation12_spill] sm:$0xff] (!%p1767_p8)  ;;  %v6395_v13 = vld [vmem:[#allocation13_spill] sm:$0xff] (!%p1767_p8) }
 0x2e0   : > { %v6393_v45 = vld [vmem:[#allocation11_spill] sm:$0xff] (!%p1767_p8)  ;;  %v1836_v47 = vsel (!%p1767_p8), %vm1772_vm14, %v6394_v59, -inf  ;;  %v1837_v9 = vsel (!%p1767_p8), %vm1773_vm2, %v6395_v13, -inf  ;;  %v6396_v61 = vld [vmem:[#allocation14_spill] sm:$0xff] (!%p1767_p8)  ;;  %v6398_v48 = vld [vmem:[#allocation16_spill] sm:$0xff] (!%p1767_p8)  ;;  %vm6402_vm14 = vcmp.eq.s32.totalorder (!%p1767_p8), %v2804_v56, 6 }
 0x2e1   : > { %v1835_v1 = vsel %vm1771_vm1, %v6393_v45, -inf  ;;  %v1838_v5 = vsel %vm1774_vm8, %v6396_v61, -inf  ;;  %v6397_v35 = vld [vmem:[#allocation15_spill] sm:$0xff]  ;;  %v1840_v46 = vsel %vm1776_vm5, %v6398_v48, -inf  ;;  %v6399_v16 = vld [vmem:[#allocation17_spill] sm:$0xff]  ;;  %vm6400_vm1 = vcmp.eq.s32.totalorder %v2806_v57, 6 }
 0x2e2   : > { %v1839_v0 = vsel %vm1775_vm15, %v6397_v35, -inf  ;;  %v1841_v30 = vsel %vm6400_vm1, %v6399_v16, -inf  ;;  %v6401_v12 = vld [vmem:[#allocation18_spill] sm:$0xff]  ;;  %vm1799_vm2 = vcmp.eq.s32.totalorder %v2898_v40, 6  ;;  %v6403_v2 = vld [vmem:[#allocation93_spill] sm:$0xff]  ;;  %v6404_v27 = vld [vmem:[#allocation19_spill] sm:$0xff]  ;;  %v1900_v61 = vmax.f32 %v1836_v47, %v1840_v46 }
 0x2e3   : > { %v1842_v6 = vsel %vm6402_vm14, %v6401_v12, -inf  ;;  %v1843_v50 = vsel %vm6405_vm6, %v6404_v27, -inf  ;;  %v6406_v39 = vld [vmem:[#allocation20_spill] sm:$0xff]  ;;  %vm6407_vm5 = vcmp.eq.s32.totalorder %v6375_v62, 6  ;;  %v6408_v49 = vld [vmem:[#allocation21_spill] sm:$0xff]  ;;  %vm6409_vm1 = vcmp.eq.s32.totalorder %v6376_v51, 6 }
 0x2e4   : > { %v1844_v26 = vsel %vm6407_vm5, %v6406_v39, -inf  ;;  %v1845_v55 = vsel %vm6409_vm1, %v6408_v49, -inf  ;;  %v6410_v54 = vld [vmem:[#allocation22_spill] sm:$0xff]  ;;  %vm6411_vm14 = vcmp.eq.s32.totalorder %v6377_v17, 6  ;;  %v1899_v13 = vmax.f32 %v1835_v1, %v1839_v0  ;;  %v6413_v48 = vld [vmem:[#allocation23_spill] sm:$0xff]  ;;  %v6415_v16 = vld [vmem:[#allocation24_spill] sm:$0xff] }
 0x2e5   : > { %v1846_v45 = vsel %vm6411_vm14, %v6410_v54, -inf  ;;  %v6412_v59 = vld [vmem:[#allocation94_spill] sm:$0xff]  ;;  %v1901_v62 = vmax.f32 %v1837_v9, %v1841_v30  ;;  %v1902_v35 = vmax.f32 %v1838_v5, %v1842_v6  ;;  %vm6414_vm5 = vcmp.eq.s32.totalorder %v2866_v58, 6  ;;  %v6417_v12 = vld [vmem:[#allocation25_spill] sm:$0xff]  ;;  %v6421_v1 = vld [vmem:[#allocation96_spill] sm:$0xff] }
 0x2e6   : > { %v1847_v51 = vsel %vm6414_vm5, %v6413_v48, -inf  ;;  %vm6416_vm1 = vcmp.eq.s32.totalorder %v6378_v4, 6  ;;  %vm6418_vm14 = vcmp.eq.s32.totalorder %v6379_v31, 6  ;;  %v6419_v39 = vld [vmem:[#allocation26_spill] sm:$0xff]  ;;  %vm6420_vm8 = vcmp.eq.s32.totalorder %v6380_v8, 6  ;;  %v6422_v47 = vld [vmem:[#allocation95_spill] sm:$0xff] }
 0x2e7   : > { %v1848_v17 = vsel %vm6416_vm1, %v6415_v16, -inf  ;;  %v1849_v27 = vsel %vm6418_vm14, %v6417_v12, -inf  ;;  %v1850_v49 = vsel %vm6420_vm8, %v6419_v39, -inf  ;;  %vm1807_vm6 = vcmp.eq.s32.totalorder %v6421_v1, 6  ;;  %v6423_v9 = vld [vmem:[#allocation98_spill] sm:$0xff]  ;;  %v6424_v5 = vld [vmem:[#allocation97_spill] sm:$0xff] }
 0x2e8   : > { %vm1808_vm15 = vcmp.eq.s32.totalorder %v6422_v47, 6  ;;  %v1903_v0 = vmax.f32 %v1899_v13, %v1843_v50  ;;  %v1904_v46 = vmax.f32 %v1900_v61, %v1844_v26  ;;  %v1905_v4 = vmax.f32 %v1901_v62, %v1845_v55  ;;  %v6425_v6 = vld [vmem:[#allocation27_spill] sm:$0xff]  ;;  %v6427_v54 = vld [vmem:[#allocation28_spill] sm:$0xff]  ;;  %v6429_v48 = vld [vmem:[#allocation29_spill] sm:$0xff] }
 0x2e9   : > { %v1906_v30 = vmax.f32 %v1902_v35, %v1846_v45  ;;  %vm6426_vm1 = vcmp.eq.s32.totalorder %v6381_v19, 6  ;;  %vm6428_vm14 = vcmp.eq.s32.totalorder %v6382_v44, 6  ;;  %v1853_v16 = vsel %vm1789_vm10, %v6429_v48, -inf  ;;  %v6430_v12 = vld [vmem:[#allocation30_spill] sm:$0xff]  ;;  %v6431_v50 = vld [vmem:[#allocation100_spill] sm:$0xff]  ;;  %v6432_v26 = vld [vmem:[#allocation99_spill] sm:$0xff] }
 0x2ea   : > { %v1851_v31 = vsel %vm6426_vm1, %v6425_v6, -inf  ;;  %v1852_v8 = vsel %vm6428_vm14, %v6427_v54, -inf  ;;  %v1854_v39 = vsel %vm1790_vm0, %v6430_v12, -inf  ;;  %vm1811_vm8 = vcmp.eq.s32.totalorder %v6431_v50, 6  ;;  %v6433_v55 = vld [vmem:[#allocation102_spill] sm:$0xff]  ;;  %v6434_v19 = vld [vmem:[#allocation101_spill] sm:$0xff] }
 0x2eb   : > { %vm1812_vm5 = vcmp.eq.s32.totalorder %v6432_v26, 6  ;;  %vm1813_vm7 = vcmp.eq.s32.totalorder %v6433_v55, 6  ;;  %vm1814_vm1 = vcmp.eq.s32.totalorder %v6434_v19, 6  ;;  %v1907_v45 = vmax.f32 %v1903_v0, %v1847_v51  ;;  %v6435_v62 = vld [vmem:[#allocation31_spill] sm:$0xff]  ;;  %v6436_v35 = vld [vmem:[#allocation32_spill] sm:$0xff]  ;;  %v6437_v6 = vld [vmem:[#allocation33_spill] sm:$0xff] }
 0x2ec   : > { %v1908_v13 = vmax.f32 %v1904_v46, %v1848_v17  ;;  %v1909_v44 = vmax.f32 %v1905_v4, %v1849_v27  ;;  %v1910_v61 = vmax.f32 %v1906_v30, %v1850_v49  ;;  %v1855_v63 = vsel %vm1791_vm13, %v6435_v62, -inf  ;;  %v6438_v48 = vld [vmem:[#allocation34_spill] sm:$0xff]  ;;  %v6439_v51 = vld [vmem:[#allocation104_spill] sm:$0xff]  ;;  %v6440_v17 = vld [vmem:[#allocation103_spill] sm:$0xff] }
 0x2ed   : > { %v1856_v11 = vsel %vm1792_vm9, %v6436_v35, -inf  ;;  %v1857_v54 = vsel %vm1793_vm4, %v6437_v6, -inf  ;;  %v1858_v12 = vsel %vm1794_vm12, %v6438_v48, -inf  ;;  %vm1815_vm10 = vcmp.eq.s32.totalorder %v6439_v51, 6  ;;  %v6441_v27 = vld [vmem:[#allocation106_spill] sm:$0xff]  ;;  %v6442_v53 = vld [vmem:[#allocation105_spill] sm:$0xff] }
 0x2ee   : > { %vm1816_vm0 = vcmp.eq.s32.totalorder %v6440_v17, 6  ;;  %v1911_v49 = vmax.f32 %v1907_v45, %v1851_v31  ;;  %v1912_v0 = vmax.f32 %v1908_v13, %v1852_v8  ;;  %v1913_v3 = vmax.f32 %v1909_v44, %v1853_v16  ;;  %v6443_v4 = vld [vmem:[#allocation35_spill] sm:$0xff]  ;;  %v6444_v30 = vld [vmem:[#allocation36_spill] sm:$0xff]  ;;  %v6445_v62 = vld [vmem:[#allocation37_spill] sm:$0xff] }
 0x2ef   : > { %v1914_v46 = vmax.f32 %v1910_v61, %v1854_v39  ;;  %v1859_v18 = vsel %vm1795_vm11, %v6443_v4, -inf  ;;  %v1860_v7 = vsel %vm1796_vm3, %v6444_v30, -inf  ;;  %vm6446_vm9 = vcmp.eq.s32.totalorder %v6391_v10, 6  ;;  %v6447_v6 = vld [vmem:[#allocation38_spill] sm:$0xff]  ;;  %v6449_v31 = vld [vmem:[#allocation108_spill] sm:$0xff]  ;;  %v6450_v8 = vld [vmem:[#allocation107_spill] sm:$0xff] }
 0x2f0   : > { %v1861_v35 = vsel %vm6446_vm9, %v6445_v62, -inf  ;;  %vm6448_vm4 = vcmp.eq.s32.totalorder %v6392_v20, 6  ;;  %vm1819_vm12 = vcmp.eq.s32.totalorder %v6449_v31, 6  ;;  %v6451_v16 = vld [vmem:[#allocation110_spill] sm:$0xff]  ;;  %v6452_v32 = vld [vmem:[#allocation109_spill] sm:$0xff]  ;;  %v1915_v39 = vmax.f32 %v1911_v49, %v1855_v63  ;;  %v6453_v44 = vld [vmem:[#allocation39_spill] sm:$0xff] }
 0x2f1   : > { %v1862_v48 = vsel %vm6448_vm4, %v6447_v6, -inf  ;;  %v1916_v45 = vmax.f32 %v1912_v0, %v1856_v11  ;;  %v1917_v52 = vmax.f32 %v1913_v3, %v1857_v54  ;;  %v1918_v13 = vmax.f32 %v1914_v46, %v1858_v12  ;;  %v6454_v61 = vld [vmem:[#allocation40_spill] sm:$0xff]  ;;  %v6456_v4 = vld [vmem:[#allocation41_spill] sm:$0xff]  ;;  %v6458_v62 = vld [vmem:[#allocation42_spill] sm:$0xff] }
 0x2f2   : > { %v1863_v10 = vsel %vm1799_vm2, %v6453_v44, -inf  ;;  %vm6455_vm3 = vcmp.eq.s32.totalorder %v2896_v41, 6  ;;  %vm6457_vm9 = vcmp.eq.s32.totalorder %v2902_v38, 6  ;;  %vm6459_vm4 = vcmp.eq.s32.totalorder %v6403_v2, 6  ;;  %v6460_v63 = vld [vmem:[#allocation111_spill] sm:$0xff]  ;;  %v6463_v46 = vld [vmem:[#allocation44_spill] sm:$0xff] }
 0x2f3   : > { %v1864_v20 = vsel %vm6455_vm3, %v6454_v61, -inf  ;;  %v1865_v30 = vsel %vm6457_vm9, %v6456_v4, -inf  ;;  %v1866_v6 = vsel %vm6459_vm4, %v6458_v62, -inf  ;;  %v1919_v11 = vmax.f32 %v1915_v39, %v1859_v18  ;;  %v6461_v0 = vld [vmem:[#allocation43_spill] sm:$0xff]  ;;  %v6465_v44 = vld [vmem:[#allocation45_spill] sm:$0xff]  ;;  %v6467_v4 = vld [vmem:[#allocation46_spill] sm:$0xff] }
 0x2f4   : > { %v1920_v54 = vmax.f32 %v1916_v45, %v1860_v7  ;;  %v1921_v12 = vmax.f32 %v1917_v52, %v1861_v35  ;;  %v1922_v49 = vmax.f32 %v1918_v13, %v1862_v48  ;;  %vm6462_vm3 = vcmp.eq.s32.totalorder %v2906_v36, 6  ;;  %v6469_v18 = vld [vmem:[#allocation112_spill] sm:$0xff]  ;;  %v6470_v45 = vld [vmem:[#allocation47_spill] sm:$0xff] }
 0x2f5   : > { %v1867_v3 = vsel %vm6462_vm3, %v6461_v0, -inf  ;;  %vm6464_vm9 = vcmp.eq.s32.totalorder %v2904_v37, 6  ;;  %vm6466_vm4 = vcmp.eq.s32.totalorder %v2910_v34, 6  ;;  %vm6468_vm13 = vcmp.eq.s32.totalorder %v6412_v59, 6  ;;  %v6471_v13 = vld [vmem:[#allocation48_spill] sm:$0xff]  ;;  %v6472_v0 = vld [vmem:[#allocation49_spill] sm:$0xff] }
 0x2f6   : > { %v1868_v2 = vsel %vm6464_vm9, %v6463_v46, -inf  ;;  %v1869_v61 = vsel %vm6466_vm4, %v6465_v44, -inf  ;;  %v1870_v62 = vsel %vm6468_vm13, %v6467_v4, -inf  ;;  %vm1827_vm2 = vcmp.eq.s32.totalorder %v2954_v21, 6  ;;  %v6474_v44 = vld [vmem:[#allocation50_spill] sm:$0xff]  ;;  %v6479_v1 = vld [vmem:[#allocation115_spill] sm:$0xff] }
 0x2f7   : > { %vm1828_vm14 = vcmp.eq.s32.totalorder %v2952_v22, 6  ;;  %v1923_v7 = vmax.f32 %v1919_v11, %v1863_v10  ;;  %v1924_v35 = vmax.f32 %v1920_v54, %v1864_v20  ;;  %v1925_v48 = vmax.f32 %v1921_v12, %v1865_v30  ;;  %v6476_v10 = vld [vmem:[#allocation114_spill] sm:$0xff]  ;;  %v6477_v20 = vld [vmem:[#allocation113_spill] sm:$0xff]  ;;  %v6478_v30 = vld [vmem:[#allocation116_spill] sm:$0xff] }
 0x2f8   : > { %v1926_v39 = vmax.f32 %v1922_v49, %v1866_v6  ;;  %v1871_v52 = vsel %vm1807_vm6, %v6470_v45, -inf  ;;  %v1872_v59 = vsel %vm1808_vm15, %v6471_v13, -inf  ;;  %vm6473_vm13 = vcmp.eq.s32.totalorder %v6423_v9, 6  ;;  %v6480_v12 = vld [vmem:[#allocation51_spill] sm:$0xff]  ;;  %v6481_v49 = vld [vmem:[#allocation52_spill] sm:$0xff]  ;;  %v6482_v45 = vld [vmem:[#allocation53_spill] sm:$0xff] }
 0x2f9   : > { %v1873_v46 = vsel %vm6473_vm13, %v6472_v0, -inf  ;;  %vm6475_vm9 = vcmp.eq.s32.totalorder %v6424_v5, 6  ;;  %vm1831_vm4 = vcmp.eq.s32.totalorder %v6476_v10, 6  ;;  %vm1832_vm3 = vcmp.eq.s32.totalorder %v6477_v20, 6  ;;  %v6483_v0 = vld [vmem:[#allocation54_spill] sm:$0xff] }
 0x2fa   : > { %v1874_v4 = vsel %vm6475_vm9, %v6474_v44, -inf  ;;  %vm1833_vm11 = vcmp.eq.s32.totalorder %v6478_v30, 6  ;;  %vm1834_vm6 = vcmp.eq.s32.totalorder %v6479_v1, 6  ;;  %v1927_v6 = vmax.f32 %v1923_v7, %v1867_v3  ;;  %v6484_v7 = vld [vmem:[#allocation55_spill] sm:$0xff] }
 0x2fb   : > { %v1928_v11 = vmax.f32 %v1924_v35, %v1868_v2  ;;  %v1929_v47 = vmax.f32 %v1925_v48, %v1869_v61  ;;  %v1930_v54 = vmax.f32 %v1926_v39, %v1870_v62  ;;  %v1875_v9 = vsel %vm1811_vm8, %v6480_v12, -inf  ;;  %v6485_v35 = vld [vmem:[#allocation56_spill] sm:$0xff]  ;;  %v6486_v48 = vld [vmem:[#allocation57_spill] sm:$0xff]  ;;  %v6488_v39 = vld [vmem:[#allocation58_spill] sm:$0xff] }
 0x2fc   : > { %v1876_v5 = vsel %vm1812_vm5, %v6481_v49, -inf  ;;  %v1877_v13 = vsel %vm1813_vm7, %v6482_v45, -inf  ;;  %v1878_v44 = vsel %vm1814_vm1, %v6483_v0, -inf  ;;  %v1931_v3 = vmax.f32 %v1927_v6, %v1871_v52  ;;  %v6490_v6 = vld [vmem:[#allocation59_spill] sm:$0xff]  ;;  %v6501_v0 = vld [vmem:[#allocation65_spill] sm:$0xff] }
 0x2fd   : > { %v1932_v2 = vmax.f32 %v1928_v11, %v1872_v59  ;;  %v1933_v61 = vmax.f32 %v1929_v47, %v1873_v46  ;;  %v1934_v62 = vmax.f32 %v1930_v54, %v1874_v4  ;;  %v1879_v50 = vsel %vm1815_vm10, %v6484_v7, -inf  ;;  %v6491_v11 = vld [vmem:[#allocation60_spill] sm:$0xff]  ;;  %v6493_v47 = vld [vmem:[#allocation61_spill] sm:$0xff]  ;;  %v6495_v54 = vld [vmem:[#allocation62_spill] sm:$0xff] }
 0x2fe   : > { %v1880_v26 = vsel %vm1816_vm0, %v6485_v35, -inf  ;;  %vm6487_vm15 = vcmp.eq.s32.totalorder %v6441_v27, 6  ;;  %vm6489_vm7 = vcmp.eq.s32.totalorder %v6442_v53, 6  ;;  %v1935_v52 = vmax.f32 %v1931_v3, %v1875_v9  ;;  %v6497_v45 = vld [vmem:[#allocation63_spill] sm:$0xff]  ;;  %v6506_v35 = vld [vmem:[#allocation68_spill] sm:$0xff] }
 0x2ff   : > { %v1881_v55 = vsel %vm6487_vm15, %v6486_v48, -inf  ;;  %v1882_v19 = vsel %vm6489_vm7, %v6488_v39, -inf  ;;  %v1936_v59 = vmax.f32 %v1932_v2, %v1876_v5  ;;  %v1937_v46 = vmax.f32 %v1933_v61, %v1877_v13  ;;  %v6499_v13 = vld [vmem:[#allocation64_spill] sm:$0xff]  ;;  %v6505_v7 = vld [vmem:[#allocation67_spill] sm:$0xff] }
 0x300   : > { %v1938_v4 = vmax.f32 %v1934_v62, %v1878_v44  ;;  %v1883_v51 = vsel %vm1819_vm12, %v6490_v6, -inf  ;;  %vm6492_vm5 = vcmp.eq.s32.totalorder %v6450_v8, 6  ;;  %vm6494_vm8 = vcmp.eq.s32.totalorder %v6451_v16, 6  ;;  %v6503_v44 = vld [vmem:[#allocation66_spill] sm:$0xff] }
 0x301   : > { %v1884_v17 = vsel %vm6492_vm5, %v6491_v11, -inf  ;;  %v1885_v27 = vsel %vm6494_vm8, %v6493_v47, -inf  ;;  %vm6496_vm1 = vcmp.eq.s32.totalorder %v6452_v32, 6  ;;  %v1939_v12 = vmax.f32 %v1935_v52, %v1879_v50 }
 0x302   : > { %v1886_v53 = vsel %vm6496_vm1, %v6495_v54, -inf  ;;  %v1940_v9 = vmax.f32 %v1936_v59, %v1880_v26  ;;  %v1941_v49 = vmax.f32 %v1937_v46, %v1881_v55  ;;  %v1942_v5 = vmax.f32 %v1938_v4, %v1882_v19  ;;  %v6507_v26 = vld [vmem:[#allocation69_spill] sm:$0xff]  ;;  %v6509_v55 = vld [vmem:[#allocation70_spill] sm:$0xff]  ;;  %v6511_v4 = vld [vmem:[#allocation72_spill] sm:$0xff] }
 0x303   : > { %vm6498_vm10 = vcmp.eq.s32.totalorder %v2946_v25, 6  ;;  %vm6500_vm0 = vcmp.eq.s32.totalorder %v6460_v63, 6  ;;  %vm6502_vm12 = vcmp.eq.s32.totalorder %v2950_v23, 6  ;;  %vm6504_vm13 = vcmp.eq.s32.totalorder %v2948_v24, 6 }
 0x304   : > { %v1887_v31 = vsel %vm6498_vm10, %v6497_v45, -inf  ;;  %v1888_v8 = vsel %vm6500_vm0, %v6499_v13, -inf  ;;  %v1889_v16 = vsel %vm6502_vm12, %v6501_v0, -inf  ;;  %v1890_v32 = vsel %vm6504_vm13, %v6503_v44, -inf }
 0x305   : > { %v1943_v3 = vmax.f32 %v1939_v12, %v1883_v51  ;;  %v1944_v2 = vmax.f32 %v1940_v9, %v1884_v17  ;;  %v1945_v61 = vmax.f32 %v1941_v49, %v1885_v27  ;;  %v1946_v62 = vmax.f32 %v1942_v5, %v1886_v53  ;;  %v6512_v51 = vld [vmem:[#allocation73_spill] sm:$0xff]  ;;  %v6513_v17 = vld [vmem:[#allocation74_spill] sm:$0xff]  ;;  %v6514_v27 = vld [vmem:[#allocation75_spill] sm:$0xff] }
 0x306   : > { %v1891_v50 = vsel %vm1827_vm2, %v6505_v7, -inf  ;;  %v1892_v63 = vsel %vm1828_vm14, %v6506_v35, -inf  ;;  %vm6508_vm9 = vcmp.eq.s32.totalorder %v2958_v33, 6  ;;  %vm6510_vm15 = vcmp.eq.s32.totalorder %v6469_v18, 6 }
 0x307   : > { %v1893_v48 = vsel %vm6508_vm9, %v6507_v26, -inf  ;;  %v1894_v39 = vsel %vm6510_vm15, %v6509_v55, -inf  ;;  %v1947_v19 = vmax.f32 %v1943_v3, %v1887_v31  ;;  %v1948_v52 = vmax.f32 %v1944_v2, %v1888_v8 }
 0x308   : > { %v1949_v59 = vmax.f32 %v1945_v61, %v1889_v16  ;;  %v1950_v46 = vmax.f32 %v1946_v62, %v1890_v32  ;;  %v1895_v6 = vsel %vm1831_vm4, %v6511_v4, -inf  ;;  %v1896_v11 = vsel %vm1832_vm3, %v6512_v51, -inf }
 0x309   : > { %v1897_v47 = vsel %vm1833_vm11, %v6513_v17, -inf  ;;  %v1898_v18 = vsel %vm1834_vm6, %v6514_v27, -inf  ;;  %v1951_v54 = vmax.f32 %v1947_v19, %v1891_v50  ;;  %v1952_v53 = vmax.f32 %v1948_v52, %v1892_v63 }
 0x30a   : > { %v1953_v12 = vmax.f32 %v1949_v59, %v1893_v48  ;;  %v1954_v9 = vmax.f32 %v1950_v46, %v1894_v39 }
 0x30b   : > { %v1955_v49 = vmax.f32 %v1951_v54, %v1895_v6  ;;  %v1956_v5 = vmax.f32 %v1952_v53, %v1896_v11 }
 0x30c   : > { %v1957_v10 = vmax.f32 %v1953_v12, %v1897_v47  ;;  %v1958_v45 = vmax.f32 %v1954_v9, %v1898_v18 }
 0x30d   : > { %v1959_v31 = vmax.f32 %v1955_v49, %v1956_v5 }
 0x30e   : > { %v1960_v13 = vmax.f32 %v1957_v10, %v1958_v45 }
 0x310   : > { %v1961_v20 = vmax.f32 %v1959_v31, %v1960_v13 }
 0x312   : > { %v1962_v8 = vrot.slane %v1961_v20, 4 }
 0x314   : > { %v1963_v0 = vmax.f32 %v1961_v20, %v1962_v8 }
 0x316   : > { %v1964_v16 = vrot.slane %v1963_v0, 2 }
 0x318   : > { %v1965_v30 = vmax.f32 %v1963_v0, %v1964_v16 }
 0x31a   : > { %v1966_v44 = vrot.slane %v1965_v30, 1 }
 0x31c   : > { %v1967_v32 = vmax.f32 %v1965_v30, %v1966_v44 }
 0x31e   : > { %1968 = vst [vmem:[#allocation3 + $0x6] sm:$0x1] %v1967_v32 }
 0x31f PF: > { %p1969_p9 = scmp.le.s32.totalorder %s2633_s13, 7  ;;  %p1970_p10 = scmp.ge.s32.totalorder %s2636_s14, 7 }
 0x321   : > { %p1971_p11 = pnand %p1970_p10, %p1969_p9 }
 0x322   : > { %vm1975_vm14 = vcmp.eq.s32.totalorder (!%p1971_p11), %v2686_v15, 7  ;;  %vm1976_vm11 = vcmp.eq.s32.totalorder (!%p1971_p11), %v2726_v29, 7  ;;  %vm1977_vm2 = vcmp.eq.s32.totalorder (!%p1971_p11), %v2684_v14, 7  ;;  %vm1978_vm3 = vcmp.eq.s32.totalorder (!%p1971_p11), %v2724_v28, 7  ;;  %v6515_v1 = vld [vmem:[#allocation71_spill] sm:$0xff] (!%p1971_p11)  ;;  %v6516_v3 = vld [vmem:[#allocation77_spill] sm:$0xff] (!%p1971_p11) }
 0x323   : > { %1974 = sbr.rel (%p1971_p11) target bundleno = 872 (0x368), region = 68  ;;  %vm1979_vm4 = vcmp.eq.s32.totalorder (!%p1971_p11), %v2766_v43, 7  ;;  %vm1980_vm6 = vcmp.eq.s32.totalorder (!%p1971_p11), %v2764_v42, 7  ;;  %v6517_v2 = vld [vmem:[#allocation76_spill] sm:$0xff] (!%p1971_p11)  ;;  %v6518_v61 = vld [vmem:[#allocation78_spill] sm:$0xff] (!%p1971_p11)  ;;  %v6520_v7 = vld [vmem:[#allocation79_spill] sm:$0xff] (!%p1971_p11) }
 0x324   : > { %v6519_v62 = vld [vmem:[#allocation80_spill] sm:$0xff] (!%p1971_p11)  ;;  %v6521_v50 = vld [vmem:[#allocation82_spill] sm:$0xff] (!%p1971_p11)  ;;  %v6522_v35 = vld [vmem:[#allocation81_spill] sm:$0xff] (!%p1971_p11)  ;;  %vm6545_vm7 = vcmp.eq.s32.totalorder (!%p1971_p11), %v2846_v60, 7 }
 0x325   : > { %v6523_v63 = vld [vmem:[#allocation84_spill] sm:$0xff] (!%p1971_p11)  ;;  %v6524_v26 = vld [vmem:[#allocation83_spill] sm:$0xff] (!%p1971_p11)  ;;  %v6525_v48 = vld [vmem:[#allocation86_spill] sm:$0xff] (!%p1971_p11) }
 0x326   : > { %vm1993_vm8 = vcmp.eq.s32.totalorder (!%p1971_p11), %v6523_v63, 7  ;;  %vm1994_vm1 = vcmp.eq.s32.totalorder (!%p1971_p11), %v6524_v26, 7  ;;  %vm1995_vm10 = vcmp.eq.s32.totalorder (!%p1971_p11), %v6525_v48, 7  ;;  %v6526_v55 = vld [vmem:[#allocation85_spill] sm:$0xff] (!%p1971_p11)  ;;  %v6527_v39 = vld [vmem:[#allocation88_spill] sm:$0xff] (!%p1971_p11)  ;;  %v6528_v19 = vld [vmem:[#allocation87_spill] sm:$0xff] (!%p1971_p11) }
 0x327   : > { %vm1996_vm0 = vcmp.eq.s32.totalorder (!%p1971_p11), %v6526_v55, 7  ;;  %vm1997_vm12 = vcmp.eq.s32.totalorder (!%p1971_p11), %v6527_v39, 7  ;;  %vm1998_vm13 = vcmp.eq.s32.totalorder (!%p1971_p11), %v6528_v19, 7  ;;  %v6529_v52 = vld [vmem:[#allocation90_spill] sm:$0xff] (!%p1971_p11)  ;;  %v6530_v59 = vld [vmem:[#allocation89_spill] sm:$0xff] (!%p1971_p11)  ;;  %v6531_v46 = vld [vmem:[#allocation92_spill] sm:$0xff] (!%p1971_p11) }
 0x328   : > { %vm1999_vm9 = vcmp.eq.s32.totalorder (!%p1971_p11), %v6529_v52, 7  ;;  %vm2000_vm15 = vcmp.eq.s32.totalorder (!%p1971_p11), %v6530_v59, 7  ;;  %v6532_v4 = vld [vmem:[#allocation91_spill] sm:$0xff] (!%p1971_p11)  ;;  %v6534_v11 = vld [vmem:[#allocation12_spill] sm:$0xff] (!%p1971_p11)  ;;  %v6535_v47 = vld [vmem:[#allocation13_spill] sm:$0xff] (!%p1971_p11) }
 0x329   : > { %v6533_v6 = vld [vmem:[#allocation11_spill] sm:$0xff] (!%p1971_p11)  ;;  %v2040_v17 = vsel (!%p1971_p11), %vm1976_vm11, %v6534_v11, -inf  ;;  %v2041_v27 = vsel (!%p1971_p11), %vm1977_vm2, %v6535_v47, -inf  ;;  %v6536_v18 = vld [vmem:[#allocation14_spill] sm:$0xff] (!%p1971_p11)  ;;  %v6538_v9 = vld [vmem:[#allocation16_spill] sm:$0xff] (!%p1971_p11)  ;;  %vm6542_vm11 = vcmp.eq.s32.totalorder (!%p1971_p11), %v2804_v56, 7 }
 0x32a   : > { %v2039_v51 = vsel %vm1975_vm14, %v6533_v6, -inf  ;;  %v2042_v54 = vsel %vm1978_vm3, %v6536_v18, -inf  ;;  %v6537_v53 = vld [vmem:[#allocation15_spill] sm:$0xff]  ;;  %v2044_v15 = vsel %vm1980_vm6, %v6538_v9, -inf  ;;  %v6539_v49 = vld [vmem:[#allocation17_spill] sm:$0xff]  ;;  %vm6540_vm14 = vcmp.eq.s32.totalorder %v2806_v57, 7 }
 0x32b   : > { %v2043_v12 = vsel %vm1979_vm4, %v6537_v53, -inf  ;;  %v2045_v29 = vsel %vm6540_vm14, %v6539_v49, -inf  ;;  %v6541_v5 = vld [vmem:[#allocation18_spill] sm:$0xff]  ;;  %vm2003_vm2 = vcmp.eq.s32.totalorder %v2898_v40, 7  ;;  %v6543_v28 = vld [vmem:[#allocation93_spill] sm:$0xff]  ;;  %v6544_v43 = vld [vmem:[#allocation19_spill] sm:$0xff]  ;;  %v2104_v8 = vmax.f32 %v2040_v17, %v2044_v15 }
 0x32c   : > { %v2046_v14 = vsel %vm6542_vm11, %v6541_v5, -inf  ;;  %v2047_v42 = vsel %vm6545_vm7, %v6544_v43, -inf  ;;  %v6546_v10 = vld [vmem:[#allocation20_spill] sm:$0xff]  ;;  %vm6547_vm6 = vcmp.eq.s32.totalorder %v6515_v1, 7  ;;  %v6548_v45 = vld [vmem:[#allocation21_spill] sm:$0xff]  ;;  %vm6549_vm14 = vcmp.eq.s32.totalorder %v6516_v3, 7 }
 0x32d   : > { %v2048_v57 = vsel %vm6547_vm6, %v6546_v10, -inf  ;;  %v2049_v56 = vsel %vm6549_vm14, %v6548_v45, -inf  ;;  %v6550_v31 = vld [vmem:[#allocation22_spill] sm:$0xff]  ;;  %vm6551_vm11 = vcmp.eq.s32.totalorder %v6517_v2, 7  ;;  %v2103_v20 = vmax.f32 %v2039_v51, %v2043_v12  ;;  %v6553_v30 = vld [vmem:[#allocation23_spill] sm:$0xff]  ;;  %v6555_v32 = vld [vmem:[#allocation24_spill] sm:$0xff] }
 0x32e   : > { %v2050_v13 = vsel %vm6551_vm11, %v6550_v31, -inf  ;;  %v6552_v60 = vld [vmem:[#allocation94_spill] sm:$0xff]  ;;  %v2105_v0 = vmax.f32 %v2041_v27, %v2045_v29  ;;  %v2106_v16 = vmax.f32 %v2042_v54, %v2046_v14  ;;  %vm6554_vm6 = vcmp.eq.s32.totalorder %v2866_v58, 7  ;;  %v6557_v3 = vld [vmem:[#allocation25_spill] sm:$0xff]  ;;  %v6561_v51 = vld [vmem:[#allocation96_spill] sm:$0xff] }
 0x32f   : > { %v2051_v44 = vsel %vm6554_vm6, %v6553_v30, -inf  ;;  %vm6556_vm14 = vcmp.eq.s32.totalorder %v6518_v61, 7  ;;  %vm6558_vm11 = vcmp.eq.s32.totalorder %v6519_v62, 7  ;;  %v6559_v6 = vld [vmem:[#allocation26_spill] sm:$0xff]  ;;  %vm6560_vm3 = vcmp.eq.s32.totalorder %v6520_v7, 7  ;;  %v6562_v17 = vld [vmem:[#allocation95_spill] sm:$0xff] }
 0x330   : > { %v2052_v1 = vsel %vm6556_vm14, %v6555_v32, -inf  ;;  %v2053_v2 = vsel %vm6558_vm11, %v6557_v3, -inf  ;;  %v2054_v11 = vsel %vm6560_vm3, %v6559_v6, -inf  ;;  %vm2011_vm7 = vcmp.eq.s32.totalorder %v6561_v51, 7  ;;  %v6563_v47 = vld [vmem:[#allocation98_spill] sm:$0xff]  ;;  %v6564_v58 = vld [vmem:[#allocation97_spill] sm:$0xff] }
 0x331   : > { %vm2012_vm4 = vcmp.eq.s32.totalorder %v6562_v17, 7  ;;  %v2107_v27 = vmax.f32 %v2103_v20, %v2047_v42  ;;  %v2108_v18 = vmax.f32 %v2104_v8, %v2048_v57  ;;  %v2109_v61 = vmax.f32 %v2105_v0, %v2049_v56  ;;  %v6565_v53 = vld [vmem:[#allocation27_spill] sm:$0xff]  ;;  %v6567_v12 = vld [vmem:[#allocation28_spill] sm:$0xff]  ;;  %v6569_v9 = vld [vmem:[#allocation29_spill] sm:$0xff] }
 0x332   : > { %v2110_v54 = vmax.f32 %v2106_v16, %v2050_v13  ;;  %vm6566_vm14 = vcmp.eq.s32.totalorder %v6521_v50, 7  ;;  %vm6568_vm11 = vcmp.eq.s32.totalorder %v6522_v35, 7  ;;  %v2057_v15 = vsel %vm1993_vm8, %v6569_v9, -inf  ;;  %v6570_v49 = vld [vmem:[#allocation30_spill] sm:$0xff]  ;;  %v6571_v5 = vld [vmem:[#allocation100_spill] sm:$0xff]  ;;  %v6572_v14 = vld [vmem:[#allocation99_spill] sm:$0xff] }
 0x333   : > { %v2055_v62 = vsel %vm6566_vm14, %v6565_v53, -inf  ;;  %v2056_v7 = vsel %vm6568_vm11, %v6567_v12, -inf  ;;  %v2058_v29 = vsel %vm1994_vm1, %v6570_v49, -inf  ;;  %vm2015_vm3 = vcmp.eq.s32.totalorder %v6571_v5, 7  ;;  %v6573_v43 = vld [vmem:[#allocation102_spill] sm:$0xff]  ;;  %v6574_v50 = vld [vmem:[#allocation101_spill] sm:$0xff] }
 0x334   : > { %vm2016_vm6 = vcmp.eq.s32.totalorder %v6572_v14, 7  ;;  %vm2017_vm5 = vcmp.eq.s32.totalorder %v6573_v43, 7  ;;  %vm2018_vm14 = vcmp.eq.s32.totalorder %v6574_v50, 7  ;;  %v2111_v42 = vmax.f32 %v2107_v27, %v2051_v44  ;;  %v6575_v45 = vld [vmem:[#allocation31_spill] sm:$0xff]  ;;  %v6576_v56 = vld [vmem:[#allocation32_spill] sm:$0xff]  ;;  %v6577_v31 = vld [vmem:[#allocation33_spill] sm:$0xff] }
 0x335   : > { %v2112_v10 = vmax.f32 %v2108_v18, %v2052_v1  ;;  %v2113_v35 = vmax.f32 %v2109_v61, %v2053_v2  ;;  %v2114_v57 = vmax.f32 %v2110_v54, %v2054_v11  ;;  %v2059_v63 = vsel %vm1995_vm10, %v6575_v45, -inf  ;;  %v6578_v20 = vld [vmem:[#allocation34_spill] sm:$0xff]  ;;  %v6579_v0 = vld [vmem:[#allocation104_spill] sm:$0xff]  ;;  %v6580_v16 = vld [vmem:[#allocation103_spill] sm:$0xff] }
 0x336   : > { %v2060_v26 = vsel %vm1996_vm0, %v6576_v56, -inf  ;;  %v2061_v13 = vsel %vm1997_vm12, %v6577_v31, -inf  ;;  %v2062_v8 = vsel %vm1998_vm13, %v6578_v20, -inf  ;;  %vm2019_vm8 = vcmp.eq.s32.totalorder %v6579_v0, 7  ;;  %v6581_v30 = vld [vmem:[#allocation106_spill] sm:$0xff]  ;;  %v6582_v48 = vld [vmem:[#allocation105_spill] sm:$0xff] }
 0x337   : > { %vm2020_vm1 = vcmp.eq.s32.totalorder %v6580_v16, 7  ;;  %v2115_v44 = vmax.f32 %v2111_v42, %v2055_v62  ;;  %v2116_v32 = vmax.f32 %v2112_v10, %v2056_v7  ;;  %v2117_v55 = vmax.f32 %v2113_v35, %v2057_v15  ;;  %v6583_v3 = vld [vmem:[#allocation35_spill] sm:$0xff]  ;;  %v6584_v2 = vld [vmem:[#allocation36_spill] sm:$0xff]  ;;  %v6585_v6 = vld [vmem:[#allocation37_spill] sm:$0xff] }
 0x338   : > { %v2118_v1 = vmax.f32 %v2114_v57, %v2058_v29  ;;  %v2063_v39 = vsel %vm1999_vm9, %v6583_v3, -inf  ;;  %v2064_v19 = vsel %vm2000_vm15, %v6584_v2, -inf  ;;  %vm6586_vm0 = vcmp.eq.s32.totalorder %v6531_v46, 7  ;;  %v6587_v27 = vld [vmem:[#allocation38_spill] sm:$0xff]  ;;  %v6589_v61 = vld [vmem:[#allocation108_spill] sm:$0xff]  ;;  %v6590_v54 = vld [vmem:[#allocation107_spill] sm:$0xff] }
 0x339   : > { %v2065_v11 = vsel %vm6586_vm0, %v6585_v6, -inf  ;;  %vm6588_vm12 = vcmp.eq.s32.totalorder %v6532_v4, 7  ;;  %vm2023_vm13 = vcmp.eq.s32.totalorder %v6589_v61, 7  ;;  %v6591_v53 = vld [vmem:[#allocation110_spill] sm:$0xff]  ;;  %v6592_v52 = vld [vmem:[#allocation109_spill] sm:$0xff]  ;;  %v2119_v62 = vmax.f32 %v2115_v44, %v2059_v63  ;;  %v6593_v9 = vld [vmem:[#allocation39_spill] sm:$0xff] }
 0x33a   : > { %v2066_v18 = vsel %vm6588_vm12, %v6587_v27, -inf  ;;  %v2120_v12 = vmax.f32 %v2116_v32, %v2060_v26  ;;  %v2121_v59 = vmax.f32 %v2117_v55, %v2061_v13  ;;  %v2122_v7 = vmax.f32 %v2118_v1, %v2062_v8  ;;  %v6594_v15 = vld [vmem:[#allocation40_spill] sm:$0xff]  ;;  %v6596_v49 = vld [vmem:[#allocation41_spill] sm:$0xff]  ;;  %v6598_v42 = vld [vmem:[#allocation42_spill] sm:$0xff] }
 0x33b   : > { %v2067_v46 = vsel %vm2003_vm2, %v6593_v9, -inf  ;;  %vm6595_vm15 = vcmp.eq.s32.totalorder %v2896_v41, 7  ;;  %vm6597_vm0 = vcmp.eq.s32.totalorder %v2902_v38, 7  ;;  %vm6599_vm12 = vcmp.eq.s32.totalorder %v6543_v28, 7  ;;  %v6600_v35 = vld [vmem:[#allocation111_spill] sm:$0xff]  ;;  %v6603_v56 = vld [vmem:[#allocation44_spill] sm:$0xff] }
 0x33c   : > { %v2068_v4 = vsel %vm6595_vm15, %v6594_v15, -inf  ;;  %v2069_v29 = vsel %vm6597_vm0, %v6596_v49, -inf  ;;  %v2070_v10 = vsel %vm6599_vm12, %v6598_v42, -inf  ;;  %v2123_v40 = vmax.f32 %v2119_v62, %v2063_v39  ;;  %v6601_v63 = vld [vmem:[#allocation43_spill] sm:$0xff]  ;;  %v6605_v26 = vld [vmem:[#allocation45_spill] sm:$0xff]  ;;  %v6607_v13 = vld [vmem:[#allocation46_spill] sm:$0xff] }
 0x33d   : > { %v2124_v57 = vmax.f32 %v2120_v12, %v2064_v19  ;;  %v2125_v41 = vmax.f32 %v2121_v59, %v2065_v11  ;;  %v2126_v45 = vmax.f32 %v2122_v7, %v2066_v18  ;;  %vm6602_vm15 = vcmp.eq.s32.totalorder %v2906_v36, 7  ;;  %v6609_v36 = vld [vmem:[#allocation112_spill] sm:$0xff]  ;;  %v6610_v55 = vld [vmem:[#allocation47_spill] sm:$0xff]  ;;  %v6612_v3 = vld [vmem:[#allocation49_spill] sm:$0xff] }
 0x33e   : > { %v2071_v38 = vsel %vm6602_vm15, %v6601_v63, -inf  ;;  %vm6604_vm0 = vcmp.eq.s32.totalorder %v2904_v37, 7  ;;  %vm6606_vm12 = vcmp.eq.s32.totalorder %v2910_v34, 7  ;;  %vm6608_vm10 = vcmp.eq.s32.totalorder %v6552_v60, 7  ;;  %v6611_v1 = vld [vmem:[#allocation48_spill] sm:$0xff]  ;;  %v6614_v2 = vld [vmem:[#allocation50_spill] sm:$0xff] }
 0x33f   : > { %v2072_v28 = vsel %vm6604_vm0, %v6603_v56, -inf  ;;  %v2073_v31 = vsel %vm6606_vm12, %v6605_v26, -inf  ;;  %v2074_v20 = vsel %vm6608_vm10, %v6607_v13, -inf  ;;  %vm2031_vm2 = vcmp.eq.s32.totalorder %v2954_v21, 7  ;;  %v6616_v6 = vld [vmem:[#allocation114_spill] sm:$0xff]  ;;  %v6617_v11 = vld [vmem:[#allocation113_spill] sm:$0xff] }
 0x340   : > { %vm2032_vm11 = vcmp.eq.s32.totalorder %v2952_v22, 7  ;;  %v2127_v8 = vmax.f32 %v2123_v40, %v2067_v46  ;;  %v2128_v44 = vmax.f32 %v2124_v57, %v2068_v4  ;;  %v2129_v37 = vmax.f32 %v2125_v41, %v2069_v29  ;;  %v6618_v27 = vld [vmem:[#allocation116_spill] sm:$0xff]  ;;  %v6619_v51 = vld [vmem:[#allocation115_spill] sm:$0xff]  ;;  %v6622_v9 = vld [vmem:[#allocation53_spill] sm:$0xff] }
 0x341   : > { %v2130_v32 = vmax.f32 %v2126_v45, %v2070_v10  ;;  %v2075_v34 = vsel %vm2011_vm7, %v6610_v55, -inf  ;;  %v2076_v60 = vsel %vm2012_vm4, %v6611_v1, -inf  ;;  %vm6613_vm10 = vcmp.eq.s32.totalorder %v6563_v47, 7  ;;  %v6620_v59 = vld [vmem:[#allocation51_spill] sm:$0xff]  ;;  %v6621_v7 = vld [vmem:[#allocation52_spill] sm:$0xff]  ;;  %v6623_v15 = vld [vmem:[#allocation54_spill] sm:$0xff] }
 0x342   : > { %v2077_v39 = vsel %vm6613_vm10, %v6612_v3, -inf  ;;  %vm6615_vm0 = vcmp.eq.s32.totalorder %v6564_v58, 7  ;;  %vm2035_vm12 = vcmp.eq.s32.totalorder %v6616_v6, 7  ;;  %vm2036_vm15 = vcmp.eq.s32.totalorder %v6617_v11, 7  ;;  %v6624_v40 = vld [vmem:[#allocation55_spill] sm:$0xff]  ;;  %v6625_v57 = vld [vmem:[#allocation56_spill] sm:$0xff] }
 0x343   : > { %v2078_v19 = vsel %vm6615_vm0, %v6614_v2, -inf  ;;  %vm2037_vm9 = vcmp.eq.s32.totalorder %v6618_v27, 7  ;;  %vm2038_vm7 = vcmp.eq.s32.totalorder %v6619_v51, 7  ;;  %v2131_v18 = vmax.f32 %v2127_v8, %v2071_v38  ;;  %v6626_v41 = vld [vmem:[#allocation57_spill] sm:$0xff]  ;;  %v6628_v45 = vld [vmem:[#allocation58_spill] sm:$0xff]  ;;  %v6630_v26 = vld [vmem:[#allocation59_spill] sm:$0xff] }
 0x344   : > { %v2132_v62 = vmax.f32 %v2128_v44, %v2072_v28  ;;  %v2133_v17 = vmax.f32 %v2129_v37, %v2073_v31  ;;  %v2134_v12 = vmax.f32 %v2130_v32, %v2074_v20  ;;  %v2079_v47 = vsel %vm2015_vm3, %v6620_v59, -inf  ;;  %v6631_v31 = vld [vmem:[#allocation60_spill] sm:$0xff]  ;;  %v6633_v13 = vld [vmem:[#allocation61_spill] sm:$0xff]  ;;  %v6635_v20 = vld [vmem:[#allocation62_spill] sm:$0xff] }
 0x345   : > { %v2080_v58 = vsel %vm2016_vm6, %v6621_v7, -inf  ;;  %v2081_v46 = vsel %vm2017_vm5, %v6622_v9, -inf  ;;  %v2082_v4 = vsel %vm2018_vm14, %v6623_v15, -inf  ;;  %v2135_v49 = vmax.f32 %v2131_v18, %v2075_v34  ;;  %v6637_v55 = vld [vmem:[#allocation63_spill] sm:$0xff]  ;;  %v6639_v34 = vld [vmem:[#allocation64_spill] sm:$0xff]  ;;  %v6641_v1 = vld [vmem:[#allocation65_spill] sm:$0xff] }
 0x346   : > { %v2136_v29 = vmax.f32 %v2132_v62, %v2076_v60  ;;  %v2137_v42 = vmax.f32 %v2133_v17, %v2077_v39  ;;  %v2138_v10 = vmax.f32 %v2134_v12, %v2078_v19  ;;  %v2083_v5 = vsel %vm2019_vm8, %v6624_v40, -inf  ;;  %v6643_v60 = vld [vmem:[#allocation66_spill] sm:$0xff]  ;;  %v6645_v18 = vld [vmem:[#allocation67_spill] sm:$0xff]  ;;  %v6646_v62 = vld [vmem:[#allocation68_spill] sm:$0xff] }
 0x347   : > { %v2084_v14 = vsel %vm2020_vm1, %v6625_v57, -inf  ;;  %vm6627_vm4 = vcmp.eq.s32.totalorder %v6581_v30, 7  ;;  %vm6629_vm5 = vcmp.eq.s32.totalorder %v6582_v48, 7  ;;  %v2139_v63 = vmax.f32 %v2135_v49, %v2079_v47  ;;  %v6647_v17 = vld [vmem:[#allocation69_spill] sm:$0xff]  ;;  %v6649_v12 = vld [vmem:[#allocation70_spill] sm:$0xff]  ;;  %v6651_v9 = vld [vmem:[#allocation72_spill] sm:$0xff] }
 0x348   : > { %v2085_v43 = vsel %vm6627_vm4, %v6626_v41, -inf  ;;  %v2086_v50 = vsel %vm6629_vm5, %v6628_v45, -inf  ;;  %v2140_v38 = vmax.f32 %v2136_v29, %v2080_v58  ;;  %v2141_v56 = vmax.f32 %v2137_v42, %v2081_v46  ;;  %v6652_v46 = vld [vmem:[#allocation73_spill] sm:$0xff]  ;;  %v6653_v15 = vld [vmem:[#allocation74_spill] sm:$0xff] }
 0x349   : > { %v2142_v28 = vmax.f32 %v2138_v10, %v2082_v4  ;;  %v2087_v0 = vsel %vm2023_vm13, %v6630_v26, -inf  ;;  %vm6632_vm6 = vcmp.eq.s32.totalorder %v6590_v54, 7  ;;  %vm6634_vm3 = vcmp.eq.s32.totalorder %v6591_v53, 7  ;;  %v6654_v4 = vld [vmem:[#allocation75_spill] sm:$0xff] }
 0x34a   : > { %v2088_v16 = vsel %vm6632_vm6, %v6631_v31, -inf  ;;  %v2089_v30 = vsel %vm6634_vm3, %v6633_v13, -inf  ;;  %vm6636_vm14 = vcmp.eq.s32.totalorder %v6592_v52, 7  ;;  %v2143_v8 = vmax.f32 %v2139_v63, %v2083_v5 }
 0x34b   : > { %v2090_v48 = vsel %vm6636_vm14, %v6635_v20, -inf  ;;  %v2144_v44 = vmax.f32 %v2140_v38, %v2084_v14  ;;  %v2145_v37 = vmax.f32 %v2141_v56, %v2085_v43  ;;  %v2146_v32 = vmax.f32 %v2142_v28, %v2086_v50 }
 0x34c   : > { %vm6638_vm8 = vcmp.eq.s32.totalorder %v2946_v25, 7  ;;  %vm6640_vm1 = vcmp.eq.s32.totalorder %v6600_v35, 7  ;;  %vm6642_vm13 = vcmp.eq.s32.totalorder %v2950_v23, 7  ;;  %vm6644_vm10 = vcmp.eq.s32.totalorder %v2948_v24, 7 }
 0x34d   : > { %v2091_v61 = vsel %vm6638_vm8, %v6637_v55, -inf  ;;  %v2092_v54 = vsel %vm6640_vm1, %v6639_v34, -inf  ;;  %v2093_v53 = vsel %vm6642_vm13, %v6641_v1, -inf  ;;  %v2094_v52 = vsel %vm6644_vm10, %v6643_v60, -inf }
 0x34e   : > { %v2147_v3 = vmax.f32 %v2143_v8, %v2087_v0  ;;  %v2148_v39 = vmax.f32 %v2144_v44, %v2088_v16  ;;  %v2149_v2 = vmax.f32 %v2145_v37, %v2089_v30  ;;  %v2150_v19 = vmax.f32 %v2146_v32, %v2090_v48 }
 0x34f   : > { %v2095_v25 = vsel %vm2031_vm2, %v6645_v18, -inf  ;;  %v2096_v35 = vsel %vm2032_vm11, %v6646_v62, -inf  ;;  %vm6648_vm0 = vcmp.eq.s32.totalorder %v2958_v33, 7  ;;  %vm6650_vm4 = vcmp.eq.s32.totalorder %v6609_v36, 7 }
 0x350   : > { %v2097_v23 = vsel %vm6648_vm0, %v6647_v17, -inf  ;;  %v2098_v24 = vsel %vm6650_vm4, %v6649_v12, -inf  ;;  %v2151_v59 = vmax.f32 %v2147_v3, %v2091_v61  ;;  %v2152_v47 = vmax.f32 %v2148_v39, %v2092_v54 }
 0x351   : > { %v2153_v7 = vmax.f32 %v2149_v2, %v2093_v53  ;;  %v2154_v58 = vmax.f32 %v2150_v19, %v2094_v52  ;;  %v2099_v21 = vsel %vm2035_vm12, %v6651_v9, -inf  ;;  %v2100_v22 = vsel %vm2036_vm15, %v6652_v46, -inf }
 0x352   : > { %v2101_v33 = vsel %vm2037_vm9, %v6653_v15, -inf  ;;  %v2102_v36 = vsel %vm2038_vm7, %v6654_v4, -inf  ;;  %v2155_v49 = vmax.f32 %v2151_v59, %v2095_v25  ;;  %v2156_v29 = vmax.f32 %v2152_v47, %v2096_v35 }
 0x353   : > { %v2157_v42 = vmax.f32 %v2153_v7, %v2097_v23  ;;  %v2158_v10 = vmax.f32 %v2154_v58, %v2098_v24 }
 0x354   : > { %v2159_v40 = vmax.f32 %v2155_v49, %v2099_v21  ;;  %v2160_v5 = vmax.f32 %v2156_v29, %v2100_v22 }
 0x355   : > { %v2161_v6 = vmax.f32 %v2157_v42, %v2101_v33  ;;  %v2162_v57 = vmax.f32 %v2158_v10, %v2102_v36 }
 0x356   : > { %v2163_v14 = vmax.f32 %v2159_v40, %v2160_v5 }
 0x357   : > { %v2164_v41 = vmax.f32 %v2161_v6, %v2162_v57 }
 0x359   : > { %v2165_v11 = vmax.f32 %v2163_v14, %v2164_v41 }
 0x35b   : > { %v2166_v43 = vrot.slane %v2165_v11, 4 }
 0x35d   : > { %v2167_v45 = vmax.f32 %v2165_v11, %v2166_v43 }
 0x35f   : > { %v2168_v50 = vrot.slane %v2167_v45, 2 }
 0x361   : > { %v2169_v27 = vmax.f32 %v2167_v45, %v2168_v50 }
 0x363   : > { %v2170_v63 = vrot.slane %v2169_v27, 1 }
 0x365   : > { %v2171_v38 = vmax.f32 %v2169_v27, %v2170_v63 }
 0x367   : > { %2172 = vst [vmem:[#allocation3 + $0x7] sm:$0x1] %v2171_v38 }
 0x368 PF: > { %v2173_v51 = vld [vmem:[#allocation2] sm:$0xff]  ;;  %p2337_p12 = scmp.ne.s32.totalorder %s2556_s27, 1 }
 0x369   : > { %v2182_v26 = vld [vmem:[%s5110_s4] sm:$0xff] (!%p2337_p12)  ;;  %v2183_v0 = vld [vmem:[%s5110_s4 + $0x8] sm:$0xff] (!%p2337_p12)  ;;  %v2184_v31 = vld [vmem:[%s5110_s4 + $0x10] sm:$0xff] (!%p2337_p12)  ;;  %v2510_v16 = vmov (!%p2337_p12), 0.0|0.0   ;;  %vm2511_vm11 = vmmov (!%p2337_p12), 0   ;;  %v2512_v20 = vmov (!%p2337_p12), 0.0  }
 0x36a   : > { %2394 = vmatprep.subr.bf16.mxu0 (!%p2337_p12), %v2510_v16  ;;  %v2395_v13 = vpack.c.bf16 (!%p2337_p12), %v2183_v0, %v2182_v26  ;;  %v2185_v30 = vld [vmem:[%s5110_s4 + $0x18] sm:$0xff] (!%p2337_p12)  ;;  %2391 = vmatprep.mubr.msk.f32.mxu0 (!%p2337_p12), %vm2511_vm11, %v2512_v20  ;;  %v2186_v8 = vld [vmem:[%s5110_s4 + $0x20] sm:$0xff] (!%p2337_p12)  ;;  %v2187_v44 = vld [vmem:[%s5110_s4 + $0x28] sm:$0xff] (!%p2337_p12)  ;;  %vm2268_vm9 = vcmask (!%p2337_p12), 76800  }
 0x36b   : > { %2180 = sbr.rel (%p2337_p12) target bundleno = 1120 (0x460), region = 72  ;;  %v2398_v48 = vpack.c.bf16 (!%p2337_p12), %v2185_v30, %v2184_v31  ;;  %v2401_v37 = vpack.c.bf16 (!%p2337_p12), %v2187_v44, %v2186_v8  ;;  %v2188_v32 = vld [vmem:[%s5110_s4 + $0x30] sm:$0xff] (!%p2337_p12)  ;;  %v2189_v55 = vld [vmem:[%s5110_s4 + $0x38] sm:$0xff] (!%p2337_p12)  ;;  %v2190_v34 = vld [vmem:[%s5110_s4 + $0x40] sm:$0xff] (!%p2337_p12) }
 0x36c   : > { %2396 = vmatpush3.bf16.msra.mxu0 (!%p2337_p12), %v2395_v13  ;;  %v2404_v61 = vpack.c.bf16 (!%p2337_p12), %v2189_v55, %v2188_v32  ;;  %v2191_v54 = vld [vmem:[%s5110_s4 + $0x48] sm:$0xff] (!%p2337_p12)  ;;  %v2192_v53 = vld [vmem:[%s5110_s4 + $0x50] sm:$0xff] (!%p2337_p12)  ;;  %v2193_v60 = vld [vmem:[%s5110_s4 + $0x58] sm:$0xff] (!%p2337_p12) }
 0x36d   : > { %2397 = vmatprep.subr.bf16.mxu0 (!%p2337_p12), %v2510_v16  ;;  %v2407_v1 = vpack.c.bf16 (!%p2337_p12), %v2191_v54, %v2190_v34  ;;  %v2410_v52 = vpack.c.bf16 (!%p2337_p12), %v2193_v60, %v2192_v53  ;;  %v2194_v3 = vld [vmem:[%s5110_s4 + $0x60] sm:$0xff] (!%p2337_p12)  ;;  %v2195_v39 = vld [vmem:[%s5110_s4 + $0x68] sm:$0xff] (!%p2337_p12)  ;;  %v2196_v19 = vld [vmem:[%s5110_s4 + $0x70] sm:$0xff] (!%p2337_p12) }
 0x36e   : > { %v2174_v56 = vld [vmem:[#allocation3] sm:$0xff]  ;;  %v2413_v2 = vpack.c.bf16 (!%p2337_p12), %v2195_v39, %v2194_v3  ;;  %v2197_v18 = vld [vmem:[%s5110_s4 + $0x78] sm:$0xff] (!%p2337_p12) }
 0x36f   : > { %v2175_v28 = vmax.f32 %v2173_v51, %v2174_v56  ;;  %v2416_v25 = vpack.c.bf16 (!%p2337_p12), %v2197_v18, %v2196_v19 }
 0x370   : > { %2399 = vmatpush3.bf16.msra.mxu0 (!%p2337_p12), %v2398_v48 }
 0x371   : > { %2176 = vst [vmem:[#allocation2] sm:$0xff] %v2175_v28  ;;  %2400 = vmatprep.subr.bf16.mxu0 (!%p2337_p12), %v2510_v16 }
 0x374   : > { %2402 = vmatpush3.bf16.msra.mxu0 %v2401_v37 }
 0x375   : > { %2403 = vmatprep.subr.bf16.mxu0 %v2510_v16 }
 0x378   : > { %2405 = vmatpush3.bf16.msra.mxu0 %v2404_v61  ;;  %v2181_v62 = vld [vmem:[#allocation2] sm:$0xff] }
 0x379   : > { %2406 = vmatprep.subr.bf16.mxu0 %v2510_v16 }
 0x37c   : > { %2408 = vmatpush3.bf16.msra.mxu0 %v2407_v1 }
 0x37d   : > { %2409 = vmatprep.subr.bf16.mxu0 %v2510_v16 }
 0x380   : > { %2411 = vmatpush3.bf16.msra.mxu0 %v2410_v52 }
 0x381   : > { %2412 = vmatprep.subr.bf16.mxu0 %v2510_v16 }
 0x384   : > { %2414 = vmatpush3.bf16.msra.mxu0 %v2413_v2 }
 0x385   : > { %2415 = vmatprep.subr.bf16.mxu0 %v2510_v16 }
 0x388   : > { %2417 = vmatpush3.bf16.msra.mxu0 %v2416_v25 }
 0x38b   : > { %2392 = vmatmul.mubr.f32.vlgmr.msra.gmra.mrb[0].mxu0 %v2181_v62 }
 0x45e   : > { %v2264_v35 = vpop.f32.mrb[0].mxu0 }
 0x45f   : > { %2269 = vst.msk [vmem:[#allocation7] sm:$0xf] %vm2268_vm9, %v2264_v35  ;;  %v2393_v17 = vpop.f32.mrb[1].mxu0 }
 0x460 PF: > { %p2422_p13 = scmp.eq.s32.totalorder %s2556_s27, 1  ;;  %s2513_s23 = smov [#allocation7]  }
 0x461   : > { %s2277_s24 = sshll.u32 %s2513_s23, 4  ;;  %s2278_s24 = int_to_ptr.vmem [resolvable:$true] %s2277_s24 }
 0x462   : > { %s2466_s25 = scalar_lea.vmem %s2278_s24, 64  ;;  %p2473_p3 = scmp.lt.s32.totalorder %s2278_s24, %s2278_s24 }
 0x463   : > { %p2467_p0 = scmp.ne.s32.totalorder %s2278_s24, %s2466_s25  ;;  %p2474_p4 = scmp.lt.s32.totalorder %s2466_s25, %s2466_s25 }
 0x465   : > { %p2468_p1 = pnand %p2467_p0, %p2422_p13  ;;  %p2475_p5 = por %p2474_p4, %p2473_p3 }
 0x467   : > { %p2469_p2 = pneg %p2468_p1 }
 0x469   : > { %p2476_p6 = pnand %p2475_p5, %p2469_p2 }
 0x46b   : > { %2479 = shalt.err (!%p2476_p6)
}
 0x46c   : > { %s2480_s28 = scalar_lea.hbm %s5111_s5, 64 }
 0x46d   : > { %p2481_p7 = scmp.ne.s32.totalorder %s5111_s5, %s2480_s28  ;;  %p2486_p10 = scmp.lt.u32.totalorder %s2480_s28, %s5111_s5 }
 0x46f   : > { %p2482_p8 = pnand %p2481_p7, %p2422_p13 }
 0x471   : > { %p2483_p9 = pneg %p2482_p8 }
 0x473   : > { %p2488_p11 = pnand %p2486_p10, %p2483_p9 }
 0x475   : > { %2491 = shalt.err (!%p2488_p11)
}
 0x476   : > { %2419 = dma.vmem_to_hbm [thread:$0]  (%p2422_p13), %s2278_s24, 64, %s5111_s5, [#allocation8]  }
 0x477   : > { %2499 = dma.done.wait (%p2422_p13), [#allocation8], 64  }
 0x478   : > { %2501 = vsyncadd (%p2422_p13), [#allocation8], 4294967232 }
 0x479 PF: > { %s26_s1 = sadd.s32 1, %s2504_s1  }
 0x47a   : > { %p23_p12 = scmp.ge.s32.totalorder %s26_s1, 4  }
 0x47c   :  { %25 = sbr.rel (!%p23_p12) target bundleno = 26 (0x1a), region = 102 }
 0x483   :  { %2290 = vsyncpa [#allocation8], 1 }
 0x484   :  { %2292 = vsyncpa [#allocation8 + $0x1], 1 }

</bundles_post_ra>
